<compile_context>
chip_gen: v6e
topology: v6e:2x2x1
jax: 0.10.0
libtpu: 0.0.40
codegen_flags: <defaults>
</compile_context>

<pallas_src>
import jax
import jax.numpy as jnp
from jax.experimental import pallas as pl
from jax.experimental.pallas import tpu as pltpu

_LANE = 128
_SUBLANE = 8


def _round_up(n, m):
    return ((n + m - 1) // m) * m


def _vmem_capacity_bytes():
    # Should be per-TensorCore capacity; if the query fails, assume the most
    # conservative case (v7x: 64 MiB per TC).
    try:
        return int(pltpu.get_tpu_info().vmem_capacity_bytes)
    except Exception:
        return 64 << 20


def _mlp_kernel(x_ref,
                w1_ref, b1_ref,
                w2_ref, b2_ref,
                w3_ref, b3_ref,
                w4_ref, b4_ref,
                o_ref, acc_ref):
    """K-tiled layer 1 into an f32 accumulator; layers 2-4 + sigmoid at the last k step."""
    k = pl.program_id(1)

    @pl.when(k == 0)
    def _():
        acc_ref[...] = jnp.zeros_like(acc_ref)

    # layer1 partial: (tb, tk) bf16 @ (tk, 1024) bf16 -> f32 accumulate
    acc_ref[...] += jnp.dot(x_ref[...], w1_ref[...],
                            preferred_element_type=jnp.float32)

    @pl.when(k == pl.num_programs(1) - 1)
    def _():
        # layer1 epilogue: bias + ReLU
        h = jnp.maximum(acc_ref[...] + b1_ref[...], 0.0)
        # layer2: Lin(1024 -> 512) + ReLU (bf16 operands, f32 accumulation)
        h = jnp.dot(h.astype(jnp.bfloat16), w2_ref[...],
                    preferred_element_type=jnp.float32) + b2_ref[...]
        h = jnp.maximum(h, 0.0)
        # layer3: Lin(512 -> 128) + ReLU
        h = jnp.dot(h.astype(jnp.bfloat16), w3_ref[...],
                    preferred_element_type=jnp.float32) + b3_ref[...]
        h = jnp.maximum(h, 0.0)
        # layer4: Lin(128 -> n_out_padded) + Sigmoid (exp + rcp both on the EUP slot)
        z = jnp.dot(h.astype(jnp.bfloat16), w4_ref[...],
                    preferred_element_type=jnp.float32) + b4_ref[...]
        o_ref[...] = pl.reciprocal(1.0 + jnp.exp(-z), approx=True)


def mlp_forward(x, params, *, block_b=256, block_k=512):
    """x: (B, V_H*V_H) float32; params: list of (W, b) with W (in, out), b (1, out) f32."""
    B, K = x.shape
    V_H = params[-1][0].shape[1]

    w1, b1 = params[0]
    w2, b2 = params[1]
    w3, b3 = params[2]
    w4, b4 = params[3]

    # ---- lane-dense final layer: pad layer-4 width to a multiple of 128 ------------
    n_out = _round_up(max(V_H, _LANE), _LANE)
    if n_out != V_H:
        w4 = jnp.pad(w4, ((0, 0), (0, n_out - V_H)))
        b4 = jnp.pad(b4, ((0, 0), (0, n_out - V_H)))

    # ---- K padding (lane-dense x / clean MXU contraction) + K tiling ---------------
    k_pad = _round_up(max(K, _LANE), _LANE)
    tk = min(k_pad, _round_up(max(int(block_k), _LANE), _LANE))
    k_pad = _round_up(k_pad, tk)
    if k_pad != K:
        x = jnp.pad(x, ((0, 0), (0, k_pad - K)))
        w1 = jnp.pad(w1, ((0, k_pad - K), (0, 0)))

    # ---- batch tile sized from the real batch (no 256-row padding for tiny B) ------
    tb = min(_round_up(max(B, 1), _SUBLANE),
             _round_up(max(int(block_b), _SUBLANE), _SUBLANE))
    b_pad = _round_up(max(B, 1), tb)
    if b_pad != B:
        x = jnp.pad(x, ((0, b_pad - B), (0, 0)))

    # ---- bf16 MXU operands (accumulation stays f32 in the kernel) ------------------
    x_bf = x.astype(jnp.bfloat16)
    w1_bf = w1.astype(jnp.bfloat16)
    w2_bf = w2.astype(jnp.bfloat16)
    w3_bf = w3.astype(jnp.bfloat16)
    w4_bf = w4.astype(jnp.bfloat16)
    b1 = b1.astype(jnp.float32)
    b2 = b2.astype(jnp.float32)
    b3 = b3.astype(jnp.float32)
    b4 = b4.astype(jnp.float32)

    grid = (b_pad // tb, k_pad // tk)

    # ---- advisory cost estimate for the XLA scheduler --------------------------------
    flops = 2 * b_pad * (k_pad * 1024 + 1024 * 512 + 512 * 128 + 128 * n_out)
    resident_arrays = [b1, w2_bf, b2, w3_bf, b3, w4_bf, b4]
    resident_bytes = sum(int(a.size) * a.dtype.itemsize for a in resident_arrays)
    w1_bytes = int(w1_bf.size) * 2
    bytes_accessed = resident_bytes + w1_bytes + b_pad * k_pad * 2 + b_pad * n_out * 4
    cost = pl.CostEstimate(flops=flops,
                           transcendentals=b_pad * n_out,
                           bytes_accessed=bytes_accessed)

    def _call(single_buffer_resident):
        def _resident(arr):
            # Full-array block with a constant index map: stays VMEM-resident, DMA'd once.
            if single_buffer_resident:
                return pl.BlockSpec(arr.shape, lambda i, k: (0, 0),
                                    pipeline_mode=pl.Buffered(1))
            return pl.BlockSpec(arr.shape, lambda i, k: (0, 0))

        in_specs = [
            pl.BlockSpec((tb, tk), lambda i, k: (i, k)),        # x: batch- & K-tiled
            pl.BlockSpec((tk, 1024), lambda i, k: (k, 0)),      # W1: K-tiled (pipelined)
            _resident(b1),
            _resident(w2_bf), _resident(b2),
            _resident(w3_bf), _resident(b3),
            _resident(w4_bf), _resident(b4),
        ]
        out_specs = pl.BlockSpec((tb, n_out), lambda i, k: (i, 0))

        # ---- per-TC VMEM budget: resident weights + pipelined tiles + scratch + headroom
        bufs = 1 if single_buffer_resident else 2
        x_tile_bytes = tb * tk * 2
        w1_tile_bytes = tk * 1024 * 2
        out_tile_bytes = tb * n_out * 4
        acc_bytes = tb * 1024 * 4
        act_bytes = tb * (1024 + 512 + 128) * 6      # f32 + bf16 copies of intermediates
        needed = (bufs * resident_bytes
                  + 2 * (x_tile_bytes + w1_tile_bytes + out_tile_bytes)
                  + acc_bytes + act_bytes + (8 << 20))
        vmem_limit = min(max(needed, 16 << 20), (_vmem_capacity_bytes() * 3) // 4)

        return pl.pallas_call(
            _mlp_kernel,
            out_shape=jax.ShapeDtypeStruct((b_pad, n_out), jnp.float32),
            grid=grid,
            in_specs=in_specs,
            out_specs=out_specs,
            scratch_shapes=[pltpu.VMEM((tb, 1024), jnp.float32)],
            compiler_params=pltpu.CompilerParams(
                dimension_semantics=("parallel", "arbitrary"),
                vmem_limit_bytes=int(vmem_limit)),
            cost_estimate=cost,
        )(x_bf, w1_bf, b1, w2_bf, b2, w3_bf, b3, w4_bf, b4)

    try:
        out_padded = jax.block_until_ready(_call(True))
    except Exception:
        # Fallback if this jax build rejects single-buffered (Buffered(1)) resident specs.
        out_padded = jax.block_until_ready(_call(False))

    return out_padded[:B, :V_H]


def init_params(key, V_H):
    """Deterministic init matching nn.Linear default: U(-1/sqrt(fan_in), 1/sqrt(fan_in))."""
    dims = [V_H * V_H, 1024, 512, 128, V_H]
    params = []
    for i in range(4):
        fan_in, fan_out = dims[i], dims[i + 1]
        key, kw, kb = jax.random.split(key, 3)
        bound = 1.0 / jnp.sqrt(jnp.float32(fan_in))
        w = jax.random.uniform(kw, (fan_in, fan_out), jnp.float32, -bound, bound)
        b = jax.random.uniform(kb, (1, fan_out), jnp.float32, -bound, bound)
        params.append((w, b))
    return params


def mlp_reference(x, params):
    """Pure-JAX f32 reference for correctness checking."""
    h = x
    for i, (w, b) in enumerate(params):
        h = h @ w + b
        if i < 3:
            h = jnp.maximum(h, 0.0)
        else:
            h = jax.nn.sigmoid(h)
    return h


if __name__ == "__main__":
    V_H = 8      # input dim = V_H*V_H = 64, output dim = 8
    B = 2        # batch

    key = jax.random.PRNGKey(0)
    key, kx = jax.random.split(key)
    x = jax.random.normal(kx, (B, V_H * V_H), jnp.float32)
    params = init_params(key, V_H)

    out = jax.block_until_ready(mlp_forward(x, params))
    ref = mlp_reference(x, params)

    assert out.shape == (B, V_H), out.shape
    # Tolerance accounts for bf16 MXU operands (f32 accumulation) and the EUP
    # approximate reciprocal (~2^-12 rel err) in the sigmoid, vs the f32 reference.
    assert jnp.allclose(out, ref, atol=2e-2, rtol=2e-2), "mismatch vs reference"

    print("KERNEL_OK")
</pallas_src>

<mosaic_0001>
module attributes {stable_mosaic.version = 11 : i64} {
  func.func @_mlp_kernel(%arg0: i32, %arg1: i32, %arg2: memref<8x128xbf16, #tpu.memory_space<vmem>>, %arg3: memref<128x1024xbf16, #tpu.memory_space<vmem>>, %arg4: memref<1x1024xf32, #tpu.memory_space<vmem>>, %arg5: memref<1024x512xbf16, #tpu.memory_space<vmem>>, %arg6: memref<1x512xf32, #tpu.memory_space<vmem>>, %arg7: memref<512x128xbf16, #tpu.memory_space<vmem>>, %arg8: memref<1x128xf32, #tpu.memory_space<vmem>>, %arg9: memref<128x128xbf16, #tpu.memory_space<vmem>>, %arg10: memref<1x128xf32, #tpu.memory_space<vmem>>, %arg11: memref<8x128xf32, #tpu.memory_space<vmem>>, %arg12: memref<8x1024xf32, #tpu.memory_space<vmem>>) attributes {dimension_semantics = [#tpu.dimension_semantics<parallel>, #tpu.dimension_semantics<arbitrary>], iteration_bounds = array<i64: 1, 1>, scalar_prefetch = 0 : i64, scratch_operands = 1 : i64, tpu.core_type = #tpu.core_type<tc>, window_params = [{transform_indices = @transform_0, window_bounds = array<i64: 8, 128>}, {transform_indices = @transform_1, window_bounds = array<i64: 128, 1024>}, {pipeline_mode = #tpu.pipeline_mode<synchronous>, transform_indices = @transform_2, window_bounds = array<i64: 1, 1024>}, {pipeline_mode = #tpu.pipeline_mode<synchronous>, transform_indices = @transform_3, window_bounds = array<i64: 1024, 512>}, {pipeline_mode = #tpu.pipeline_mode<synchronous>, transform_indices = @transform_4, window_bounds = array<i64: 1, 512>}, {pipeline_mode = #tpu.pipeline_mode<synchronous>, transform_indices = @transform_5, window_bounds = array<i64: 512, 128>}, {pipeline_mode = #tpu.pipeline_mode<synchronous>, transform_indices = @transform_6, window_bounds = array<i64: 1, 128>}, {pipeline_mode = #tpu.pipeline_mode<synchronous>, transform_indices = @transform_7, window_bounds = array<i64: 128, 128>}, {pipeline_mode = #tpu.pipeline_mode<synchronous>, transform_indices = @transform_8, window_bounds = array<i64: 1, 128>}, {transform_indices = @transform_9, window_bounds = array<i64: 8, 128>}]} {
    %c0_i32 = arith.constant 0 : i32
    %0 = arith.cmpi eq, %arg1, %c0_i32 : i32
    %1 = arith.extui %0 : i1 to i32
    %c0_i32_0 = arith.constant 0 : i32
    %2 = arith.cmpi ne, %1, %c0_i32_0 : i32
    scf.if %2 {
      %cst_10 = arith.constant 0.000000e+00 : f32
      %12 = vector.broadcast %cst_10 : f32 to vector<8x1024xf32>
      %c0_11 = arith.constant 0 : index
      %c0_12 = arith.constant 0 : index
      %13 = vector.load %arg12[%c0_11, %c0_12] : memref<8x1024xf32, #tpu.memory_space<vmem>>, vector<8x1024xf32>
      tpu.vector_store %arg12[%c0_11, %c0_12], %12 {strides = array<i32>} : memref<8x1024xf32, #tpu.memory_space<vmem>>, vector<8x1024xf32>,
    } else {
    }
    %c0 = arith.constant 0 : index
    %c0_1 = arith.constant 0 : index
    %3 = vector.load %arg12[%c0, %c0_1] : memref<8x1024xf32, #tpu.memory_space<vmem>>, vector<8x1024xf32>
    %c0_2 = arith.constant 0 : index
    %c0_3 = arith.constant 0 : index
    %4 = vector.load %arg2[%c0_2, %c0_3] : memref<8x128xbf16, #tpu.memory_space<vmem>>, vector<8x128xbf16>
    %c0_4 = arith.constant 0 : index
    %c0_5 = arith.constant 0 : index
    %5 = vector.load %arg3[%c0_4, %c0_5] : memref<128x1024xbf16, #tpu.memory_space<vmem>>, vector<128x1024xbf16>
    %cst = arith.constant dense<0.000000e+00> : vector<8x1024xf32>
    %6 = tpu.matmul %4, %5, %cst {dimension_numbers = #tpu.dot_dimension_numbers<[1], [0], [0], [1], [0, 0, 1, 1], [], []>} : vector<8x128xbf16>, vector<128x1024xbf16>, vector<8x1024xf32> -> vector<8x1024xf32>
    %7 = arith.addf %3, %6 : vector<8x1024xf32>
    %c0_6 = arith.constant 0 : index
    %c0_7 = arith.constant 0 : index
    %8 = vector.load %arg12[%c0_6, %c0_7] : memref<8x1024xf32, #tpu.memory_space<vmem>>, vector<8x1024xf32>
    tpu.vector_store %arg12[%c0_6, %c0_7], %7 {strides = array<i32>} : memref<8x1024xf32, #tpu.memory_space<vmem>>, vector<8x1024xf32>,
    %c0_i32_8 = arith.constant 0 : i32
    %9 = arith.cmpi eq, %arg1, %c0_i32_8 : i32
    %10 = arith.extui %9 : i1 to i32
    %c0_i32_9 = arith.constant 0 : i32
    %11 = arith.cmpi ne, %10, %c0_i32_9 : i32
    scf.if %11 {
      %c0_10 = arith.constant 0 : index
      %c0_11 = arith.constant 0 : index
      %12 = vector.load %arg12[%c0_10, %c0_11] : memref<8x1024xf32, #tpu.memory_space<vmem>>, vector<8x1024xf32>
      %c0_12 = arith.constant 0 : index
      %c0_13 = arith.constant 0 : index
      %13 = vector.load %arg4[%c0_12, %c0_13] : memref<1x1024xf32, #tpu.memory_space<vmem>>, vector<1x1024xf32>
      %14 = vector.broadcast %13 : vector<1x1024xf32> to vector<8x1024xf32>
      %15 = arith.addf %12, %14 : vector<8x1024xf32>
      %cst_14 = arith.constant 0.000000e+00 : f32
      %16 = vector.broadcast %cst_14 : f32 to vector<8x1024xf32>
      %17 = arith.maximumf %15, %16 : vector<8x1024xf32>
      %18 = arith.truncf %17 : vector<8x1024xf32> to vector<8x1024xbf16>
      %c0_15 = arith.constant 0 : index
      %c0_16 = arith.constant 0 : index
      %19 = vector.load %arg5[%c0_15, %c0_16] : memref<1024x512xbf16, #tpu.memory_space<vmem>>, vector<1024x512xbf16>
      %cst_17 = arith.constant dense<0.000000e+00> : vector<8x512xf32>
      %20 = tpu.matmul %18, %19, %cst_17 {dimension_numbers = #tpu.dot_dimension_numbers<[1], [0], [0], [1], [0, 0, 1, 1], [], []>} : vector<8x1024xbf16>, vector<1024x512xbf16>, vector<8x512xf32> -> vector<8x512xf32>
      %c0_18 = arith.constant 0 : index
      %c0_19 = arith.constant 0 : index
      %21 = vector.load %arg6[%c0_18, %c0_19] : memref<1x512xf32, #tpu.memory_space<vmem>>, vector<1x512xf32>
      %22 = vector.broadcast %21 : vector<1x512xf32> to vector<8x512xf32>
      %23 = arith.addf %20, %22 : vector<8x512xf32>
      %cst_20 = arith.constant 0.000000e+00 : f32
      %24 = vector.broadcast %cst_20 : f32 to vector<8x512xf32>
      %25 = arith.maximumf %23, %24 : vector<8x512xf32>
      %26 = arith.truncf %25 : vector<8x512xf32> to vector<8x512xbf16>
      %c0_21 = arith.constant 0 : index
      %c0_22 = arith.constant 0 : index
      %27 = vector.load %arg7[%c0_21, %c0_22] : memref<512x128xbf16, #tpu.memory_space<vmem>>, vector<512x128xbf16>
      %cst_23 = arith.constant dense<0.000000e+00> : vector<8x128xf32>
      %28 = tpu.matmul %26, %27, %cst_23 {dimension_numbers = #tpu.dot_dimension_numbers<[1], [0], [0], [1], [0, 0, 1, 1], [], []>} : vector<8x512xbf16>, vector<512x128xbf16>, vector<8x128xf32> -> vector<8x128xf32>
      %c0_24 = arith.constant 0 : index
      %c0_25 = arith.constant 0 : index
      %29 = vector.load %arg8[%c0_24, %c0_25] : memref<1x128xf32, #tpu.memory_space<vmem>>, vector<1x128xf32>
      %30 = vector.broadcast %29 : vector<1x128xf32> to vector<8x128xf32>
      %31 = arith.addf %28, %30 : vector<8x128xf32>
      %cst_26 = arith.constant 0.000000e+00 : f32
      %32 = vector.broadcast %cst_26 : f32 to vector<8x128xf32>
      %33 = arith.maximumf %31, %32 : vector<8x128xf32>
      %34 = arith.truncf %33 : vector<8x128xf32> to vector<8x128xbf16>
      %c0_27 = arith.constant 0 : index
      %c0_28 = arith.constant 0 : index
      %35 = vector.load %arg9[%c0_27, %c0_28] : memref<128x128xbf16, #tpu.memory_space<vmem>>, vector<128x128xbf16>
      %cst_29 = arith.constant dense<0.000000e+00> : vector<8x128xf32>
      %36 = tpu.matmul %34, %35, %cst_29 {dimension_numbers = #tpu.dot_dimension_numbers<[1], [0], [0], [1], [0, 0, 1, 1], [], []>} : vector<8x128xbf16>, vector<128x128xbf16>, vector<8x128xf32> -> vector<8x128xf32>
      %c0_30 = arith.constant 0 : index
      %c0_31 = arith.constant 0 : index
      %37 = vector.load %arg10[%c0_30, %c0_31] : memref<1x128xf32, #tpu.memory_space<vmem>>, vector<1x128xf32>
      %38 = vector.broadcast %37 : vector<1x128xf32> to vector<8x128xf32>
      %39 = arith.addf %36, %38 : vector<8x128xf32>
      %cst_32 = arith.constant 0.000000e+00 : f32
      %40 = vector.broadcast %cst_32 : f32 to vector<8x128xf32>
      %41 = arith.subf %40, %39 : vector<8x128xf32>
      %42 = math.exp %41 : vector<8x128xf32>
      %cst_33 = arith.constant 1.000000e+00 : f32
      %43 = vector.broadcast %cst_33 : f32 to vector<8x128xf32>
      %44 = arith.addf %43, %42 : vector<8x128xf32>
      %45 = tpu.reciprocal %44 {approx = true} : vector<8x128xf32> -> vector<8x128xf32>
      %c0_34 = arith.constant 0 : index
      %c0_35 = arith.constant 0 : index
      %46 = vector.load %arg11[%c0_34, %c0_35] : memref<8x128xf32, #tpu.memory_space<vmem>>, vector<8x128xf32>
      tpu.vector_store %arg11[%c0_34, %c0_35], %45 {strides = array<i32>} : memref<8x128xf32, #tpu.memory_space<vmem>>, vector<8x128xf32>,
    } else {
    }
    return
  }
  func.func @transform_0(%arg0: i32, %arg1: i32) -> (i32, i32) {
    %c0_i32 = arith.constant 0 : i32
    return %arg0, %arg1 : i32, i32
  }
  func.func @transform_1(%arg0: i32, %arg1: i32) -> (i32, i32) {
    %c0_i32 = arith.constant 0 : i32
    %c0_i32_0 = arith.constant 0 : i32
    return %arg1, %c0_i32 : i32, i32
  }
  func.func @transform_2(%arg0: i32, %arg1: i32) -> (i32, i32) {
    %c0_i32 = arith.constant 0 : i32
    %c0_i32_0 = arith.constant 0 : i32
    %c0_i32_1 = arith.constant 0 : i32
    return %c0_i32, %c0_i32_0 : i32, i32
  }
  func.func @transform_3(%arg0: i32, %arg1: i32) -> (i32, i32) {
    %c0_i32 = arith.constant 0 : i32
    %c0_i32_0 = arith.constant 0 : i32
    %c0_i32_1 = arith.constant 0 : i32
    return %c0_i32, %c0_i32_0 : i32, i32
  }
  func.func @transform_4(%arg0: i32, %arg1: i32) -> (i32, i32) {
    %c0_i32 = arith.constant 0 : i32
    %c0_i32_0 = arith.constant 0 : i32
    %c0_i32_1 = arith.constant 0 : i32
    return %c0_i32, %c0_i32_0 : i32, i32
  }
  func.func @transform_5(%arg0: i32, %arg1: i32) -> (i32, i32) {
    %c0_i32 = arith.constant 0 : i32
    %c0_i32_0 = arith.constant 0 : i32
    %c0_i32_1 = arith.constant 0 : i32
    return %c0_i32, %c0_i32_0 : i32, i32
  }
  func.func @transform_6(%arg0: i32, %arg1: i32) -> (i32, i32) {
    %c0_i32 = arith.constant 0 : i32
    %c0_i32_0 = arith.constant 0 : i32
    %c0_i32_1 = arith.constant 0 : i32
    return %c0_i32, %c0_i32_0 : i32, i32
  }
  func.func @transform_7(%arg0: i32, %arg1: i32) -> (i32, i32) {
    %c0_i32 = arith.constant 0 : i32
    %c0_i32_0 = arith.constant 0 : i32
    %c0_i32_1 = arith.constant 0 : i32
    return %c0_i32, %c0_i32_0 : i32, i32
  }
  func.func @transform_8(%arg0: i32, %arg1: i32) -> (i32, i32) {
    %c0_i32 = arith.constant 0 : i32
    %c0_i32_0 = arith.constant 0 : i32
    %c0_i32_1 = arith.constant 0 : i32
    return %c0_i32, %c0_i32_0 : i32, i32
  }
  func.func @transform_9(%arg0: i32, %arg1: i32) -> (i32, i32) {
    %c0_i32 = arith.constant 0 : i32
    %c0_i32_0 = arith.constant 0 : i32
    return %arg0, %c0_i32 : i32, i32
  }
}

module attributes {stable_mosaic.version = 11 : i64} {
  func.func @_mlp_kernel(%arg0: i32, %arg1: i32, %arg2: memref<8x128xbf16, #tpu.memory_space<vmem>>, %arg3: memref<128x1024xbf16, #tpu.memory_space<vmem>>, %arg4: memref<1x1024xf32, #tpu.memory_space<vmem>>, %arg5: memref<1024x512xbf16, #tpu.memory_space<vmem>>, %arg6: memref<1x512xf32, #tpu.memory_space<vmem>>, %arg7: memref<512x128xbf16, #tpu.memory_space<vmem>>, %arg8: memref<1x128xf32, #tpu.memory_space<vmem>>, %arg9: memref<128x128xbf16, #tpu.memory_space<vmem>>, %arg10: memref<1x128xf32, #tpu.memory_space<vmem>>, %arg11: memref<8x128xf32, #tpu.memory_space<vmem>>, %arg12: memref<8x1024xf32, #tpu.memory_space<vmem>>) attributes {dimension_semantics = [#tpu.dimension_semantics<parallel>, #tpu.dimension_semantics<arbitrary>], iteration_bounds = array<i64: 1, 1>, scalar_prefetch = 0 : i64, scratch_operands = 1 : i64, tpu.core_type = #tpu.core_type<tc>, window_params = [{transform_indices = @transform_0, window_bounds = array<i64: 8, 128>}, {transform_indices = @transform_1, window_bounds = array<i64: 128, 1024>}, {pipeline_mode = #tpu.pipeline_mode<synchronous>, transform_indices = @transform_2, window_bounds = array<i64: 1, 1024>}, {pipeline_mode = #tpu.pipeline_mode<synchronous>, transform_indices = @transform_3, window_bounds = array<i64: 1024, 512>}, {pipeline_mode = #tpu.pipeline_mode<synchronous>, transform_indices = @transform_4, window_bounds = array<i64: 1, 512>}, {pipeline_mode = #tpu.pipeline_mode<synchronous>, transform_indices = @transform_5, window_bounds = array<i64: 512, 128>}, {pipeline_mode = #tpu.pipeline_mode<synchronous>, transform_indices = @transform_6, window_bounds = array<i64: 1, 128>}, {pipeline_mode = #tpu.pipeline_mode<synchronous>, transform_indices = @transform_7, window_bounds = array<i64: 128, 128>}, {pipeline_mode = #tpu.pipeline_mode<synchronous>, transform_indices = @transform_8, window_bounds = array<i64: 1, 128>}, {transform_indices = @transform_9, window_bounds = array<i64: 8, 128>}]} {
    %c0_i32 = arith.constant 0 : i32
    %0 = arith.cmpi eq, %arg1, %c0_i32 : i32
    %1 = arith.extui %0 : i1 to i32
    %c0_i32_0 = arith.constant 0 : i32
    %2 = arith.cmpi ne, %1, %c0_i32_0 : i32
    scf.if %2 {
      %cst_10 = arith.constant 0.000000e+00 : f32
      %12 = vector.broadcast %cst_10 : f32 to vector<8x1024xf32>
      %c0_11 = arith.constant 0 : index
      %c0_12 = arith.constant 0 : index
      %13 = vector.load %arg12[%c0_11, %c0_12] : memref<8x1024xf32, #tpu.memory_space<vmem>>, vector<8x1024xf32>
      tpu.vector_store %arg12[%c0_11, %c0_12], %12 {strides = array<i32>} : memref<8x1024xf32, #tpu.memory_space<vmem>>, vector<8x1024xf32>,
    } else {
    }
    %c0 = arith.constant 0 : index
    %c0_1 = arith.constant 0 : index
    %3 = vector.load %arg12[%c0, %c0_1] : memref<8x1024xf32, #tpu.memory_space<vmem>>, vector<8x1024xf32>
    %c0_2 = arith.constant 0 : index
    %c0_3 = arith.constant 0 : index
    %4 = vector.load %arg2[%c0_2, %c0_3] : memref<8x128xbf16, #tpu.memory_space<vmem>>, vector<8x128xbf16>
    %c0_4 = arith.constant 0 : index
    %c0_5 = arith.constant 0 : index
    %5 = vector.load %arg3[%c0_4, %c0_5] : memref<128x1024xbf16, #tpu.memory_space<vmem>>, vector<128x1024xbf16>
    %cst = arith.constant dense<0.000000e+00> : vector<8x1024xf32>
    %6 = tpu.matmul %4, %5, %cst {dimension_numbers = #tpu.dot_dimension_numbers<[1], [0], [0], [1], [0, 0, 1, 1], [], []>} : vector<8x128xbf16>, vector<128x1024xbf16>, vector<8x1024xf32> -> vector<8x1024xf32>
    %7 = arith.addf %3, %6 : vector<8x1024xf32>
    %c0_6 = arith.constant 0 : index
    %c0_7 = arith.constant 0 : index
    %8 = vector.load %arg12[%c0_6, %c0_7] : memref<8x1024xf32, #tpu.memory_space<vmem>>, vector<8x1024xf32>
    tpu.vector_store %arg12[%c0_6, %c0_7], %7 {strides = array<i32>} : memref<8x1024xf32, #tpu.memory_space<vmem>>, vector<8x1024xf32>,
    %c0_i32_8 = arith.constant 0 : i32
    %9 = arith.cmpi eq, %arg1, %c0_i32_8 : i32
    %10 = arith.extui %9 : i1 to i32
    %c0_i32_9 = arith.constant 0 : i32
    %11 = arith.cmpi ne, %10, %c0_i32_9 : i32
    scf.if %11 {
      %c0_10 = arith.constant 0 : index
      %c0_11 = arith.constant 0 : index
      %12 = vector.load %arg12[%c0_10, %c0_11] : memref<8x1024xf32, #tpu.memory_space<vmem>>, vector<8x1024xf32>
      %c0_12 = arith.constant 0 : index
      %c0_13 = arith.constant 0 : index
      %13 = vector.load %arg4[%c0_12, %c0_13] : memref<1x1024xf32, #tpu.memory_space<vmem>>, vector<1x1024xf32>
      %14 = vector.broadcast %13 : vector<1x1024xf32> to vector<8x1024xf32>
      %15 = arith.addf %12, %14 : vector<8x1024xf32>
      %cst_14 = arith.constant 0.000000e+00 : f32
      %16 = vector.broadcast %cst_14 : f32 to vector<8x1024xf32>
      %17 = arith.maximumf %15, %16 : vector<8x1024xf32>
      %18 = arith.truncf %17 : vector<8x1024xf32> to vector<8x1024xbf16>
      %c0_15 = arith.constant 0 : index
      %c0_16 = arith.constant 0 : index
      %19 = vector.load %arg5[%c0_15, %c0_16] : memref<1024x512xbf16, #tpu.memory_space<vmem>>, vector<1024x512xbf16>
      %cst_17 = arith.constant dense<0.000000e+00> : vector<8x512xf32>
      %20 = tpu.matmul %18, %19, %cst_17 {dimension_numbers = #tpu.dot_dimension_numbers<[1], [0], [0], [1], [0, 0, 1, 1], [], []>} : vector<8x1024xbf16>, vector<1024x512xbf16>, vector<8x512xf32> -> vector<8x512xf32>
      %c0_18 = arith.constant 0 : index
      %c0_19 = arith.constant 0 : index
      %21 = vector.load %arg6[%c0_18, %c0_19] : memref<1x512xf32, #tpu.memory_space<vmem>>, vector<1x512xf32>
      %22 = vector.broadcast %21 : vector<1x512xf32> to vector<8x512xf32>
      %23 = arith.addf %20, %22 : vector<8x512xf32>
      %cst_20 = arith.constant 0.000000e+00 : f32
      %24 = vector.broadcast %cst_20 : f32 to vector<8x512xf32>
      %25 = arith.maximumf %23, %24 : vector<8x512xf32>
      %26 = arith.truncf %25 : vector<8x512xf32> to vector<8x512xbf16>
      %c0_21 = arith.constant 0 : index
      %c0_22 = arith.constant 0 : index
      %27 = vector.load %arg7[%c0_21, %c0_22] : memref<512x128xbf16, #tpu.memory_space<vmem>>, vector<512x128xbf16>
      %cst_23 = arith.constant dense<0.000000e+00> : vector<8x128xf32>
      %28 = tpu.matmul %26, %27, %cst_23 {dimension_numbers = #tpu.dot_dimension_numbers<[1], [0], [0], [1], [0, 0, 1, 1], [], []>} : vector<8x512xbf16>, vector<512x128xbf16>, vector<8x128xf32> -> vector<8x128xf32>
      %c0_24 = arith.constant 0 : index
      %c0_25 = arith.constant 0 : index
      %29 = vector.load %arg8[%c0_24, %c0_25] : memref<1x128xf32, #tpu.memory_space<vmem>>, vector<1x128xf32>
      %30 = vector.broadcast %29 : vector<1x128xf32> to vector<8x128xf32>
      %31 = arith.addf %28, %30 : vector<8x128xf32>
      %cst_26 = arith.constant 0.000000e+00 : f32
      %32 = vector.broadcast %cst_26 : f32 to vector<8x128xf32>
      %33 = arith.maximumf %31, %32 : vector<8x128xf32>
      %34 = arith.truncf %33 : vector<8x128xf32> to vector<8x128xbf16>
      %c0_27 = arith.constant 0 : index
      %c0_28 = arith.constant 0 : index
      %35 = vector.load %arg9[%c0_27, %c0_28] : memref<128x128xbf16, #tpu.memory_space<vmem>>, vector<128x128xbf16>
      %cst_29 = arith.constant dense<0.000000e+00> : vector<8x128xf32>
      %36 = tpu.matmul %34, %35, %cst_29 {dimension_numbers = #tpu.dot_dimension_numbers<[1], [0], [0], [1], [0, 0, 1, 1], [], []>} : vector<8x128xbf16>, vector<128x128xbf16>, vector<8x128xf32> -> vector<8x128xf32>
      %c0_30 = arith.constant 0 : index
      %c0_31 = arith.constant 0 : index
      %37 = vector.load %arg10[%c0_30, %c0_31] : memref<1x128xf32, #tpu.memory_space<vmem>>, vector<1x128xf32>
      %38 = vector.broadcast %37 : vector<1x128xf32> to vector<8x128xf32>
      %39 = arith.addf %36, %38 : vector<8x128xf32>
      %cst_32 = arith.constant 0.000000e+00 : f32
      %40 = vector.broadcast %cst_32 : f32 to vector<8x128xf32>
      %41 = arith.subf %40, %39 : vector<8x128xf32>
      %42 = math.exp %41 : vector<8x128xf32>
      %cst_33 = arith.constant 1.000000e+00 : f32
      %43 = vector.broadcast %cst_33 : f32 to vector<8x128xf32>
      %44 = arith.addf %43, %42 : vector<8x128xf32>
      %45 = tpu.reciprocal %44 {approx = true} : vector<8x128xf32> -> vector<8x128xf32>
      %c0_34 = arith.constant 0 : index
      %c0_35 = arith.constant 0 : index
      %46 = vector.load %arg11[%c0_34, %c0_35] : memref<8x128xf32, #tpu.memory_space<vmem>>, vector<8x128xf32>
      tpu.vector_store %arg11[%c0_34, %c0_35], %45 {strides = array<i32>} : memref<8x128xf32, #tpu.memory_space<vmem>>, vector<8x128xf32>,
    } else {
    }
    return
  }
  func.func @transform_0(%arg0: i32, %arg1: i32) -> (i32, i32) {
    %c0_i32 = arith.constant 0 : i32
    return %arg0, %arg1 : i32, i32
  }
  func.func @transform_1(%arg0: i32, %arg1: i32) -> (i32, i32) {
    %c0_i32 = arith.constant 0 : i32
    %c0_i32_0 = arith.constant 0 : i32
    return %arg1, %c0_i32 : i32, i32
  }
  func.func @transform_2(%arg0: i32, %arg1: i32) -> (i32, i32) {
    %c0_i32 = arith.constant 0 : i32
    %c0_i32_0 = arith.constant 0 : i32
    %c0_i32_1 = arith.constant 0 : i32
    return %c0_i32, %c0_i32_0 : i32, i32
  }
  func.func @transform_3(%arg0: i32, %arg1: i32) -> (i32, i32) {
    %c0_i32 = arith.constant 0 : i32
    %c0_i32_0 = arith.constant 0 : i32
    %c0_i32_1 = arith.constant 0 : i32
    return %c0_i32, %c0_i32_0 : i32, i32
  }
  func.func @transform_4(%arg0: i32, %arg1: i32) -> (i32, i32) {
    %c0_i32 = arith.constant 0 : i32
    %c0_i32_0 = arith.constant 0 : i32
    %c0_i32_1 = arith.constant 0 : i32
    return %c0_i32, %c0_i32_0 : i32, i32
  }
  func.func @transform_5(%arg0: i32, %arg1: i32) -> (i32, i32) {
    %c0_i32 = arith.constant 0 : i32
    %c0_i32_0 = arith.constant 0 : i32
    %c0_i32_1 = arith.constant 0 : i32
    return %c0_i32, %c0_i32_0 : i32, i32
  }
  func.func @transform_6(%arg0: i32, %arg1: i32) -> (i32, i32) {
    %c0_i32 = arith.constant 0 : i32
    %c0_i32_0 = arith.constant 0 : i32
    %c0_i32_1 = arith.constant 0 : i32
    return %c0_i32, %c0_i32_0 : i32, i32
  }
  func.func @transform_7(%arg0: i32, %arg1: i32) -> (i32, i32) {
    %c0_i32 = arith.constant 0 : i32
    %c0_i32_0 = arith.constant 0 : i32
    %c0_i32_1 = arith.constant 0 : i32
    return %c0_i32, %c0_i32_0 : i32, i32
  }
  func.func @transform_8(%arg0: i32, %arg1: i32) -> (i32, i32) {
    %c0_i32 = arith.constant 0 : i32
    %c0_i32_0 = arith.constant 0 : i32
    %c0_i32_1 = arith.constant 0 : i32
    return %c0_i32, %c0_i32_0 : i32, i32
  }
  func.func @transform_9(%arg0: i32, %arg1: i32) -> (i32, i32) {
    %c0_i32 = arith.constant 0 : i32
    %c0_i32_0 = arith.constant 0 : i32
    return %arg0, %c0_i32 : i32, i32
  }
}

</mosaic_0001>

<bundles_post_ra>
// kernel: tpu_custom_call.1
= control target key start
LH: loop header
LB: loop body
LE: loop exit
PB: predicated region body
PF: predicated region fallthrough
CT: control target
= control target key end

     0   :  { %14 = vsyncpa [#allocation4], 0  ;;  %s4369_s0 = inlined_call_operand.hbm [shape: bf16[8,128], index: 0, kind: input, shape index: {}]   ;;  %s4370_s1 = inlined_call_operand.hbm [shape: bf16[128,1024], index: 1, kind: input, shape index: {}]   ;;  %s4371_s2 = inlined_call_operand.hbm [shape: f32[1,1024], index: 2, kind: input, shape index: {}]   ;;  %s4372_s3 = inlined_call_operand.hbm [shape: bf16[1024,512], index: 3, kind: input, shape index: {}]   ;;  %s4373_s4 = inlined_call_operand.vmem [shape: f32[1,512], index: 4, kind: input, shape index: {}]   ;;  %s4374_s5 = inlined_call_operand.hbm [shape: bf16[512,128], index: 5, kind: input, shape index: {}]   ;;  %s4375_s6 = inlined_call_operand.vmem [shape: f32[1,128], index: 6, kind: input, shape index: {}]   ;;  %s4376_s7 = inlined_call_operand.hbm [shape: bf16[128,128], index: 7, kind: input, shape index: {}]   ;;  %s4377_s8 = inlined_call_operand.vmem [shape: f32[1,128], index: 8, kind: input, shape index: {}]   ;;  %s4378_s9 = inlined_call_operand.hbm [shape: f32[8,128], index: 9, kind: output, shape index: {}]  }
   0x1   :  { %15 = vsyncpa [#allocation7], 0 }
   0x2   :  { %16 = vsyncpa [#allocation10], 0 }
   0x3   :  { %17 = vsyncpa [#allocation13], 0 }
   0x4   :  { %18 = vsyncpa [#allocation5], 0  ;;  %s4177_s30 = smov [#allocation6]  }
   0x5   :  { %s34_s10 = sshll.u32 %s4177_s30, 4  ;;  %s35_s10 = int_to_ptr.vmem [resolvable:$true] %s34_s10 }
   0x6   :  { %s4035_s11 = scalar_lea.vmem %s35_s10, 8192  ;;  %p4040_p1 = scmp.lt.s32.totalorder %s35_s10, %s35_s10 }
   0x7   :  { %p4036_p0 = scmp.ne.s32.totalorder %s35_s10, %s4035_s11  ;;  %p4041_p2 = scmp.lt.s32.totalorder %s4035_s11, %s4035_s11 }
   0x9   :  { %p4042_p3 = por %p4041_p2, %p4040_p1 }
   0xb   :  { %p4043_p4 = pnand %p4042_p3, %p4036_p0 }
   0xd   :  { %4046 = shalt.err (!%p4043_p4)
}
   0xe   :  { %s4178_s12 = smov 512   ;;  %s4179_s13 = smov 32  }
   0xf   :  { %40 = dma.hbm_to_vmem [thread:$0]  %s4370_s1, 8192, %s35_s10, [#allocation7], %s4178_s12, %s4178_s12, %s4179_s13  }
  0x10   :  { %s4180_s16 = smov [#allocation9]  }
  0x11   :  { %s56_s17 = sshll.u32 %s4180_s16, 4  ;;  %s57_s17 = int_to_ptr.vmem [resolvable:$true] %s56_s17 }
  0x12   :  { %s4055_s18 = scalar_lea.vmem %s57_s17, 32768  ;;  %p4060_p6 = scmp.lt.s32.totalorder %s57_s17, %s57_s17 }
  0x13   :  { %p4056_p5 = scmp.ne.s32.totalorder %s57_s17, %s4055_s18  ;;  %p4061_p7 = scmp.lt.s32.totalorder %s4055_s18, %s4055_s18 }
  0x15   :  { %p4062_p8 = por %p4061_p7, %p4060_p6 }
  0x17   :  { %p4063_p9 = pnand %p4062_p8, %p4056_p5 }
  0x19   :  { %4066 = shalt.err (!%p4063_p9)
}
  0x1a   :  { %s4181_s19 = smov 256   ;;  %s4182_s20 = smov 16  }
  0x1b   :  { %62 = dma.hbm_to_vmem [thread:$0]  %s4372_s3, 32768, %s57_s17, [#allocation10], %s4181_s19, %s4181_s19, %s4182_s20  }
  0x1c   :  { %s4183_s23 = smov [#allocation3]   ;;  %s4184_s25 = smov [#allocation8]  }
  0x1d   :  { %s25_s24 = sshll.u32 %s4183_s23, 4  ;;  %s47_s1 = sshll.u32 %s4184_s25, 4  ;;  %s26_s24 = int_to_ptr.vmem [resolvable:$true] %s25_s24  ;;  %s48_s1 = int_to_ptr.vmem [resolvable:$true] %s47_s1 }
  0x1e   :  { %s4075_s26 = scalar_lea.vmem %s26_s24, 64  ;;  %p4080_p11 = scmp.lt.s32.totalorder %s26_s24, %s26_s24 }
  0x1f   :  { %p4076_p10 = scmp.ne.s32.totalorder %s26_s24, %s4075_s26  ;;  %p4081_p12 = scmp.lt.s32.totalorder %s4075_s26, %s4075_s26 }
  0x21   :  { %p4082_p13 = por %p4081_p12, %p4080_p11 }
  0x23   :  { %p4083_p0 = pnand %p4082_p13, %p4076_p10 }
  0x25   :  { %4086 = shalt.err (!%p4083_p0)
}
  0x26   :  { %28 = dma.hbm_to_vmem [thread:$0]  %s4369_s0, 64, %s26_s24, [#allocation4]  }
  0x27   :  { %s4095_s29 = scalar_lea.vmem %s48_s1, 128  ;;  %p4100_p2 = scmp.lt.s32.totalorder %s48_s1, %s48_s1 }
  0x28   :  { %p4096_p1 = scmp.ne.s32.totalorder %s48_s1, %s4095_s29  ;;  %p4101_p3 = scmp.lt.s32.totalorder %s4095_s29, %s4095_s29 }
  0x2a   :  { %p4102_p4 = por %p4101_p3, %p4100_p2 }
  0x2c   :  { %p4103_p5 = pnand %p4102_p4, %p4096_p1 }
  0x2e   :  { %4106 = shalt.err (!%p4103_p5)
}
  0x2f   :  { %50 = dma.hbm_to_vmem [thread:$0]  %s4371_s2, 128, %s48_s1, [#allocation7]  }
  0x30   :  { %s4185_s10 = smov [#allocation11]  }
  0x31   :  { %s70_s11 = sshll.u32 %s4185_s10, 4  ;;  %s71_s11 = int_to_ptr.vmem [resolvable:$true] %s70_s11 }
  0x32   :  { %s4115_s12 = scalar_lea.vmem %s71_s11, 4096  ;;  %p4120_p7 = scmp.lt.s32.totalorder %s71_s11, %s71_s11 }
  0x33   :  { %p4116_p6 = scmp.ne.s32.totalorder %s71_s11, %s4115_s12  ;;  %p4121_p8 = scmp.lt.s32.totalorder %s4115_s12, %s4115_s12 }
  0x35   :  { %p4122_p9 = por %p4121_p8, %p4120_p7 }
  0x37   :  { %p4123_p10 = pnand %p4122_p9, %p4116_p6 }
  0x39   :  { %4126 = shalt.err (!%p4123_p10)
}
  0x3a   :  { %s4186_s0 = smov 64   ;;  %s4187_s13 = smov 4  }
  0x3b   :  { %76 = dma.hbm_to_vmem [thread:$0]  %s4374_s5, 4096, %s71_s11, [#allocation10], %s4186_s0, %s4186_s0, %s4187_s13  }
  0x3c   :  { %s4188_s16 = smov [#allocation12]  }
  0x3d   :  { %s84_s17 = sshll.u32 %s4188_s16, 4  ;;  %s85_s17 = int_to_ptr.vmem [resolvable:$true] %s84_s17 }
  0x3e   :  { %s4135_s2 = scalar_lea.vmem %s85_s17, 1024  ;;  %p4140_p12 = scmp.lt.s32.totalorder %s85_s17, %s85_s17 }
  0x3f   :  { %p4136_p11 = scmp.ne.s32.totalorder %s85_s17, %s4135_s2  ;;  %p4141_p13 = scmp.lt.s32.totalorder %s4135_s2, %s4135_s2 }
  0x41   :  { %p4142_p0 = por %p4141_p13, %p4140_p12 }
  0x43   :  { %p4143_p1 = pnand %p4142_p0, %p4136_p11 }
  0x45   :  { %4146 = shalt.err (!%p4143_p1)
}
  0x46   :  { %90 = dma.hbm_to_vmem [thread:$0]  %s4376_s7, 1024, %s85_s17, [#allocation13], %s4186_s0, %s4186_s0, %s4187_s13  }
  0x47   :  { %4167 = dma.done.wait [#allocation4], 64  }
  0x48   :  { %4168 = vsyncadd [#allocation4], 4294967232 }
  0x49   :  { %4169 = dma.done.wait [#allocation7], 8320  }
  0x4a   :  { %4170 = vsyncadd [#allocation7], 4294958976 }
  0x4b   :  { %4171 = dma.done.wait [#allocation10], 36864  }
  0x4c   :  { %4172 = vsyncadd [#allocation10], 4294930432 }
  0x4d   :  { %4173 = dma.done.wait [#allocation13], 1024  }
  0x4e   :  { %4174 = vsyncadd [#allocation13], 4294966272  ;;  %v4189_v0 = vmov 0   ;;  %v189_v1 = vld [vmem:[#allocation6 + $0x1c0] sm:$0xff]  ;;  %v190_v3 = vld [vmem:[#allocation6 + $0x1c8] sm:$0xff]  ;;  %vm4191_vm0 = vmmov 0  }
  0x4f   :  { %549 = vmatprep.mubr.bf16.mxu0 %v4189_v0  ;;  %590 = vmatprep.mubr.bf16.mxu1 %v4189_v0  ;;  %v193_v2 = vld [vmem:[#allocation6 + $0x1e0] sm:$0xff]  ;;  %v194_v5 = vld [vmem:[#allocation6 + $0x1e8] sm:$0xff]  ;;  %v191_v62 = vld [vmem:[#allocation6 + $0x1d0] sm:$0xff] }
  0x50   :  { %v3205_v4 = vcombine.high %v189_v1, %v193_v2  ;;  %v3204_v6 = vcombine.low %v189_v1, %v193_v2  ;;  %v181_v7 = vld [vmem:[#allocation6 + $0x180] sm:$0xff]  ;;  %v3207_v9 = vcombine.high %v190_v3, %v194_v5  ;;  %v3206_v10 = vcombine.low %v190_v3, %v194_v5  ;;  %v182_v12 = vld [vmem:[#allocation6 + $0x188] sm:$0xff]  ;;  %v195_v1 = vld [vmem:[#allocation6 + $0x1f0] sm:$0xff] }
  0x51   :  { %v185_v8 = vld [vmem:[#allocation6 + $0x1a0] sm:$0xff]  ;;  %v186_v13 = vld [vmem:[#allocation6 + $0x1a8] sm:$0xff]  ;;  %v192_v2 = vld [vmem:[#allocation6 + $0x1d8] sm:$0xff] }
  0x52   :  { %v3197_v11 = vcombine.high %v181_v7, %v185_v8  ;;  %v173_v14 = vld [vmem:[#allocation6 + $0x140] sm:$0xff]  ;;  %517 = vmatprep.subr.bf16.mxu0 %v3205_v4  ;;  %v3199_v15 = vcombine.high %v182_v12, %v186_v13  ;;  %v174_v17 = vld [vmem:[#allocation6 + $0x148] sm:$0xff]  ;;  %558 = vmatprep.subr.bf16.mxu1 %v3207_v9  ;;  %v3196_v19 = vcombine.low %v181_v7, %v185_v8  ;;  %v196_v3 = vld [vmem:[#allocation6 + $0x1f8] sm:$0xff] }
  0x53   :  { %v177_v16 = vld [vmem:[#allocation6 + $0x160] sm:$0xff]  ;;  %v178_v18 = vld [vmem:[#allocation6 + $0x168] sm:$0xff]  ;;  %518 = vmatpush1.bf16.msra.mxu0 %v3204_v6  ;;  %559 = vmatpush1.bf16.msra.mxu1 %v3206_v10  ;;  %v3198_v20 = vcombine.low %v182_v12, %v186_v13  ;;  %v3209_v6 = vcombine.high %v191_v62, %v195_v1  ;;  %v183_v7 = vld [vmem:[#allocation6 + $0x190] sm:$0xff]  ;;  %v3211_v8 = vcombine.high %v192_v2, %v196_v3 }
  0x54   :  { %519 = vmatprep.subr.bf16.mxu0 %v3197_v11  ;;  %v3189_v21 = vcombine.high %v173_v14, %v177_v16  ;;  %560 = vmatprep.subr.bf16.mxu1 %v3199_v15  ;;  %v3191_v22 = vcombine.high %v174_v17, %v178_v18  ;;  %v165_v23 = vld [vmem:[#allocation6 + $0x100] sm:$0xff]  ;;  %v166_v25 = vld [vmem:[#allocation6 + $0x108] sm:$0xff]  ;;  %v3188_v27 = vcombine.low %v173_v14, %v177_v16  ;;  %v187_v9 = vld [vmem:[#allocation6 + $0x1b0] sm:$0xff] }
  0x55   :  { %v169_v24 = vld [vmem:[#allocation6 + $0x120] sm:$0xff]  ;;  %v170_v26 = vld [vmem:[#allocation6 + $0x128] sm:$0xff]  ;;  %v3190_v28 = vcombine.low %v174_v17, %v178_v18  ;;  %v184_v10 = vld [vmem:[#allocation6 + $0x198] sm:$0xff]  ;;  %v3208_v13 = vcombine.low %v191_v62, %v195_v1  ;;  %v3210_v14 = vcombine.low %v192_v2, %v196_v3  ;;  %v3201_v15 = vcombine.high %v183_v7, %v187_v9 }
  0x56   :  { %v3181_v29 = vcombine.high %v165_v23, %v169_v24  ;;  %v3183_v30 = vcombine.high %v166_v25, %v170_v26  ;;  %v157_v31 = vld [vmem:[#allocation6 + $0xc0] sm:$0xff]  ;;  %v158_v33 = vld [vmem:[#allocation6 + $0xc8] sm:$0xff]  ;;  %v3180_v35 = vcombine.low %v165_v23, %v169_v24  ;;  %v3182_v36 = vcombine.low %v166_v25, %v170_v26  ;;  %v188_v11 = vld [vmem:[#allocation6 + $0x1b8] sm:$0xff] }
  0x57   :  { %520 = vmatpush1.bf16.msra.mxu0 %v3196_v19  ;;  %561 = vmatpush1.bf16.msra.mxu1 %v3198_v20  ;;  %v161_v32 = vld [vmem:[#allocation6 + $0xe0] sm:$0xff]  ;;  %v162_v34 = vld [vmem:[#allocation6 + $0xe8] sm:$0xff]  ;;  %v4263_v12 = vld [vmem:[#allocation3] sm:$0xf]  ;;  %v3203_v17 = vcombine.high %v184_v10, %v188_v11 }
  0x58   :  { %521 = vmatprep.subr.bf16.mxu0 %v3189_v21  ;;  %562 = vmatprep.subr.bf16.mxu1 %v3191_v22  ;;  %v3173_v37 = vcombine.high %v157_v31, %v161_v32  ;;  %v3175_v38 = vcombine.high %v158_v33, %v162_v34  ;;  %v149_v39 = vld [vmem:[#allocation6 + $0x80] sm:$0xff]  ;;  %v150_v41 = vld [vmem:[#allocation6 + $0x88] sm:$0xff]  ;;  %v3172_v43 = vcombine.low %v157_v31, %v161_v32  ;;  %v175_v16 = vld [vmem:[#allocation6 + $0x150] sm:$0xff] }
  0x59   :  { %v153_v40 = vld [vmem:[#allocation6 + $0xa0] sm:$0xff]  ;;  %v154_v42 = vld [vmem:[#allocation6 + $0xa8] sm:$0xff]  ;;  %v3174_v44 = vcombine.low %v158_v33, %v162_v34  ;;  %v179_v18 = vld [vmem:[#allocation6 + $0x170] sm:$0xff]  ;;  %v3200_v21 = vcombine.low %v183_v7, %v187_v9  ;;  %v3202_v22 = vcombine.low %v184_v10, %v188_v11 }
  0x5a   :  { %v3165_v45 = vcombine.high %v149_v39, %v153_v40  ;;  %v3167_v46 = vcombine.high %v150_v41, %v154_v42  ;;  %v141_v47 = vld [vmem:[#allocation6 + $0x40] sm:$0xff]  ;;  %v142_v49 = vld [vmem:[#allocation6 + $0x48] sm:$0xff]  ;;  %v3164_v51 = vcombine.low %v149_v39, %v153_v40  ;;  %v3166_v52 = vcombine.low %v150_v41, %v154_v42  ;;  %v176_v19 = vld [vmem:[#allocation6 + $0x158] sm:$0xff] }
  0x5b   :  { %522 = vmatpush1.bf16.msra.mxu0 %v3188_v27  ;;  %563 = vmatpush1.bf16.msra.mxu1 %v3190_v28  ;;  %v145_v48 = vld [vmem:[#allocation6 + $0x60] sm:$0xff]  ;;  %v146_v50 = vld [vmem:[#allocation6 + $0x68] sm:$0xff]  ;;  %v180_v20 = vld [vmem:[#allocation6 + $0x178] sm:$0xff]  ;;  %v3193_v23 = vcombine.high %v175_v16, %v179_v18 }
  0x5c   :  { %523 = vmatprep.subr.bf16.mxu0 %v3181_v29  ;;  %564 = vmatprep.subr.bf16.mxu1 %v3183_v30  ;;  %v3157_v53 = vcombine.high %v141_v47, %v145_v48  ;;  %v133_v54 = vld [vmem:[#allocation6] sm:$0xff]  ;;  %v3159_v55 = vcombine.high %v142_v49, %v146_v50  ;;  %v134_v57 = vld [vmem:[#allocation6 + $0x8] sm:$0xff]  ;;  %v3156_v59 = vcombine.low %v141_v47, %v145_v48  ;;  %v167_v24 = vld [vmem:[#allocation6 + $0x110] sm:$0xff] }
  0x5d   :  { %v137_v56 = vld [vmem:[#allocation6 + $0x20] sm:$0xff]  ;;  %v138_v58 = vld [vmem:[#allocation6 + $0x28] sm:$0xff]  ;;  %v3158_v60 = vcombine.low %v142_v49, %v146_v50  ;;  %v3195_v25 = vcombine.high %v176_v19, %v180_v20  ;;  %v171_v26 = vld [vmem:[#allocation6 + $0x130] sm:$0xff]  ;;  %v3192_v29 = vcombine.low %v175_v16, %v179_v18  ;;  %v3194_v30 = vcombine.low %v176_v19, %v180_v20 }
  0x5e   :  { %v3149_v61 = vcombine.high %v133_v54, %v137_v56  ;;  %v3151_v63 = vcombine.high %v134_v57, %v138_v58  ;;  %v3148_v4 = vcombine.low %v133_v54, %v137_v56  ;;  %v3150_v5 = vcombine.low %v134_v57, %v138_v58  ;;  %v168_v27 = vld [vmem:[#allocation6 + $0x118] sm:$0xff]  ;;  %v159_v32 = vld [vmem:[#allocation6 + $0xd0] sm:$0xff] }
  0x5f   :  { %524 = vmatpush1.bf16.msra.mxu0 %v3180_v35  ;;  %565 = vmatpush1.bf16.msra.mxu1 %v3182_v36  ;;  %v172_v28 = vld [vmem:[#allocation6 + $0x138] sm:$0xff]  ;;  %v3185_v31 = vcombine.high %v167_v24, %v171_v26  ;;  %v163_v34 = vld [vmem:[#allocation6 + $0xf0] sm:$0xff] }
  0x60   :  { %525 = vmatprep.subr.bf16.mxu0 %v3173_v37  ;;  %566 = vmatprep.subr.bf16.mxu1 %v3175_v38  ;;  %v3187_v33 = vcombine.high %v168_v27, %v172_v28  ;;  %v160_v35 = vld [vmem:[#allocation6 + $0xd8] sm:$0xff]  ;;  %v3184_v37 = vcombine.low %v167_v24, %v171_v26  ;;  %v3186_v38 = vcombine.low %v168_v27, %v172_v28  ;;  %v151_v40 = vld [vmem:[#allocation6 + $0x90] sm:$0xff] }
  0x61   :  { %v164_v36 = vld [vmem:[#allocation6 + $0xf8] sm:$0xff]  ;;  %v3177_v39 = vcombine.high %v159_v32, %v163_v34  ;;  %v155_v41 = vld [vmem:[#allocation6 + $0xb0] sm:$0xff] }
  0x62   :  { %v152_v42 = vld [vmem:[#allocation6 + $0x98] sm:$0xff]  ;;  %v143_v47 = vld [vmem:[#allocation6 + $0x50] sm:$0xff] }
  0x63   :  { %526 = vmatpush1.bf16.msra.mxu0 %v3172_v43  ;;  %567 = vmatpush1.bf16.msra.mxu1 %v3174_v44  ;;  %v156_v43 = vld [vmem:[#allocation6 + $0xb8] sm:$0xff]  ;;  %v3176_v44 = vcombine.low %v159_v32, %v163_v34  ;;  %v147_v49 = vld [vmem:[#allocation6 + $0x70] sm:$0xff] }
  0x64   :  { %527 = vmatprep.subr.bf16.mxu0 %v3165_v45  ;;  %568 = vmatprep.subr.bf16.mxu1 %v3167_v46  ;;  %v3178_v45 = vcombine.low %v160_v35, %v164_v36  ;;  %v3169_v46 = vcombine.high %v151_v40, %v155_v41  ;;  %v3171_v48 = vcombine.high %v152_v42, %v156_v43  ;;  %v144_v50 = vld [vmem:[#allocation6 + $0x58] sm:$0xff]  ;;  %v139_v57 = vld [vmem:[#allocation6 + $0x30] sm:$0xff] }
  0x65   :  { %v3161_v54 = vcombine.high %v143_v47, %v147_v49  ;;  %v136_v58 = vld [vmem:[#allocation6 + $0x18] sm:$0xff] }
  0x66   :  { %v3601_v1 = vld [vmem:[#allocation9 + $0xe4] ss:$16 sps:$4 sm:$0xff]   ;;  %v3605_v9 = vld [vmem:[#allocation9 + $0xc0] ss:$16 sps:$4 sm:$0xff]  }
  0x67   :  { %528 = vmatpush1.bf16.msra.mxu0 %v3164_v51  ;;  %569 = vmatpush1.bf16.msra.mxu1 %v3166_v52  ;;  %v148_v51 = vld [vmem:[#allocation6 + $0x78] sm:$0xff]  ;;  %v3168_v52 = vcombine.low %v151_v40, %v155_v41 }
  0x68   :  { %529 = vmatprep.subr.bf16.mxu0 %v3157_v53  ;;  %570 = vmatprep.subr.bf16.mxu1 %v3159_v55  ;;  %v3170_v53 = vcombine.low %v152_v42, %v156_v43  ;;  %v135_v55 = vld [vmem:[#allocation6 + $0x10] sm:$0xff]  ;;  %v3163_v56 = vcombine.high %v144_v50, %v148_v51  ;;  %v3604_v3 = vld [vmem:[#allocation9 + $0x2e4] ss:$16 sps:$4 sm:$0xff]   ;;  %v3608_v10 = vld [vmem:[#allocation9 + $0x2c0] ss:$16 sps:$4 sm:$0xff]  }
  0x69   :  { %v3153_v62 = vcombine.high %v135_v55, %v139_v57  ;;  %v3152_v2 = vcombine.low %v135_v55, %v139_v57  ;;  %v3607_v7 = vld [vmem:[#allocation9 + $0xc4] ss:$16 sps:$4 sm:$0xff]   ;;  %v3617_v18 = vld [vmem:[#allocation9 + $0x80] ss:$16 sps:$4 sm:$0xff]  }
  0x6a   :  { %v3613_v11 = vld [vmem:[#allocation9 + $0xa4] ss:$16 sps:$4 sm:$0xff]   ;;  %v3620_v19 = vld [vmem:[#allocation9 + $0x280] ss:$16 sps:$4 sm:$0xff]  }
  0x6b   :  { %530 = vmatpush1.bf16.msra.mxu0 %v3156_v59  ;;  %571 = vmatpush1.bf16.msra.mxu1 %v3158_v60  ;;  %v140_v59 = vld [vmem:[#allocation6 + $0x38] sm:$0xff]  ;;  %v3160_v60 = vcombine.low %v143_v47, %v147_v49 }
  0x6c   :  { %531 = vmatprep.subr.bf16.mxu0 %v3149_v61  ;;  %572 = vmatprep.subr.bf16.mxu1 %v3151_v63  ;;  %v3162_v61 = vcombine.low %v144_v50, %v148_v51  ;;  %v3155_v63 = vcombine.high %v136_v58, %v140_v59  ;;  %v3619_v16 = vld [vmem:[#allocation9 + $0x84] ss:$16 sps:$4 sm:$0xff]   ;;  %v3632_v26 = vld [vmem:[#allocation9 + $0x240] ss:$16 sps:$4 sm:$0xff]  }
  0x6d   :  { %v3625_v20 = vld [vmem:[#allocation9 + $0x64] ss:$16 sps:$4 sm:$0xff]   ;;  %v3644_v34 = vld [vmem:[#allocation9 + $0x200] ss:$16 sps:$4 sm:$0xff]  }
  0x6e   :  { %v3634_v24 = vld [vmem:[#allocation9 + $0x244] ss:$16 sps:$4 sm:$0xff]   ;;  %v3656_v41 = vld [vmem:[#allocation9 + $0x3c0] ss:$16 sps:$4 sm:$0xff]  }
  0x6f   :  { %532 = vmatpush1.bf16.msra.mxu0 %v3148_v4  ;;  %573 = vmatpush1.bf16.msra.mxu1 %v3150_v5  ;;  %v3154_v4 = vcombine.low %v136_v58, %v140_v59  ;;  %v3599_v5 = vld [vmem:[#allocation9 + $0xe0] ss:$16 sps:$4 sm:$0xff]   ;;  %v3637_v27 = vld [vmem:[#allocation9 + $0x24] ss:$16 sps:$4 sm:$0xff]  }
  0x70   :  { %599 = vmatprep.subr.bf16.mxu0 %v3209_v6  ;;  %640 = vmatprep.subr.bf16.mxu1 %v3211_v8  ;;  %v3602_v6 = vld [vmem:[#allocation9 + $0x2e0] ss:$16 sps:$4 sm:$0xff]   ;;  %v3610_v8 = vld [vmem:[#allocation9 + $0x2c4] ss:$16 sps:$4 sm:$0xff]  }
  0x71   :  { %v3640_v28 = vld [vmem:[#allocation9 + $0x224] ss:$16 sps:$4 sm:$0xff]   ;;  %v3668_v49 = vld [vmem:[#allocation9 + $0x380] ss:$16 sps:$4 sm:$0xff]  }
  0x72   :  { %550 = vmatmul.mubr.bf16.vlgmr.msra.gmra.mxu0 %v4263_v12  ;;  %591 = vmatmul.mubr.bf16.vlgmr.msra.gmra.mxu1 %v4263_v12  ;;  %v3646_v32 = vld [vmem:[#allocation9 + $0x204] ss:$16 sps:$4 sm:$0xff]   ;;  %v3680_v57 = vld [vmem:[#allocation9 + $0x340] ss:$16 sps:$4 sm:$0xff]  }
  0x73   :  { %600 = vmatpush1.bf16.msra.mxu0 %v3208_v13  ;;  %641 = vmatpush1.bf16.msra.mxu1 %v3210_v14  ;;  %v3616_v13 = vld [vmem:[#allocation9 + $0x2a4] ss:$16 sps:$4 sm:$0xff]   ;;  %v3611_v14 = vld [vmem:[#allocation9 + $0xa0] ss:$16 sps:$4 sm:$0xff]  }
  0x74   :  { %601 = vmatprep.subr.bf16.mxu0 %v3201_v15  ;;  %642 = vmatprep.subr.bf16.mxu1 %v3203_v17  ;;  %v3614_v15 = vld [vmem:[#allocation9 + $0x2a0] ss:$16 sps:$4 sm:$0xff]   ;;  %v3622_v17 = vld [vmem:[#allocation9 + $0x284] ss:$16 sps:$4 sm:$0xff]  }
  0x75   :  { %631 = vmatprep.mubr.bf16.mxu0 %v4189_v0  ;;  %672 = vmatprep.mubr.bf16.mxu1 %v4189_v0  ;;  %v3179_v0 = vcombine.high %v160_v35, %v164_v36  ;;  %v3649_v35 = vld [vmem:[#allocation9 + $0x1e4] ss:$16 sps:$4 sm:$0xff]  }
  0x76   :  { %v3652_v36 = vld [vmem:[#allocation9 + $0x3e4] ss:$16 sps:$4 sm:$0xff]  }
  0x77   :  { %602 = vmatpush1.bf16.msra.mxu0 %v3200_v21  ;;  %643 = vmatpush1.bf16.msra.mxu1 %v3202_v22  ;;  %v3628_v21 = vld [vmem:[#allocation9 + $0x264] ss:$16 sps:$4 sm:$0xff]   ;;  %v3626_v22 = vld [vmem:[#allocation9 + $0x260] ss:$16 sps:$4 sm:$0xff]  }
  0x78   :  { %603 = vmatprep.subr.bf16.mxu0 %v3193_v23  ;;  %644 = vmatprep.subr.bf16.mxu1 %v3195_v25  ;;  %v3631_v23 = vld [vmem:[#allocation9 + $0x44] ss:$16 sps:$4 sm:$0xff]   ;;  %v3629_v25 = vld [vmem:[#allocation9 + $0x40] ss:$16 sps:$4 sm:$0xff]  }
  0x79   :  { %v3658_v40 = vld [vmem:[#allocation9 + $0x3c4] ss:$16 sps:$4 sm:$0xff]  }
  0x7a   :  { %v3661_v42 = vld [vmem:[#allocation9 + $0x1a4] ss:$16 sps:$4 sm:$0xff]  }
  0x7b   :  { %604 = vmatpush1.bf16.msra.mxu0 %v3192_v29  ;;  %645 = vmatpush1.bf16.msra.mxu1 %v3194_v30  ;;  %v3635_v29 = vld [vmem:[#allocation9 + $0x20] ss:$16 sps:$4 sm:$0xff]   ;;  %v3664_v43 = vld [vmem:[#allocation9 + $0x3a4] ss:$16 sps:$4 sm:$0xff]  }
  0x7c   :  { %605 = vmatprep.subr.bf16.mxu0 %v3185_v31  ;;  %646 = vmatprep.subr.bf16.mxu1 %v3187_v33  ;;  %v3638_v30 = vld [vmem:[#allocation9 + $0x220] ss:$16 sps:$4 sm:$0xff]   ;;  %v3643_v31 = vld [vmem:[#allocation9 + $0x4] ss:$16 sps:$4 sm:$0xff]  }
  0x7d   :  { %v3641_v33 = vld [vmem:[#allocation9] ss:$16 sps:$4 sm:$0xff]   ;;  %v3670_v47 = vld [vmem:[#allocation9 + $0x384] ss:$16 sps:$4 sm:$0xff]  }
  0x7e   :  { %v3673_v50 = vld [vmem:[#allocation9 + $0x164] ss:$16 sps:$4 sm:$0xff]  }
  0x7f   :  { %606 = vmatpush1.bf16.msra.mxu0 %v3184_v37  ;;  %647 = vmatpush1.bf16.msra.mxu1 %v3186_v38  ;;  %v3647_v37 = vld [vmem:[#allocation9 + $0x1e0] ss:$16 sps:$4 sm:$0xff]   ;;  %v3676_v51 = vld [vmem:[#allocation9 + $0x364] ss:$16 sps:$4 sm:$0xff]  }
  0x80   :  { %607 = vmatprep.subr.bf16.mxu0 %v3177_v39  ;;  %648 = vmatprep.subr.bf16.mxu1 %v3179_v0  ;;  %v3650_v38 = vld [vmem:[#allocation9 + $0x3e0] ss:$16 sps:$4 sm:$0xff]   ;;  %v3655_v39 = vld [vmem:[#allocation9 + $0x1c4] ss:$16 sps:$4 sm:$0xff]  }
  0x81   :  { %v3653_v0 = vld [vmem:[#allocation9 + $0x1c0] ss:$16 sps:$4 sm:$0xff]   ;;  %v3682_v55 = vld [vmem:[#allocation9 + $0x344] ss:$16 sps:$4 sm:$0xff]  }
  0x82   :  { %v3685_v58 = vld [vmem:[#allocation9 + $0x124] ss:$16 sps:$4 sm:$0xff]  }
  0x83   :  { %608 = vmatpush1.bf16.msra.mxu0 %v3176_v44  ;;  %649 = vmatpush1.bf16.msra.mxu1 %v3178_v45  ;;  %v3659_v44 = vld [vmem:[#allocation9 + $0x1a0] ss:$16 sps:$4 sm:$0xff]   ;;  %v3688_v59 = vld [vmem:[#allocation9 + $0x324] ss:$16 sps:$4 sm:$0xff]  }
  0x84   :  { %609 = vmatprep.subr.bf16.mxu0 %v3169_v46  ;;  %650 = vmatprep.subr.bf16.mxu1 %v3171_v48  ;;  %v3662_v45 = vld [vmem:[#allocation9 + $0x3a0] ss:$16 sps:$4 sm:$0xff]   ;;  %v3667_v46 = vld [vmem:[#allocation9 + $0x184] ss:$16 sps:$4 sm:$0xff]  }
  0x85   :  { %v3665_v48 = vld [vmem:[#allocation9 + $0x180] ss:$16 sps:$4 sm:$0xff]  }
  0x87   :  { %610 = vmatpush1.bf16.msra.mxu0 %v3168_v52  ;;  %651 = vmatpush1.bf16.msra.mxu1 %v3170_v53  ;;  %v3671_v52 = vld [vmem:[#allocation9 + $0x160] ss:$16 sps:$4 sm:$0xff]  }
  0x88   :  { %611 = vmatprep.subr.bf16.mxu0 %v3161_v54  ;;  %652 = vmatprep.subr.bf16.mxu1 %v3163_v56  ;;  %v3674_v53 = vld [vmem:[#allocation9 + $0x360] ss:$16 sps:$4 sm:$0xff]   ;;  %v3679_v54 = vld [vmem:[#allocation9 + $0x144] ss:$16 sps:$4 sm:$0xff]  }
  0x89   :  { %v3677_v56 = vld [vmem:[#allocation9 + $0x140] ss:$16 sps:$4 sm:$0xff]  }
  0x8b   :  { %612 = vmatpush1.bf16.msra.mxu0 %v3160_v60  ;;  %653 = vmatpush1.bf16.msra.mxu1 %v3162_v61  ;;  %v3683_v60 = vld [vmem:[#allocation9 + $0x120] ss:$16 sps:$4 sm:$0xff]  }
  0x8c   :  { %613 = vmatprep.subr.bf16.mxu0 %v3153_v62  ;;  %654 = vmatprep.subr.bf16.mxu1 %v3155_v63  ;;  %v3686_v61 = vld [vmem:[#allocation9 + $0x320] ss:$16 sps:$4 sm:$0xff]   ;;  %v3691_v62 = vld [vmem:[#allocation9 + $0x104] ss:$16 sps:$4 sm:$0xff]  }
  0x8d   :  { %v3694_v63 = vld [vmem:[#allocation9 + $0x304] ss:$16 sps:$4 sm:$0xff]  }
  0x8f   :  { %614 = vmatpush1.bf16.msra.mxu0 %v3152_v2  ;;  %655 = vmatpush1.bf16.msra.mxu1 %v3154_v4  ;;  %v3692_v2 = vld [vmem:[#allocation9 + $0x300] ss:$16 sps:$4 sm:$0xff]   ;;  %v3700_v4 = vld [vmem:[#allocation9 + $0x6e4] ss:$16 sps:$4 sm:$0xff]  }
  0x90   :  { %2332 = vmatprep.subr.bf16.mxu0 %v3601_v1  ;;  %2373 = vmatprep.subr.bf16.mxu1 %v3604_v3  ;;  %v3689_v1 = vld [vmem:[#allocation9 + $0x100] ss:$16 sps:$4 sm:$0xff]   ;;  %v3697_v3 = vld [vmem:[#allocation9 + $0x4e4] ss:$16 sps:$4 sm:$0xff]  }
  0x92   :  { %632 = vmatmul.mubr.bf16.vlgmr.msra.gmra.mxu0 %v4263_v12  ;;  %673 = vmatmul.mubr.bf16.vlgmr.msra.gmra.mxu1 %v4263_v12  ;;  %v3623_v12 = vld [vmem:[#allocation9 + $0x60] ss:$16 sps:$4 sm:$0xff]  }
  0x93   :  { %2333 = vmatpush1.bf16.msra.mxu0 %v3599_v5  ;;  %2374 = vmatpush1.bf16.msra.mxu1 %v3602_v6  ;;  %v710_v5 = vlaneseq }
  0x94   :  { %2334 = vmatprep.subr.bf16.mxu0 %v3607_v7  ;;  %2375 = vmatprep.subr.bf16.mxu1 %v3610_v8  ;;  %v4273_v7 = vld [vmem:[#allocation8] sm:$0xff] }
  0x95   :  { %v4271_v6 = vshrl.u32 %v710_v5, 7  ;;  %v3739_v5 = vld [vmem:[#allocation9 + $0x404] ss:$16 sps:$4 sm:$0xff]  }
  0x97   :  { %2335 = vmatpush1.bf16.msra.mxu0 %v3605_v9  ;;  %2376 = vmatpush1.bf16.msra.mxu1 %v3608_v10  ;;  %v728_v8 = vsub.s32 4, %v4271_v6  ;;  %v736_v10 = vsub.s32 6, %v4271_v6 }
  0x98   :  { %2336 = vmatprep.subr.bf16.mxu0 %v3613_v11  ;;  %2377 = vmatprep.subr.bf16.mxu1 %v3616_v13  ;;  %v712_v13 = vsub.s32 0, %v4271_v6 }
  0x99   :  { %v4277_v9 = vrot.slane %v4273_v7, %v728_v8  ;;  %v4281_v11 = vrot.slane %v4273_v7, %v736_v10 }
  0x9b   :  { %2337 = vmatpush1.bf16.msra.mxu0 %v3611_v14  ;;  %2378 = vmatpush1.bf16.msra.mxu1 %v3614_v15  ;;  %v720_v14 = vsub.s32 2, %v4271_v6  ;;  %v716_v15 = vsub.s32 1, %v4271_v6 }
  0x9c   :  { %2338 = vmatprep.subr.bf16.mxu0 %v3619_v16  ;;  %2379 = vmatprep.subr.bf16.mxu1 %v3622_v17  ;;  %v724_v16 = vsub.s32 3, %v4271_v6  ;;  %v713_v17 = vrot.slane %v4273_v7, %v712_v13 }
  0x9f   :  { %2339 = vmatpush1.bf16.msra.mxu0 %v3617_v18  ;;  %2380 = vmatpush1.bf16.msra.mxu1 %v3620_v19  ;;  %v721_v18 = vrot.slane %v4273_v7, %v720_v14  ;;  %v717_v19 = vrot.slane %v4273_v7, %v716_v15 }
  0xa0   :  { %2340 = vmatprep.subr.bf16.mxu0 %v3625_v20  ;;  %2381 = vmatprep.subr.bf16.mxu1 %v3628_v21  ;;  %v725_v21 = vrot.slane %v4273_v7, %v724_v16 }
  0xa3   :  { %2341 = vmatpush1.bf16.msra.mxu0 %v3623_v12  ;;  %2382 = vmatpush1.bf16.msra.mxu1 %v3626_v22 }
  0xa4   :  { %2342 = vmatprep.subr.bf16.mxu0 %v3631_v23  ;;  %2383 = vmatprep.subr.bf16.mxu1 %v3634_v24 }
  0xa7   :  { %2343 = vmatpush1.bf16.msra.mxu0 %v3629_v25  ;;  %2384 = vmatpush1.bf16.msra.mxu1 %v3632_v26 }
  0xa8   :  { %2344 = vmatprep.subr.bf16.mxu0 %v3637_v27  ;;  %2385 = vmatprep.subr.bf16.mxu1 %v3640_v28 }
  0xab   :  { %2345 = vmatpush1.bf16.msra.mxu0 %v3635_v29  ;;  %2386 = vmatpush1.bf16.msra.mxu1 %v3638_v30 }
  0xac   :  { %2346 = vmatprep.subr.bf16.mxu0 %v3643_v31  ;;  %2387 = vmatprep.subr.bf16.mxu1 %v3646_v32 }
  0xaf   :  { %2347 = vmatpush1.bf16.msra.mxu0 %v3641_v33  ;;  %2388 = vmatpush1.bf16.msra.mxu1 %v3644_v34 }
  0xb0   :  { %2348 = vmatprep.subr.bf16.mxu0 %v3649_v35  ;;  %2389 = vmatprep.subr.bf16.mxu1 %v3652_v36 }
  0xb3   :  { %2349 = vmatpush2.bf16.msra.mxu0 %v3647_v37  ;;  %2390 = vmatpush2.bf16.msra.mxu1 %v3650_v38  ;;  %v3695_v38 = vld [vmem:[#allocation9 + $0x4e0] ss:$16 sps:$4 sm:$0xff]  }
  0xb4   :  { %2350 = vmatprep.subr.bf16.mxu0 %v3655_v39  ;;  %2391 = vmatprep.subr.bf16.mxu1 %v3658_v40 }
  0xb7   :  { %2351 = vmatpush2.bf16.msra.mxu0 %v3653_v0  ;;  %2392 = vmatpush2.bf16.msra.mxu1 %v3656_v41  ;;  %v3698_v0 = vld [vmem:[#allocation9 + $0x6e0] ss:$16 sps:$4 sm:$0xff]   ;;  %v3703_v41 = vld [vmem:[#allocation9 + $0x4c4] ss:$16 sps:$4 sm:$0xff]  }
  0xb8   :  { %2352 = vmatprep.subr.bf16.mxu0 %v3661_v42  ;;  %2393 = vmatprep.subr.bf16.mxu1 %v3664_v43  ;;  %v3706_v42 = vld [vmem:[#allocation9 + $0x6c4] ss:$16 sps:$4 sm:$0xff]   ;;  %v3701_v43 = vld [vmem:[#allocation9 + $0x4c0] ss:$16 sps:$4 sm:$0xff]  }
  0xbb   :  { %2353 = vmatpush2.bf16.msra.mxu0 %v3659_v44  ;;  %2394 = vmatpush2.bf16.msra.mxu1 %v3662_v45  ;;  %v3704_v44 = vld [vmem:[#allocation9 + $0x6c0] ss:$16 sps:$4 sm:$0xff]   ;;  %v3709_v45 = vld [vmem:[#allocation9 + $0x4a4] ss:$16 sps:$4 sm:$0xff]  }
  0xbc   :  { %2354 = vmatprep.subr.bf16.mxu0 %v3667_v46  ;;  %2395 = vmatprep.subr.bf16.mxu1 %v3670_v47  ;;  %v3712_v46 = vld [vmem:[#allocation9 + $0x6a4] ss:$16 sps:$4 sm:$0xff]   ;;  %v3707_v47 = vld [vmem:[#allocation9 + $0x4a0] ss:$16 sps:$4 sm:$0xff]  }
  0xbf   :  { %2355 = vmatpush2.bf16.msra.mxu0 %v3665_v48  ;;  %2396 = vmatpush2.bf16.msra.mxu1 %v3668_v49  ;;  %v3710_v48 = vld [vmem:[#allocation9 + $0x6a0] ss:$16 sps:$4 sm:$0xff]   ;;  %v3715_v49 = vld [vmem:[#allocation9 + $0x484] ss:$16 sps:$4 sm:$0xff]  }
  0xc0   :  { %2356 = vmatprep.subr.bf16.mxu0 %v3673_v50  ;;  %2397 = vmatprep.subr.bf16.mxu1 %v3676_v51  ;;  %v3718_v50 = vld [vmem:[#allocation9 + $0x684] ss:$16 sps:$4 sm:$0xff]   ;;  %v3713_v51 = vld [vmem:[#allocation9 + $0x480] ss:$16 sps:$4 sm:$0xff]  }
  0xc3   :  { %2357 = vmatpush2.bf16.msra.mxu0 %v3671_v52  ;;  %2398 = vmatpush2.bf16.msra.mxu1 %v3674_v53  ;;  %v3716_v52 = vld [vmem:[#allocation9 + $0x680] ss:$16 sps:$4 sm:$0xff]   ;;  %v3721_v53 = vld [vmem:[#allocation9 + $0x464] ss:$16 sps:$4 sm:$0xff]  }
  0xc4   :  { %2358 = vmatprep.subr.bf16.mxu0 %v3679_v54  ;;  %2399 = vmatprep.subr.bf16.mxu1 %v3682_v55  ;;  %v3724_v54 = vld [vmem:[#allocation9 + $0x664] ss:$16 sps:$4 sm:$0xff]   ;;  %v3719_v55 = vld [vmem:[#allocation9 + $0x460] ss:$16 sps:$4 sm:$0xff]  }
  0xc7   :  { %2359 = vmatpush2.bf16.msra.mxu0 %v3677_v56  ;;  %2400 = vmatpush2.bf16.msra.mxu1 %v3680_v57  ;;  %v3722_v56 = vld [vmem:[#allocation9 + $0x660] ss:$16 sps:$4 sm:$0xff]   ;;  %v3727_v57 = vld [vmem:[#allocation9 + $0x444] ss:$16 sps:$4 sm:$0xff]  }
  0xc8   :  { %2360 = vmatprep.subr.bf16.mxu0 %v3685_v58  ;;  %2401 = vmatprep.subr.bf16.mxu1 %v3688_v59  ;;  %v3730_v58 = vld [vmem:[#allocation9 + $0x644] ss:$16 sps:$4 sm:$0xff]   ;;  %v3725_v59 = vld [vmem:[#allocation9 + $0x440] ss:$16 sps:$4 sm:$0xff]  }
  0xcb   :  { %2361 = vmatpush2.bf16.msra.mxu0 %v3683_v60  ;;  %2402 = vmatpush2.bf16.msra.mxu1 %v3686_v61  ;;  %v732_v60 = vsub.s32 5, %v4271_v6  ;;  %v3728_v61 = vld [vmem:[#allocation9 + $0x640] ss:$16 sps:$4 sm:$0xff]  }
  0xcc   :  { %2362 = vmatprep.subr.bf16.mxu0 %v3691_v62  ;;  %2403 = vmatprep.subr.bf16.mxu1 %v3694_v63  ;;  %v3733_v62 = vld [vmem:[#allocation9 + $0x424] ss:$16 sps:$4 sm:$0xff]   ;;  %v740_v63 = vsub.s32 7, %v4271_v6 }
  0xce   :  { %v741_v10 = vrot.slane %v4273_v7, %v740_v63  ;;  %v3782_v63 = vld [vmem:[#allocation9 + $0x720] ss:$16 sps:$4 sm:$0xff]  }
  0xcf   :  { %2363 = vmatpush2.bf16.msra.mxu0 %v3689_v1  ;;  %2404 = vmatpush2.bf16.msra.mxu1 %v3692_v2  ;;  %v3736_v1 = vld [vmem:[#allocation9 + $0x624] ss:$16 sps:$4 sm:$0xff]   ;;  %v3731_v2 = vld [vmem:[#allocation9 + $0x420] ss:$16 sps:$4 sm:$0xff]  }
  0xd0   :  { %2414 = vmatprep.subr.bf16.mxu0 %v3697_v3  ;;  %2455 = vmatprep.subr.bf16.mxu1 %v3700_v4  ;;  %v733_v3 = vrot.slane %v4273_v7, %v732_v60  ;;  %v3734_v4 = vld [vmem:[#allocation9 + $0x620] ss:$16 sps:$4 sm:$0xff]  }
 0x132   :  { %v551_v20 = vpop.f32.mrf.mxu0  ;;  %v592_v22 = vpop.f32.mrf.mxu1 }
 0x133   :  { %v750_v12 = vadd.f32 %v713_v17, %v551_v20  ;;  %v752_v23 = vadd.f32 %v721_v18, %v592_v22  ;;  %v3742_v17 = vld [vmem:[#allocation9 + $0x604] ss:$16 sps:$4 sm:$0xff]   ;;  %v3737_v20 = vld [vmem:[#allocation9 + $0x400] ss:$16 sps:$4 sm:$0xff]  }
 0x134   :  { %v553_v24 = vpop.f32.mrf.mxu0  ;;  %v594_v26 = vpop.f32.mrf.mxu1  ;;  %v3740_v22 = vld [vmem:[#allocation9 + $0x600] ss:$16 sps:$4 sm:$0xff]  }
 0x135   :  { %v751_v25 = vadd.f32 %v717_v19, %v553_v24  ;;  %v758_v27 = vmax.f32 %v750_v12, 0.0  ;;  %v760_v28 = vmax.f32 %v752_v23, 0.0  ;;  %v753_v29 = vadd.f32 %v725_v21, %v594_v26  ;;  %v3745_v23 = vld [vmem:[#allocation9 + $0x5e4] ss:$16 sps:$4 sm:$0xff]  }
 0x136   :  { %v555_v30 = vpop.f32.mrf.mxu0  ;;  %v596_v32 = vpop.f32.mrf.mxu1  ;;  %v3748_v26 = vld [vmem:[#allocation9 + $0x7e4] ss:$16 sps:$4 sm:$0xff]  }
 0x137   :  { %v759_v31 = vmax.f32 %v751_v25, 0.0  ;;  %v761_v33 = vmax.f32 %v753_v29, 0.0  ;;  %v4299_v35 = vpack.c.bf16 %v760_v28, %v760_v28  ;;  %v4303_v39 = vpack.c.bf16 %v758_v27, %v758_v27  ;;  %v3743_v30 = vld [vmem:[#allocation9 + $0x5e0] ss:$16 sps:$4 sm:$0xff]  }
 0x138   :  { %v556_v34 = vpop.f32.mrf.mxu0  ;;  %v597_v37 = vpop.f32.mrf.mxu1 }
 0x139   :  { %v4301_v36 = vpack.c.bf16 %v759_v31, %v759_v31  ;;  %v4305_v40 = vpack.c.bf16 %v761_v33, %v761_v33  ;;  %v3746_v33 = vld [vmem:[#allocation9 + $0x7e0] ss:$16 sps:$4 sm:$0xff]   ;;  %v3751_v34 = vld [vmem:[#allocation9 + $0x5c4] ss:$16 sps:$4 sm:$0xff]  }
 0x13b   :  { %2364 = vmatprep.mubr.bf16.mxu0 %v4301_v36  ;;  %2405 = vmatprep.mubr.bf16.mxu1 %v4305_v40 }
 0x13c   :  { %2365 = vmatmul.mubr.bf16.vlgmr.msra.gmra.mxu0 %v4303_v39  ;;  %2406 = vmatmul.mubr.bf16.vlgmr.msra.gmra.mxu1 %v4299_v35 }
 0x13d   :  { %2415 = vmatpush1.bf16.msra.mxu0 %v3695_v38  ;;  %2456 = vmatpush1.bf16.msra.mxu1 %v3698_v0  ;;  %v3754_v38 = vld [vmem:[#allocation9 + $0x7c4] ss:$16 sps:$4 sm:$0xff]   ;;  %v3749_v0 = vld [vmem:[#allocation9 + $0x5c0] ss:$16 sps:$4 sm:$0xff]  }
 0x13e   :  { %2416 = vmatprep.subr.bf16.mxu0 %v3703_v41  ;;  %2457 = vmatprep.subr.bf16.mxu1 %v3706_v42  ;;  %v3752_v41 = vld [vmem:[#allocation9 + $0x7c0] ss:$16 sps:$4 sm:$0xff]   ;;  %v3757_v42 = vld [vmem:[#allocation9 + $0x5a4] ss:$16 sps:$4 sm:$0xff]  }
 0x141   :  { %2417 = vmatpush1.bf16.msra.mxu0 %v3701_v43  ;;  %2458 = vmatpush1.bf16.msra.mxu1 %v3704_v44  ;;  %v3760_v43 = vld [vmem:[#allocation9 + $0x7a4] ss:$16 sps:$4 sm:$0xff]   ;;  %v3755_v44 = vld [vmem:[#allocation9 + $0x5a0] ss:$16 sps:$4 sm:$0xff]  }
 0x142   :  { %2418 = vmatprep.subr.bf16.mxu0 %v3709_v45  ;;  %2459 = vmatprep.subr.bf16.mxu1 %v3712_v46  ;;  %v3758_v45 = vld [vmem:[#allocation9 + $0x7a0] ss:$16 sps:$4 sm:$0xff]   ;;  %v3763_v46 = vld [vmem:[#allocation9 + $0x584] ss:$16 sps:$4 sm:$0xff]  }
 0x145   :  { %2419 = vmatpush1.bf16.msra.mxu0 %v3707_v47  ;;  %2460 = vmatpush1.bf16.msra.mxu1 %v3710_v48  ;;  %v3766_v47 = vld [vmem:[#allocation9 + $0x784] ss:$16 sps:$4 sm:$0xff]   ;;  %v3761_v48 = vld [vmem:[#allocation9 + $0x580] ss:$16 sps:$4 sm:$0xff]  }
 0x146   :  { %2420 = vmatprep.subr.bf16.mxu0 %v3715_v49  ;;  %2461 = vmatprep.subr.bf16.mxu1 %v3718_v50  ;;  %v3764_v49 = vld [vmem:[#allocation9 + $0x780] ss:$16 sps:$4 sm:$0xff]   ;;  %v3769_v50 = vld [vmem:[#allocation9 + $0x564] ss:$16 sps:$4 sm:$0xff]  }
 0x149   :  { %2421 = vmatpush1.bf16.msra.mxu0 %v3713_v51  ;;  %2462 = vmatpush1.bf16.msra.mxu1 %v3716_v52  ;;  %v3772_v51 = vld [vmem:[#allocation9 + $0x764] ss:$16 sps:$4 sm:$0xff]   ;;  %v3767_v52 = vld [vmem:[#allocation9 + $0x560] ss:$16 sps:$4 sm:$0xff]  }
 0x14a   :  { %2422 = vmatprep.subr.bf16.mxu0 %v3721_v53  ;;  %2463 = vmatprep.subr.bf16.mxu1 %v3724_v54  ;;  %v3770_v53 = vld [vmem:[#allocation9 + $0x760] ss:$16 sps:$4 sm:$0xff]   ;;  %v3775_v54 = vld [vmem:[#allocation9 + $0x544] ss:$16 sps:$4 sm:$0xff]  }
 0x14d   :  { %2423 = vmatpush1.bf16.msra.mxu0 %v3719_v55  ;;  %2464 = vmatpush1.bf16.msra.mxu1 %v3722_v56  ;;  %v3778_v55 = vld [vmem:[#allocation9 + $0x744] ss:$16 sps:$4 sm:$0xff]   ;;  %v3773_v56 = vld [vmem:[#allocation9 + $0x540] ss:$16 sps:$4 sm:$0xff]  }
 0x14e   :  { %2424 = vmatprep.subr.bf16.mxu0 %v3727_v57  ;;  %2465 = vmatprep.subr.bf16.mxu1 %v3730_v58  ;;  %v3776_v57 = vld [vmem:[#allocation9 + $0x740] ss:$16 sps:$4 sm:$0xff]   ;;  %v3781_v58 = vld [vmem:[#allocation9 + $0x524] ss:$16 sps:$4 sm:$0xff]  }
 0x151   :  { %2425 = vmatpush1.bf16.msra.mxu0 %v3725_v59  ;;  %2466 = vmatpush1.bf16.msra.mxu1 %v3728_v61  ;;  %v3784_v59 = vld [vmem:[#allocation9 + $0x724] ss:$16 sps:$4 sm:$0xff]   ;;  %v3779_v61 = vld [vmem:[#allocation9 + $0x520] ss:$16 sps:$4 sm:$0xff]  }
 0x152   :  { %2426 = vmatprep.subr.bf16.mxu0 %v3733_v62  ;;  %v4314_v8 = vpop.f32.mrf.mxu0  ;;  %2467 = vmatprep.subr.bf16.mxu1 %v3736_v1  ;;  %v4317_v18 = vpop.f32.mrf.mxu1  ;;  %v3787_v1 = vld [vmem:[#allocation9 + $0x504] ss:$16 sps:$4 sm:$0xff]  }
 0x153   :  { %v756_v60 = vadd.f32 %v4281_v11, %v4317_v18  ;;  %v754_v62 = vadd.f32 %v4277_v9, %v4314_v8  ;;  %v3796_v11 = vld [vmem:[#allocation9 + $0x2ec] ss:$16 sps:$4 sm:$0xff]   ;;  %v3791_v9 = vld [vmem:[#allocation9 + $0xe8] ss:$16 sps:$4 sm:$0xff]  }
 0x154   :  { %v635_v19 = vpop.f32.mrf.mxu0  ;;  %v676_v12 = vpop.f32.mrf.mxu1 }
 0x155   :  { %2427 = vmatpush1.bf16.msra.mxu0 %v3731_v2  ;;  %v755_v21 = vadd.f32 %v733_v3, %v635_v19  ;;  %2468 = vmatpush1.bf16.msra.mxu1 %v3734_v4  ;;  %v757_v25 = vadd.f32 %v741_v10, %v676_v12  ;;  %v3790_v2 = vld [vmem:[#allocation9 + $0x704] ss:$16 sps:$4 sm:$0xff]   ;;  %v764_v3 = vmax.f32 %v756_v60, 0.0  ;;  %v3785_v4 = vld [vmem:[#allocation9 + $0x500] ss:$16 sps:$4 sm:$0xff]  }
 0x156   :  { %2428 = vmatprep.subr.bf16.mxu0 %v3739_v5  ;;  %v637_v24 = vpop.f32.mrf.mxu0  ;;  %2469 = vmatprep.subr.bf16.mxu1 %v3742_v17  ;;  %v678_v28 = vpop.f32.mrf.mxu1  ;;  %v762_v5 = vmax.f32 %v754_v62, 0.0  ;;  %v3788_v10 = vld [vmem:[#allocation9 + $0x700] ss:$16 sps:$4 sm:$0xff]   ;;  %v3793_v17 = vld [vmem:[#allocation9 + $0xec] ss:$16 sps:$4 sm:$0xff]  }
 0x157   :  { %v763_v27 = vmax.f32 %v755_v21, 0.0  ;;  %v765_v7 = vmax.f32 %v757_v25, 0.0  ;;  %v4329_v18 = vpack.c.bf16 %v764_v3, %v764_v3  ;;  %v3794_v19 = vld [vmem:[#allocation9 + $0x2e8] ss:$16 sps:$4 sm:$0xff]   ;;  %v3802_v21 = vld [vmem:[#allocation9 + $0x2cc] ss:$16 sps:$4 sm:$0xff]  }
 0x158   :  { %v638_v29 = vpop.f32.mrf.mxu0  ;;  %v679_v32 = vpop.f32.mrf.mxu1  ;;  %v4331_v8 = vpack.c.bf16 %v762_v5, %v762_v5  ;;  %v3797_v12 = vld [vmem:[#allocation9 + $0xc8] ss:$16 sps:$4 sm:$0xff]   ;;  %v3808_v24 = vld [vmem:[#allocation9 + $0x2ac] ss:$16 sps:$4 sm:$0xff]  }
 0x159   :  { %2429 = vmatpush1.bf16.msra.mxu0 %v3737_v20  ;;  %v4319_v31 = vpack.c.bf16 %v763_v27, %v763_v27  ;;  %2470 = vmatpush1.bf16.msra.mxu1 %v3740_v22  ;;  %v4321_v37 = vpack.c.bf16 %v765_v7, %v765_v7  ;;  %v3799_v20 = vld [vmem:[#allocation9 + $0xcc] ss:$16 sps:$4 sm:$0xff]   ;;  %v3800_v22 = vld [vmem:[#allocation9 + $0x2c8] ss:$16 sps:$4 sm:$0xff]  }
 0x15a   :  { %2430 = vmatprep.subr.bf16.mxu0 %v3745_v23  ;;  %2471 = vmatprep.subr.bf16.mxu1 %v3748_v26  ;;  %v3805_v23 = vld [vmem:[#allocation9 + $0xac] ss:$16 sps:$4 sm:$0xff]   ;;  %v3803_v25 = vld [vmem:[#allocation9 + $0xa8] ss:$16 sps:$4 sm:$0xff]  }
 0x15b   :  { %2446 = vmatprep.mubr.bf16.mxu0 %v4319_v31  ;;  %2487 = vmatprep.mubr.bf16.mxu1 %v4321_v37  ;;  %v3806_v26 = vld [vmem:[#allocation9 + $0x2a8] ss:$16 sps:$4 sm:$0xff]   ;;  %v3811_v27 = vld [vmem:[#allocation9 + $0x8c] ss:$16 sps:$4 sm:$0xff]  }
 0x15c   :  { %v3814_v28 = vld [vmem:[#allocation9 + $0x28c] ss:$16 sps:$4 sm:$0xff]   ;;  %v3809_v7 = vld [vmem:[#allocation9 + $0x88] ss:$16 sps:$4 sm:$0xff]  }
 0x15d   :  { %2431 = vmatpush2.bf16.msra.mxu0 %v3743_v30  ;;  %2472 = vmatpush2.bf16.msra.mxu1 %v3746_v33  ;;  %v3817_v29 = vld [vmem:[#allocation9 + $0x6c] ss:$16 sps:$4 sm:$0xff]   ;;  %v3818_v32 = vld [vmem:[#allocation9 + $0x268] ss:$16 sps:$4 sm:$0xff]  }
 0x15e   :  { %2432 = vmatprep.subr.bf16.mxu0 %v3751_v34  ;;  %2473 = vmatprep.subr.bf16.mxu1 %v3754_v38  ;;  %v3820_v30 = vld [vmem:[#allocation9 + $0x26c] ss:$16 sps:$4 sm:$0xff]   ;;  %v3821_v38 = vld [vmem:[#allocation9 + $0x48] ss:$16 sps:$4 sm:$0xff]  }
 0x15f   :  { %v3823_v33 = vld [vmem:[#allocation9 + $0x4c] ss:$16 sps:$4 sm:$0xff]   ;;  %v3854_v60 = vld [vmem:[#allocation9 + $0x3a8] ss:$16 sps:$4 sm:$0xff]  }
 0x160   :  { %v3826_v34 = vld [vmem:[#allocation9 + $0x24c] ss:$16 sps:$4 sm:$0xff]   ;;  %v3866_v5 = vld [vmem:[#allocation9 + $0x368] ss:$16 sps:$4 sm:$0xff]  }
 0x161   :  { %2433 = vmatpush2.bf16.msra.mxu0 %v3749_v0  ;;  %2474 = vmatpush2.bf16.msra.mxu1 %v3752_v41  ;;  %v3824_v0 = vld [vmem:[#allocation9 + $0x248] ss:$16 sps:$4 sm:$0xff]   ;;  %v3829_v41 = vld [vmem:[#allocation9 + $0x2c] ss:$16 sps:$4 sm:$0xff]  }
 0x162   :  { %2434 = vmatprep.subr.bf16.mxu0 %v3757_v42  ;;  %2475 = vmatprep.subr.bf16.mxu1 %v3760_v43  ;;  %v3832_v42 = vld [vmem:[#allocation9 + $0x22c] ss:$16 sps:$4 sm:$0xff]   ;;  %v3827_v43 = vld [vmem:[#allocation9 + $0x28] ss:$16 sps:$4 sm:$0xff]  }
 0x163   :  { %v3862_v62 = vld [vmem:[#allocation9 + $0x38c] ss:$16 sps:$4 sm:$0xff]  }
 0x164   :  { %v3868_v3 = vld [vmem:[#allocation9 + $0x36c] ss:$16 sps:$4 sm:$0xff]  }
 0x165   :  { %2435 = vmatpush2.bf16.msra.mxu0 %v3755_v44  ;;  %2476 = vmatpush2.bf16.msra.mxu1 %v3758_v45  ;;  %v3830_v44 = vld [vmem:[#allocation9 + $0x228] ss:$16 sps:$4 sm:$0xff]   ;;  %v3835_v45 = vld [vmem:[#allocation9 + $0xc] ss:$16 sps:$4 sm:$0xff]  }
 0x166   :  { %2436 = vmatprep.subr.bf16.mxu0 %v3763_v46  ;;  %2477 = vmatprep.subr.bf16.mxu1 %v3766_v47  ;;  %v3838_v46 = vld [vmem:[#allocation9 + $0x20c] ss:$16 sps:$4 sm:$0xff]   ;;  %v3833_v47 = vld [vmem:[#allocation9 + $0x8] ss:$16 sps:$4 sm:$0xff]  }
 0x169   :  { %2437 = vmatpush2.bf16.msra.mxu0 %v3761_v48  ;;  %2478 = vmatpush2.bf16.msra.mxu1 %v3764_v49  ;;  %v3836_v48 = vld [vmem:[#allocation9 + $0x208] ss:$16 sps:$4 sm:$0xff]   ;;  %v3841_v49 = vld [vmem:[#allocation9 + $0x1ec] ss:$16 sps:$4 sm:$0xff]  }
 0x16a   :  { %2438 = vmatprep.subr.bf16.mxu0 %v3769_v50  ;;  %2479 = vmatprep.subr.bf16.mxu1 %v3772_v51  ;;  %v3844_v50 = vld [vmem:[#allocation9 + $0x3ec] ss:$16 sps:$4 sm:$0xff]   ;;  %v3839_v51 = vld [vmem:[#allocation9 + $0x1e8] ss:$16 sps:$4 sm:$0xff]  }
 0x16d   :  { %2439 = vmatpush2.bf16.msra.mxu0 %v3767_v52  ;;  %2480 = vmatpush2.bf16.msra.mxu1 %v3770_v53  ;;  %v3842_v52 = vld [vmem:[#allocation9 + $0x3e8] ss:$16 sps:$4 sm:$0xff]   ;;  %v3847_v53 = vld [vmem:[#allocation9 + $0x1cc] ss:$16 sps:$4 sm:$0xff]  }
 0x16e   :  { %2440 = vmatprep.subr.bf16.mxu0 %v3775_v54  ;;  %2481 = vmatprep.subr.bf16.mxu1 %v3778_v55  ;;  %v3850_v54 = vld [vmem:[#allocation9 + $0x3cc] ss:$16 sps:$4 sm:$0xff]   ;;  %v3845_v55 = vld [vmem:[#allocation9 + $0x1c8] ss:$16 sps:$4 sm:$0xff]  }
 0x171   :  { %2441 = vmatpush2.bf16.msra.mxu0 %v3773_v56  ;;  %2482 = vmatpush2.bf16.msra.mxu1 %v3776_v57  ;;  %v3848_v56 = vld [vmem:[#allocation9 + $0x3c8] ss:$16 sps:$4 sm:$0xff]   ;;  %v3853_v57 = vld [vmem:[#allocation9 + $0x1ac] ss:$16 sps:$4 sm:$0xff]  }
 0x172   :  { %2442 = vmatprep.subr.bf16.mxu0 %v3781_v58  ;;  %2483 = vmatprep.subr.bf16.mxu1 %v3784_v59  ;;  %v3856_v58 = vld [vmem:[#allocation9 + $0x3ac] ss:$16 sps:$4 sm:$0xff]   ;;  %v3851_v59 = vld [vmem:[#allocation9 + $0x1a8] ss:$16 sps:$4 sm:$0xff]  }
 0x175   :  { %2443 = vmatpush2.bf16.msra.mxu0 %v3779_v61  ;;  %2484 = vmatpush2.bf16.msra.mxu1 %v3782_v63  ;;  %v3859_v61 = vld [vmem:[#allocation9 + $0x18c] ss:$16 sps:$4 sm:$0xff]   ;;  %v3857_v63 = vld [vmem:[#allocation9 + $0x188] ss:$16 sps:$4 sm:$0xff]  }
 0x176   :  { %2444 = vmatprep.subr.bf16.mxu0 %v3787_v1  ;;  %2485 = vmatprep.subr.bf16.mxu1 %v3790_v2  ;;  %v3860_v1 = vld [vmem:[#allocation9 + $0x388] ss:$16 sps:$4 sm:$0xff]   ;;  %v3865_v2 = vld [vmem:[#allocation9 + $0x16c] ss:$16 sps:$4 sm:$0xff]  }
 0x179   :  { %2445 = vmatpush2.bf16.msra.mxu0 %v3785_v4  ;;  %2486 = vmatpush2.bf16.msra.mxu1 %v3788_v10  ;;  %v3863_v4 = vld [vmem:[#allocation9 + $0x168] ss:$16 sps:$4 sm:$0xff]   ;;  %v3871_v10 = vld [vmem:[#allocation9 + $0x14c] ss:$16 sps:$4 sm:$0xff]  }
 0x17a   :  { %2496 = vmatprep.subr.bf16.mxu0 %v3793_v17  ;;  %2537 = vmatprep.subr.bf16.mxu1 %v3796_v11  ;;  %v3874_v17 = vld [vmem:[#allocation9 + $0x34c] ss:$16 sps:$4 sm:$0xff]   ;;  %v3869_v11 = vld [vmem:[#allocation9 + $0x148] ss:$16 sps:$4 sm:$0xff]  }
 0x17c   :  { %2447 = vmatmul.mubr.bf16.vlgmr.msra.gmra.mxu0 %v4331_v8  ;;  %2488 = vmatmul.mubr.bf16.vlgmr.msra.gmra.mxu1 %v4329_v18 }
 0x17d   :  { %2497 = vmatpush1.bf16.msra.mxu0 %v3791_v9  ;;  %2528 = vmatprep.mubr.bf16.mxu0 %v4301_v36  ;;  %v3812_v36 = vld [vmem:[#allocation9 + $0x288] ss:$16 sps:$4 sm:$0xff]  }
 0x17e   :  { %2538 = vmatpush1.bf16.msra.mxu1 %v3794_v19  ;;  %2569 = vmatprep.mubr.bf16.mxu1 %v4305_v40  ;;  %v3815_v40 = vld [vmem:[#allocation9 + $0x68] ss:$16 sps:$4 sm:$0xff]   ;;  %v3877_v19 = vld [vmem:[#allocation9 + $0x12c] ss:$16 sps:$4 sm:$0xff]  }
 0x17f   :  { %2498 = vmatprep.subr.bf16.mxu0 %v3799_v20  ;;  %2539 = vmatprep.subr.bf16.mxu1 %v3802_v21  ;;  %v3872_v9 = vld [vmem:[#allocation9 + $0x348] ss:$16 sps:$4 sm:$0xff]   ;;  %v3880_v20 = vld [vmem:[#allocation9 + $0x32c] ss:$16 sps:$4 sm:$0xff]  }
 0x180   :  { %v3875_v21 = vld [vmem:[#allocation9 + $0x128] ss:$16 sps:$4 sm:$0xff]  }
 0x181   :  { %2499 = vmatpush1.bf16.msra.mxu0 %v3797_v12  ;;  %v3878_v12 = vld [vmem:[#allocation9 + $0x328] ss:$16 sps:$4 sm:$0xff]  }
 0x182   :  { %2540 = vmatpush1.bf16.msra.mxu1 %v3800_v22  ;;  %2500 = vmatprep.subr.bf16.mxu0 %v3805_v23  ;;  %v3883_v22 = vld [vmem:[#allocation9 + $0x10c] ss:$16 sps:$4 sm:$0xff]  }
 0x183   :  { %2541 = vmatprep.subr.bf16.mxu1 %v3808_v24  ;;  %v3886_v23 = vld [vmem:[#allocation9 + $0x30c] ss:$16 sps:$4 sm:$0xff]   ;;  %v3881_v24 = vld [vmem:[#allocation9 + $0x108] ss:$16 sps:$4 sm:$0xff]  }
 0x185   :  { %2501 = vmatpush1.bf16.msra.mxu0 %v3803_v25  ;;  %v3884_v25 = vld [vmem:[#allocation9 + $0x308] ss:$16 sps:$4 sm:$0xff]  }
 0x186   :  { %2542 = vmatpush1.bf16.msra.mxu1 %v3806_v26  ;;  %2502 = vmatprep.subr.bf16.mxu0 %v3811_v27  ;;  %v3889_v26 = vld [vmem:[#allocation9 + $0x4ec] ss:$16 sps:$4 sm:$0xff]  }
 0x187   :  { %2543 = vmatprep.subr.bf16.mxu1 %v3814_v28  ;;  %v3892_v27 = vld [vmem:[#allocation9 + $0x6ec] ss:$16 sps:$4 sm:$0xff]   ;;  %v3887_v28 = vld [vmem:[#allocation9 + $0x4e8] ss:$16 sps:$4 sm:$0xff]  }
 0x189   :  { %2503 = vmatpush1.bf16.msra.mxu0 %v3809_v7  ;;  %v3890_v7 = vld [vmem:[#allocation9 + $0x6e8] ss:$16 sps:$4 sm:$0xff]  }
 0x18a   :  { %2544 = vmatpush1.bf16.msra.mxu1 %v3812_v36  ;;  %2504 = vmatprep.subr.bf16.mxu0 %v3817_v29  ;;  %v3895_v36 = vld [vmem:[#allocation9 + $0x4cc] ss:$16 sps:$4 sm:$0xff]  }
 0x18b   :  { %2545 = vmatprep.subr.bf16.mxu1 %v3820_v30  ;;  %v3898_v29 = vld [vmem:[#allocation9 + $0x6cc] ss:$16 sps:$4 sm:$0xff]   ;;  %v3893_v30 = vld [vmem:[#allocation9 + $0x4c8] ss:$16 sps:$4 sm:$0xff]  }
 0x18d   :  { %2505 = vmatpush1.bf16.msra.mxu0 %v3815_v40  ;;  %v3896_v40 = vld [vmem:[#allocation9 + $0x6c8] ss:$16 sps:$4 sm:$0xff]  }
 0x18e   :  { %2546 = vmatpush1.bf16.msra.mxu1 %v3818_v32  ;;  %2506 = vmatprep.subr.bf16.mxu0 %v3823_v33  ;;  %v3901_v32 = vld [vmem:[#allocation9 + $0x4ac] ss:$16 sps:$4 sm:$0xff]  }
 0x18f   :  { %2547 = vmatprep.subr.bf16.mxu1 %v3826_v34  ;;  %v3904_v33 = vld [vmem:[#allocation9 + $0x6ac] ss:$16 sps:$4 sm:$0xff]   ;;  %v3899_v34 = vld [vmem:[#allocation9 + $0x4a8] ss:$16 sps:$4 sm:$0xff]  }
 0x191   :  { %2507 = vmatpush1.bf16.msra.mxu0 %v3821_v38  ;;  %v3907_v38 = vld [vmem:[#allocation9 + $0x48c] ss:$16 sps:$4 sm:$0xff]  }
 0x192   :  { %2548 = vmatpush1.bf16.msra.mxu1 %v3824_v0  ;;  %2508 = vmatprep.subr.bf16.mxu0 %v3829_v41  ;;  %v3905_v0 = vld [vmem:[#allocation9 + $0x488] ss:$16 sps:$4 sm:$0xff]   ;;  %v3913_v41 = vld [vmem:[#allocation9 + $0x46c] ss:$16 sps:$4 sm:$0xff]  }
 0x193   :  { %2549 = vmatprep.subr.bf16.mxu1 %v3832_v42  ;;  %v3916_v42 = vld [vmem:[#allocation9 + $0x66c] ss:$16 sps:$4 sm:$0xff]  }
 0x195   :  { %2509 = vmatpush1.bf16.msra.mxu0 %v3827_v43  ;;  %v3914_v43 = vld [vmem:[#allocation9 + $0x668] ss:$16 sps:$4 sm:$0xff]  }
 0x196   :  { %2550 = vmatpush1.bf16.msra.mxu1 %v3830_v44  ;;  %2510 = vmatprep.subr.bf16.mxu0 %v3835_v45  ;;  %v3919_v44 = vld [vmem:[#allocation9 + $0x44c] ss:$16 sps:$4 sm:$0xff]  }
 0x197   :  { %2551 = vmatprep.subr.bf16.mxu1 %v3838_v46  ;;  %v3922_v45 = vld [vmem:[#allocation9 + $0x64c] ss:$16 sps:$4 sm:$0xff]   ;;  %v3917_v46 = vld [vmem:[#allocation9 + $0x448] ss:$16 sps:$4 sm:$0xff]  }
 0x199   :  { %2511 = vmatpush1.bf16.msra.mxu0 %v3833_v47  ;;  %v3920_v47 = vld [vmem:[#allocation9 + $0x648] ss:$16 sps:$4 sm:$0xff]  }
 0x19a   :  { %2552 = vmatpush1.bf16.msra.mxu1 %v3836_v48  ;;  %2512 = vmatprep.subr.bf16.mxu0 %v3841_v49  ;;  %v3925_v48 = vld [vmem:[#allocation9 + $0x42c] ss:$16 sps:$4 sm:$0xff]  }
 0x19b   :  { %2553 = vmatprep.subr.bf16.mxu1 %v3844_v50  ;;  %v3928_v49 = vld [vmem:[#allocation9 + $0x62c] ss:$16 sps:$4 sm:$0xff]   ;;  %v3923_v50 = vld [vmem:[#allocation9 + $0x428] ss:$16 sps:$4 sm:$0xff]  }
 0x19d   :  { %2513 = vmatpush2.bf16.msra.mxu0 %v3839_v51  ;;  %v3926_v51 = vld [vmem:[#allocation9 + $0x628] ss:$16 sps:$4 sm:$0xff]  }
 0x19e   :  { %2554 = vmatpush2.bf16.msra.mxu1 %v3842_v52  ;;  %2514 = vmatprep.subr.bf16.mxu0 %v3847_v53  ;;  %v3931_v52 = vld [vmem:[#allocation9 + $0x40c] ss:$16 sps:$4 sm:$0xff]  }
 0x19f   :  { %2555 = vmatprep.subr.bf16.mxu1 %v3850_v54  ;;  %v3934_v53 = vld [vmem:[#allocation9 + $0x60c] ss:$16 sps:$4 sm:$0xff]   ;;  %v3929_v54 = vld [vmem:[#allocation9 + $0x408] ss:$16 sps:$4 sm:$0xff]  }
 0x1a1   :  { %2515 = vmatpush2.bf16.msra.mxu0 %v3845_v55  ;;  %v3932_v55 = vld [vmem:[#allocation9 + $0x608] ss:$16 sps:$4 sm:$0xff]  }
 0x1a2   :  { %2556 = vmatpush2.bf16.msra.mxu1 %v3848_v56  ;;  %2516 = vmatprep.subr.bf16.mxu0 %v3853_v57  ;;  %v3937_v56 = vld [vmem:[#allocation9 + $0x5ec] ss:$16 sps:$4 sm:$0xff]  }
 0x1a3   :  { %2557 = vmatprep.subr.bf16.mxu1 %v3856_v58  ;;  %v3940_v57 = vld [vmem:[#allocation9 + $0x7ec] ss:$16 sps:$4 sm:$0xff]   ;;  %v3935_v58 = vld [vmem:[#allocation9 + $0x5e8] ss:$16 sps:$4 sm:$0xff]  }
 0x1a5   :  { %2517 = vmatpush2.bf16.msra.mxu0 %v3851_v59  ;;  %v3938_v59 = vld [vmem:[#allocation9 + $0x7e8] ss:$16 sps:$4 sm:$0xff]  }
 0x1a6   :  { %2558 = vmatpush2.bf16.msra.mxu1 %v3854_v60  ;;  %2518 = vmatprep.subr.bf16.mxu0 %v3859_v61  ;;  %v3943_v60 = vld [vmem:[#allocation9 + $0x5cc] ss:$16 sps:$4 sm:$0xff]  }
 0x1a7   :  { %2559 = vmatprep.subr.bf16.mxu1 %v3862_v62  ;;  %v3946_v61 = vld [vmem:[#allocation9 + $0x7cc] ss:$16 sps:$4 sm:$0xff]   ;;  %v3941_v62 = vld [vmem:[#allocation9 + $0x5c8] ss:$16 sps:$4 sm:$0xff]  }
 0x1a9   :  { %2519 = vmatpush2.bf16.msra.mxu0 %v3857_v63  ;;  %v3944_v63 = vld [vmem:[#allocation9 + $0x7c8] ss:$16 sps:$4 sm:$0xff]  }
 0x1aa   :  { %2560 = vmatpush2.bf16.msra.mxu1 %v3860_v1  ;;  %2520 = vmatprep.subr.bf16.mxu0 %v3865_v2  ;;  %v3949_v1 = vld [vmem:[#allocation9 + $0x5ac] ss:$16 sps:$4 sm:$0xff]  }
 0x1ab   :  { %2561 = vmatprep.subr.bf16.mxu1 %v3868_v3  ;;  %v3952_v2 = vld [vmem:[#allocation9 + $0x7ac] ss:$16 sps:$4 sm:$0xff]   ;;  %v3947_v3 = vld [vmem:[#allocation9 + $0x5a8] ss:$16 sps:$4 sm:$0xff]  }
 0x1ad   :  { %2521 = vmatpush2.bf16.msra.mxu0 %v3863_v4  ;;  %v3950_v4 = vld [vmem:[#allocation9 + $0x7a8] ss:$16 sps:$4 sm:$0xff]  }
 0x1ae   :  { %2562 = vmatpush2.bf16.msra.mxu1 %v3866_v5  ;;  %2522 = vmatprep.subr.bf16.mxu0 %v3871_v10  ;;  %v3955_v5 = vld [vmem:[#allocation9 + $0x58c] ss:$16 sps:$4 sm:$0xff]  }
 0x1af   :  { %2563 = vmatprep.subr.bf16.mxu1 %v3874_v17  ;;  %v3958_v10 = vld [vmem:[#allocation9 + $0x78c] ss:$16 sps:$4 sm:$0xff]   ;;  %v3953_v17 = vld [vmem:[#allocation9 + $0x588] ss:$16 sps:$4 sm:$0xff]  }
 0x1b1   :  { %2523 = vmatpush2.bf16.msra.mxu0 %v3869_v11  ;;  %v3956_v11 = vld [vmem:[#allocation9 + $0x788] ss:$16 sps:$4 sm:$0xff]  }
 0x1b2   :  { %2564 = vmatpush2.bf16.msra.mxu1 %v3872_v9  ;;  %2524 = vmatprep.subr.bf16.mxu0 %v3877_v19  ;;  %v3961_v9 = vld [vmem:[#allocation9 + $0x56c] ss:$16 sps:$4 sm:$0xff]  }
 0x1b3   :  { %2565 = vmatprep.subr.bf16.mxu1 %v3880_v20  ;;  %v3964_v19 = vld [vmem:[#allocation9 + $0x76c] ss:$16 sps:$4 sm:$0xff]   ;;  %v3959_v20 = vld [vmem:[#allocation9 + $0x568] ss:$16 sps:$4 sm:$0xff]  }
 0x1b5   :  { %2525 = vmatpush2.bf16.msra.mxu0 %v3875_v21  ;;  %v3962_v21 = vld [vmem:[#allocation9 + $0x768] ss:$16 sps:$4 sm:$0xff]  }
 0x1b6   :  { %2566 = vmatpush2.bf16.msra.mxu1 %v3878_v12  ;;  %2526 = vmatprep.subr.bf16.mxu0 %v3883_v22  ;;  %v3967_v12 = vld [vmem:[#allocation9 + $0x54c] ss:$16 sps:$4 sm:$0xff]  }
 0x1b7   :  { %2567 = vmatprep.subr.bf16.mxu1 %v3886_v23  ;;  %v3970_v22 = vld [vmem:[#allocation9 + $0x74c] ss:$16 sps:$4 sm:$0xff]   ;;  %v3965_v23 = vld [vmem:[#allocation9 + $0x548] ss:$16 sps:$4 sm:$0xff]  }
 0x1b9   :  { %2527 = vmatpush2.bf16.msra.mxu0 %v3881_v24  ;;  %v3968_v24 = vld [vmem:[#allocation9 + $0x748] ss:$16 sps:$4 sm:$0xff]  }
 0x1ba   :  { %2568 = vmatpush2.bf16.msra.mxu1 %v3884_v25  ;;  %2578 = vmatprep.subr.bf16.mxu0 %v3889_v26  ;;  %v3973_v25 = vld [vmem:[#allocation9 + $0x52c] ss:$16 sps:$4 sm:$0xff]  }
 0x1bb   :  { %2619 = vmatprep.subr.bf16.mxu1 %v3892_v27  ;;  %v3976_v26 = vld [vmem:[#allocation9 + $0x72c] ss:$16 sps:$4 sm:$0xff]   ;;  %v3971_v27 = vld [vmem:[#allocation9 + $0x528] ss:$16 sps:$4 sm:$0xff]  }
 0x1bc   :  { %2529 = vmatmul.mubr.bf16.vlgmr.msra.gmra.mxu0 %v4303_v39  ;;  %v3902_v39 = vld [vmem:[#allocation9 + $0x6a8] ss:$16 sps:$4 sm:$0xff]  }
 0x1bd   :  { %2570 = vmatmul.mubr.bf16.vlgmr.msra.gmra.mxu1 %v4299_v35  ;;  %2579 = vmatpush1.bf16.msra.mxu0 %v3887_v28  ;;  %v3910_v35 = vld [vmem:[#allocation9 + $0x68c] ss:$16 sps:$4 sm:$0xff]   ;;  %v3974_v28 = vld [vmem:[#allocation9 + $0x728] ss:$16 sps:$4 sm:$0xff]  }
 0x1be   :  { %2610 = vmatprep.mubr.bf16.mxu0 %v4319_v31  ;;  %2620 = vmatpush1.bf16.msra.mxu1 %v3890_v7  ;;  %v3908_v31 = vld [vmem:[#allocation9 + $0x688] ss:$16 sps:$4 sm:$0xff]   ;;  %v3979_v7 = vld [vmem:[#allocation9 + $0x50c] ss:$16 sps:$4 sm:$0xff]  }
 0x1bf   :  { %2651 = vmatprep.mubr.bf16.mxu1 %v4321_v37  ;;  %2580 = vmatprep.subr.bf16.mxu0 %v3895_v36  ;;  %v3911_v37 = vld [vmem:[#allocation9 + $0x468] ss:$16 sps:$4 sm:$0xff]   ;;  %v3982_v36 = vld [vmem:[#allocation9 + $0x70c] ss:$16 sps:$4 sm:$0xff]  }
 0x1c0   :  { %2621 = vmatprep.subr.bf16.mxu1 %v3898_v29  ;;  %v3977_v29 = vld [vmem:[#allocation9 + $0x508] ss:$16 sps:$4 sm:$0xff]  }
 0x1c1   :  { %2581 = vmatpush1.bf16.msra.mxu0 %v3893_v30  ;;  %v3980_v30 = vld [vmem:[#allocation9 + $0x708] ss:$16 sps:$4 sm:$0xff]  }
 0x1c2   :  { %2622 = vmatpush1.bf16.msra.mxu1 %v3896_v40  ;;  %2582 = vmatprep.subr.bf16.mxu0 %v3901_v32  ;;  %v3983_v40 = vld [vmem:[#allocation11 + $0x78] sm:$0xff]  }
 0x1c3   :  { %2623 = vmatprep.subr.bf16.mxu1 %v3904_v33  ;;  %v3984_v32 = vld [vmem:[#allocation11 + $0x38] sm:$0xff]   ;;  %v3985_v33 = vld [vmem:[#allocation11 + $0x70] sm:$0xff]  }
 0x1c5   :  { %2583 = vmatpush1.bf16.msra.mxu0 %v3899_v34 }
 0x1c6   :  { %2624 = vmatpush1.bf16.msra.mxu1 %v3902_v39  ;;  %2584 = vmatprep.subr.bf16.mxu0 %v3907_v38  ;;  %v3986_v38 = vld [vmem:[#allocation11 + $0x30] sm:$0xff]  }
 0x1c7   :  { %2625 = vmatprep.subr.bf16.mxu1 %v3910_v35 }
 0x1c9   :  { %2585 = vmatpush1.bf16.msra.mxu0 %v3905_v0  ;;  %v3987_v0 = vld [vmem:[#allocation11 + $0x68] sm:$0xff]  }
 0x1ca   :  { %2626 = vmatpush1.bf16.msra.mxu1 %v3908_v31  ;;  %2586 = vmatprep.subr.bf16.mxu0 %v3913_v41 }
 0x1cb   :  { %2627 = vmatprep.subr.bf16.mxu1 %v3916_v42 }
 0x1cd   :  { %2587 = vmatpush1.bf16.msra.mxu0 %v3911_v37  ;;  %v3988_v37 = vld [vmem:[#allocation11 + $0x28] sm:$0xff]  }
 0x1ce   :  { %2628 = vmatpush1.bf16.msra.mxu1 %v3914_v43  ;;  %2588 = vmatprep.subr.bf16.mxu0 %v3919_v44  ;;  %v3989_v44 = vld [vmem:[#allocation11 + $0x60] sm:$0xff]  }
 0x1cf   :  { %2629 = vmatprep.subr.bf16.mxu1 %v3922_v45 }
 0x1d1   :  { %2589 = vmatpush1.bf16.msra.mxu0 %v3917_v46  ;;  %v3999_v46 = vld [vmem:[#allocation11 + $0xf8] sm:$0xff]  }
 0x1d2   :  { %2630 = vmatpush1.bf16.msra.mxu1 %v3920_v47  ;;  %2590 = vmatprep.subr.bf16.mxu0 %v3925_v48  ;;  %v4001_v47 = vld [vmem:[#allocation11 + $0xf0] sm:$0xff]   ;;  %v3991_v48 = vld [vmem:[#allocation11 + $0x58] sm:$0xff]  }
 0x1d3   :  { %2631 = vmatprep.subr.bf16.mxu1 %v3928_v49  ;;  %v4002_v49 = vld [vmem:[#allocation11 + $0xb0] sm:$0xff]  }
 0x1d5   :  { %2591 = vmatpush1.bf16.msra.mxu0 %v3923_v50  ;;  %v4003_v50 = vld [vmem:[#allocation11 + $0xe8] sm:$0xff]  }
 0x1d6   :  { %2632 = vmatpush1.bf16.msra.mxu1 %v3926_v51  ;;  %2592 = vmatprep.subr.bf16.mxu0 %v3931_v52  ;;  %v3992_v51 = vld [vmem:[#allocation11 + $0x18] sm:$0xff]   ;;  %v3993_v52 = vld [vmem:[#allocation11 + $0x50] sm:$0xff]  }
 0x1d7   :  { %2633 = vmatprep.subr.bf16.mxu1 %v3934_v53  ;;  %v4004_v53 = vld [vmem:[#allocation11 + $0xa8] sm:$0xff]  }
 0x1d9   :  { %2593 = vmatpush1.bf16.msra.mxu0 %v3929_v54  ;;  %v4005_v54 = vld [vmem:[#allocation11 + $0xe0] sm:$0xff]  }
 0x1da   :  { %2634 = vmatpush1.bf16.msra.mxu1 %v3932_v55  ;;  %2594 = vmatprep.subr.bf16.mxu0 %v3937_v56  ;;  %v3994_v55 = vld [vmem:[#allocation11 + $0x10] sm:$0xff]   ;;  %v3995_v56 = vld [vmem:[#allocation11 + $0x48] sm:$0xff]  }
 0x1db   :  { %2635 = vmatprep.subr.bf16.mxu1 %v3940_v57  ;;  %v4006_v57 = vld [vmem:[#allocation11 + $0xa0] sm:$0xff]  }
 0x1dd   :  { %2595 = vmatpush2.bf16.msra.mxu0 %v3935_v58  ;;  %v4007_v58 = vld [vmem:[#allocation11 + $0xd8] sm:$0xff]  }
 0x1de   :  { %2636 = vmatpush2.bf16.msra.mxu1 %v3938_v59  ;;  %2596 = vmatprep.subr.bf16.mxu0 %v3943_v60  ;;  %v3996_v59 = vld [vmem:[#allocation11 + $0x8] sm:$0xff]   ;;  %v3997_v60 = vld [vmem:[#allocation11 + $0x40] sm:$0xff]  }
 0x1df   :  { %2637 = vmatprep.subr.bf16.mxu1 %v3946_v61  ;;  %v4008_v61 = vld [vmem:[#allocation11 + $0x98] sm:$0xff]  }
 0x1e1   :  { %2597 = vmatpush2.bf16.msra.mxu0 %v3941_v62  ;;  %v3998_v62 = vld [vmem:[#allocation11] sm:$0xff]  }
 0x1e2   :  { %2638 = vmatpush2.bf16.msra.mxu1 %v3944_v63  ;;  %2598 = vmatprep.subr.bf16.mxu0 %v3949_v1  ;;  %v4346_v63 = vld [vmem:[%s4373_s4] sm:$0xf] }
 0x1e3   :  { %2639 = vmatprep.subr.bf16.mxu1 %v3952_v2  ;;  %v1035_v1 = vrot.slane %v4346_v63, %v712_v13  ;;  %v1039_v2 = vrot.slane %v4346_v63, %v716_v15  ;;  %v4012_v15 = vld [vmem:[#allocation11 + $0x88] sm:$0xff]  }
 0x1e5   :  { %2599 = vmatpush2.bf16.msra.mxu0 %v3947_v3 }
 0x1e6   :  { %2640 = vmatpush2.bf16.msra.mxu1 %v3950_v4  ;;  %2600 = vmatprep.subr.bf16.mxu0 %v3955_v5 }
 0x1e7   :  { %2641 = vmatprep.subr.bf16.mxu1 %v3958_v10 }
 0x1e9   :  { %2601 = vmatpush2.bf16.msra.mxu0 %v3953_v17  ;;  %v4009_v17 = vld [vmem:[#allocation11 + $0xd0] sm:$0xff]  }
 0x1ea   :  { %2642 = vmatpush2.bf16.msra.mxu1 %v3956_v11  ;;  %2602 = vmatprep.subr.bf16.mxu0 %v3961_v9 }
 0x1eb   :  { %2643 = vmatprep.subr.bf16.mxu1 %v3964_v19 }
 0x1ed   :  { %2603 = vmatpush2.bf16.msra.mxu0 %v3959_v20  ;;  %v4010_v20 = vld [vmem:[#allocation11 + $0x90] sm:$0xff]  }
 0x1ee   :  { %2644 = vmatpush2.bf16.msra.mxu1 %v3962_v21  ;;  %2604 = vmatprep.subr.bf16.mxu0 %v3967_v12 }
 0x1ef   :  { %2645 = vmatprep.subr.bf16.mxu1 %v3970_v22 }
 0x1f1   :  { %2605 = vmatpush2.bf16.msra.mxu0 %v3965_v23 }
 0x1f2   :  { %2646 = vmatpush2.bf16.msra.mxu1 %v3968_v24  ;;  %2606 = vmatprep.subr.bf16.mxu0 %v3973_v25  ;;  %v4011_v24 = vld [vmem:[#allocation11 + $0xc8] sm:$0xff]  }
 0x1f3   :  { %2647 = vmatprep.subr.bf16.mxu1 %v3976_v26 }
 0x1f5   :  { %2607 = vmatpush2.bf16.msra.mxu0 %v3971_v27 }
 0x1f6   :  { %2648 = vmatpush2.bf16.msra.mxu1 %v3974_v28  ;;  %2608 = vmatprep.subr.bf16.mxu0 %v3979_v7 }
 0x1f7   :  { %2649 = vmatprep.subr.bf16.mxu1 %v3982_v36 }
 0x1f9   :  { %2609 = vmatpush2.bf16.msra.mxu0 %v3977_v29  ;;  %v4013_v29 = vld [vmem:[#allocation11 + $0xc0] sm:$0xff]  }
 0x1fa   :  { %2650 = vmatpush2.bf16.msra.mxu1 %v3980_v30  ;;  %3510 = vmatprep.subr.bf16.mxu0 %v3983_v40  ;;  %v4014_v40 = vld [vmem:[#allocation11 + $0x80] sm:$0xff]  }
 0x1fb   :  { %3532 = vmatprep.subr.bf16.mxu1 %v3999_v46  ;;  %v4019_v46 = vld [vmem:[#allocation12 + $0x18] sm:$0xff]  }
 0x1fc   :  { %2611 = vmatmul.mubr.bf16.vlgmr.msra.gmra.mxu0 %v4331_v8  ;;  %v2366_v34 = vpop.f32.mrf.mxu0  ;;  %v2407_v39 = vpop.f32.mrf.mxu1  ;;  %v4000_v8 = vld [vmem:[#allocation11 + $0xb8] sm:$0xff]  }
 0x1fd   :  { %2652 = vmatmul.mubr.bf16.vlgmr.msra.gmra.mxu1 %v4329_v18  ;;  %3511 = vmatpush3.bf16.msra.mxu0 %v3984_v32  ;;  %v3990_v18 = vld [vmem:[#allocation11 + $0x20] sm:$0xff]   ;;  %v2367_v3 = vadd.f32 %v2366_v34, %v1035_v1 }
 0x1fe   :  { %v2368_v35 = vpop.f32.mrf.mxu0  ;;  %3512 = vmatprep.subr.bf16.mxu0 %v3985_v33  ;;  %v2409_v31 = vpop.f32.mrf.mxu1  ;;  %3533 = vmatpush3.bf16.msra.mxu1 %v4000_v8  ;;  %v1043_v8 = vrot.slane %v4346_v63, %v720_v14 }
 0x1ff   :  { %3534 = vmatprep.subr.bf16.mxu1 %v4001_v47  ;;  %v2369_v4 = vadd.f32 %v2368_v35, %v1039_v2  ;;  %v2408_v5 = vadd.f32 %v2407_v39, %v2367_v3  ;;  %v1047_v47 = vrot.slane %v4346_v63, %v724_v16  ;;  %v4020_v2 = vld [vmem:[#allocation12 + $0x10] sm:$0xff]  }
 0x200   :  { %v2370_v41 = vpop.f32.mrf.mxu0  ;;  %v2411_v42 = vpop.f32.mrf.mxu1 }
 0x201   :  { %3513 = vmatpush3.bf16.msra.mxu0 %v3986_v38  ;;  %v2410_v11 = vadd.f32 %v2409_v31, %v2369_v4  ;;  %v4015_v42 = vld [vmem:[#allocation12 + $0x38] sm:$0xff]  }
 0x202   :  { %v2371_v43 = vpop.f32.mrf.mxu0  ;;  %3514 = vmatprep.subr.bf16.mxu0 %v3987_v0  ;;  %v2412_v45 = vpop.f32.mrf.mxu1  ;;  %3535 = vmatpush3.bf16.msra.mxu1 %v4002_v49 }
 0x203   :  { %3536 = vmatprep.subr.bf16.mxu1 %v4003_v50  ;;  %v4016_v43 = vld [vmem:[#allocation12 + $0x30] sm:$0xff]   ;;  %v4018_v45 = vld [vmem:[#allocation12 + $0x20] sm:$0xff]  }
 0x205   :  { %3515 = vmatpush3.bf16.msra.mxu0 %v3988_v37  ;;  %v4190_v37 = vmov 0.0  }
 0x206   :  { %3516 = vmatprep.subr.bf16.mxu0 %v3989_v44  ;;  %3537 = vmatpush3.bf16.msra.mxu1 %v4004_v53  ;;  %v4017_v44 = vld [vmem:[#allocation12 + $0x28] sm:$0xff]  }
 0x207   :  { %3538 = vmatprep.subr.bf16.mxu1 %v4005_v54 }
 0x209   :  { %3517 = vmatpush3.bf16.msra.mxu0 %v3990_v18 }
 0x20a   :  { %3518 = vmatprep.subr.bf16.mxu0 %v3991_v48  ;;  %3539 = vmatpush3.bf16.msra.mxu1 %v4006_v57 }
 0x20b   :  { %3540 = vmatprep.subr.bf16.mxu1 %v4007_v58 }
 0x20d   :  { %3519 = vmatpush3.bf16.msra.mxu0 %v3992_v51 }
 0x20e   :  { %3520 = vmatprep.subr.bf16.mxu0 %v3993_v52  ;;  %3541 = vmatpush3.bf16.msra.mxu1 %v4008_v61 }
 0x20f   :  { %3542 = vmatprep.subr.bf16.mxu1 %v4009_v17 }
 0x211   :  { %3521 = vmatpush3.bf16.msra.mxu0 %v3994_v55 }
 0x212   :  { %3522 = vmatprep.subr.bf16.mxu0 %v3995_v56  ;;  %3543 = vmatpush3.bf16.msra.mxu1 %v4010_v20 }
 0x213   :  { %3544 = vmatprep.subr.bf16.mxu1 %v4011_v24 }
 0x215   :  { %3523 = vmatpush3.bf16.msra.mxu0 %v3996_v59 }
 0x216   :  { %3524 = vmatprep.subr.bf16.mxu0 %v3997_v60  ;;  %3545 = vmatpush3.bf16.msra.mxu1 %v4012_v15 }
 0x217   :  { %3546 = vmatprep.subr.bf16.mxu1 %v4013_v29 }
 0x219   :  { %3525 = vmatpush3.bf16.msra.mxu0 %v3998_v62 }
 0x21a   :  { %3547 = vmatpush3.bf16.msra.mxu1 %v4014_v40  ;;  %3563 = vmatprep.subr.bf16.mxu0 %v4190_v37 }
 0x23c   :  { %v2448_v10 = vpop.f32.mrf.mxu0  ;;  %v2489_v19 = vpop.f32.mrf.mxu1 }
 0x23d   :  { %v2449_v9 = vadd.f32 %v2448_v10, %v2408_v5  ;;  %v4021_v10 = vld [vmem:[#allocation12 + $0x8] sm:$0xff]  }
 0x23e   :  { %v2450_v21 = vpop.f32.mrf.mxu0  ;;  %v2491_v23 = vpop.f32.mrf.mxu1 }
 0x23f   :  { %v2490_v12 = vadd.f32 %v2489_v19, %v2449_v9  ;;  %v2451_v22 = vadd.f32 %v2450_v21, %v2410_v11  ;;  %v4022_v11 = vld [vmem:[#allocation12] sm:$0xff]   ;;  %v3468_v9 = vld [vmem:[%s4375_s6] ss:$0 sm:$0xff]  ;;  %s4192_s6 = smov [#allocation14]  }
 0x240   :  { %v2452_v13 = vpop.f32.mrf.mxu0  ;;  %v2493_v26 = vpop.f32.mrf.mxu1  ;;  %s3136_s23 = sshll.u32 %s4192_s6, 4  ;;  %s3137_s23 = int_to_ptr.vmem [resolvable:$true] %s3136_s23 }
 0x241   :  { %v2492_v25 = vadd.f32 %v2491_v23, %v2451_v22  ;;  %v2660_v27 = vmax.f32 %v2490_v12, 0.0  ;;  %v3501_v26 = vld [vmem:[%s4377_s8] ss:$0 sm:$0xff]  ;;  %s4147_s24 = scalar_lea.vmem %s3137_s23, 128  ;;  %p4152_p3 = scmp.lt.s32.totalorder %s3137_s23, %s3137_s23 }
 0x242   :  { %v2453_v28 = vpop.f32.mrf.mxu0  ;;  %v2494_v36 = vpop.f32.mrf.mxu1  ;;  %p4148_p2 = scmp.ne.s32.totalorder %s3137_s23, %s4147_s24  ;;  %p4153_p4 = scmp.lt.s32.totalorder %s4147_s24, %s4147_s24 }
 0x243   :  { %v2661_v7 = vmax.f32 %v2492_v25, 0.0  ;;  %v2664_v32 = vpack.c.bf16 %v2660_v27, %v2660_v27 }
 0x244   :  { %p4154_p5 = por %p4153_p4, %p4152_p3 }
 0x245   :  { %v2665_v30 = vpack.c.bf16 %v2661_v7, %v2661_v7 }
 0x246   :  { %p4155_p6 = pnand %p4154_p5, %p4148_p2 }
 0x247   :  { %2963 = vmatprep.mubr.bf16.mxu0 %v2665_v30 }
 0x248   :  { %2964 = vmatmul.mubr.bf16.vlgmr.msra.gmra.mxu0 %v2664_v32 }
 0x249   :  { %3564 = vmatpush3.bf16.msra.mxu0 %v4015_v42  ;;  %3579 = vmatprep.mubr.msk.bf16.mxu0 %vm4191_vm0, %v4190_v37 }
 0x24a   :  { %3565 = vmatprep.subr.bf16.mxu0 %v4190_v37 }
 0x24d   :  { %3566 = vmatpush3.bf16.msra.mxu0 %v4016_v43 }
 0x24e   :  { %3567 = vmatprep.subr.bf16.mxu0 %v4190_v37 }
 0x251   :  { %3568 = vmatpush3.bf16.msra.mxu0 %v4017_v44 }
 0x252   :  { %3569 = vmatprep.subr.bf16.mxu0 %v4190_v37 }
 0x255   :  { %3570 = vmatpush3.bf16.msra.mxu0 %v4018_v45 }
 0x256   :  { %3571 = vmatprep.subr.bf16.mxu0 %v4190_v37 }
 0x259   :  { %3572 = vmatpush3.bf16.msra.mxu0 %v4019_v46 }
 0x25a   :  { %3573 = vmatprep.subr.bf16.mxu0 %v4190_v37 }
 0x25d   :  { %3574 = vmatpush3.bf16.msra.mxu0 %v4020_v2 }
 0x25e   :  { %3575 = vmatprep.subr.bf16.mxu0 %v4190_v37 }
 0x261   :  { %3576 = vmatpush3.bf16.msra.mxu0 %v4021_v10 }
 0x262   :  { %3577 = vmatprep.subr.bf16.mxu0 %v4190_v37 }
 0x265   :  { %3578 = vmatpush3.bf16.msra.mxu0 %v4022_v11 }
 0x27c   :  { %v2530_v33 = vpop.f32.mrf.mxu0 }
 0x27d   :  { %v2571_v34 = vpop.f32.mrf.mxu1  ;;  %v2531_v18 = vadd.f32 %v2530_v33, %v1043_v8 }
 0x27e   :  { %v2532_v39 = vpop.f32.mrf.mxu0 }
 0x27f   :  { %v2573_v38 = vpop.f32.mrf.mxu1  ;;  %v2533_v48 = vadd.f32 %v2532_v39, %v1047_v47  ;;  %v2572_v49 = vadd.f32 %v2571_v34, %v2531_v18 }
 0x280   :  { %v2534_v35 = vpop.f32.mrf.mxu0 }
 0x281   :  { %v2575_v0 = vpop.f32.mrf.mxu1  ;;  %v2574_v51 = vadd.f32 %v2573_v38, %v2533_v48 }
 0x282   :  { %v2535_v31 = vpop.f32.mrf.mxu0 }
 0x283   :  { %v2576_v41 = vpop.f32.mrf.mxu1 }
 0x2bc   :  { %v2612_v50 = vpop.f32.mrf.mxu0 }
 0x2bd   :  { %v2613_v52 = vadd.f32 %v2612_v50, %v2572_v49  ;;  %v2653_v53 = vpop.f32.mrf.mxu1 }
 0x2be   :  { %v2614_v54 = vpop.f32.mrf.mxu0 }
 0x2bf   :  { %v2654_v55 = vadd.f32 %v2653_v53, %v2613_v52  ;;  %v2615_v56 = vadd.f32 %v2614_v54, %v2574_v51  ;;  %v2655_v57 = vpop.f32.mrf.mxu1 }
 0x2c0   :  { %v2616_v58 = vpop.f32.mrf.mxu0 }
 0x2c1   :  { %v2656_v59 = vadd.f32 %v2655_v57, %v2615_v56  ;;  %v2657_v60 = vpop.f32.mrf.mxu1  ;;  %v2662_v61 = vmax.f32 %v2654_v55, 0.0 }
 0x2c2   :  { %v2617_v14 = vpop.f32.mrf.mxu0 }
 0x2c3   :  { %v2663_v62 = vmax.f32 %v2656_v59, 0.0  ;;  %v2658_v6 = vpop.f32.mrf.mxu1  ;;  %v2666_v16 = vpack.c.bf16 %v2662_v61, %v2662_v61 }
 0x2c5   :  { %v2667_v1 = vpack.c.bf16 %v2663_v62, %v2663_v62 }
 0x2c7   :  { %3003 = vmatprep.mubr.bf16.mxu1 %v2667_v1 }
 0x2c8   :  { %3004 = vmatmul.mubr.bf16.vlgmr.msra.gmra.mxu1 %v2666_v16 }
 0x308   :  { %v3526_v63 = vpop.f32.mrf.mxu0 }
 0x30a   :  { %v3527_v3 = vpop.f32.mrf.mxu0 }
 0x30b   :  { %v3528_v4 = vadd.f32 %v3527_v3, %v3526_v63 }
 0x30c   :  { %v3529_v5 = vpop.f32.mrf.mxu0 }
 0x30d   :  { %v2966_v21 = vadd.f32 %v3528_v4, %v3468_v9 }
 0x30e   :  { %v3530_v17 = vpop.f32.mrf.mxu0 }
 0x388   :  { %v3548_v19 = vpop.f32.mrf.mxu1 }
 0x38a   :  { %v3549_v20 = vpop.f32.mrf.mxu1 }
 0x38b   :  { %v3550_v12 = vadd.f32 %v3549_v20, %v3548_v19 }
 0x38c   :  { %v3551_v22 = vpop.f32.mrf.mxu1 }
 0x38d   :  { %v3006_v23 = vadd.f32 %v3550_v12, %v2966_v21 }
 0x38e   :  { %v3552_v13 = vpop.f32.mrf.mxu1 }
 0x38f   :  { %v3011_v24 = vmax.f32 %v3006_v23, 0.0 }
 0x391   :  { %v3012_v25 = vpack.c.bf16 %v3011_v24, %v3011_v24 }
 0x393   :  { %3580 = vmatmul.mubr.bf16.vlgmr.msra.gmra.mxu0 %v3012_v25 }
 0x453   :  { %v3118_v15 = vpop.f32.mrf.mxu0 }
 0x454   :  { %v3119_v27 = vadd.f32 %v3501_v26, %v3118_v15 }
 0x455   :  { %v3581_v28 = vpop.f32.mrf.mxu0 }
 0x456   :  { %v3124_v7 = vsub.f32 0.0, %v3119_v27 }
 0x457   :  { %v3121_v36 = vpop.f32.mrf.mxu0 }
 0x458   :  { %v3125_v29 = vmul.f32 1.442695, %v3124_v7 }
 0x459   :  { %v3582_v30 = vpop.f32.mrf.mxu0 }
 0x45a   :  { %4023 = vpow2.f32 %v3125_v29 }
 0x467   :  { %v4024_v40 = vpop.eup %4023 }
 0x468   :  { %v3127_v32 = vadd.f32 1.0, %v4024_v40 }
 0x46a   :  { %4025 = vrcp.f32 %v3127_v32 }
 0x477   :  { %v4026_v33 = vpop.eup %4025 }
 0x478   :  { %3129 = vst [vmem:[#allocation14] sm:$0xff] %v4026_v33 }
 0x479   :  { %4158 = shalt.err (!%p4155_p6)
}
 0x47a   :  { %3139 = dma.vmem_to_hbm [thread:$0]  %s3137_s23, 128, %s4378_s9, [#allocation5]  }
 0x47b   :  { %4175 = dma.done.wait [#allocation5], 128  }
 0x47c   :  { %4176 = vsyncadd [#allocation5], 4294967168 }
 0x47d   :  { %3143 = vsyncpa [#allocation4], 1 }
 0x47e   :  { %3144 = vsyncpa [#allocation7], 1 }
 0x47f   :  { %3145 = vsyncpa [#allocation10], 1 }
 0x480   :  { %3146 = vsyncpa [#allocation13], 1 }
 0x481   :  { %3147 = vsyncpa [#allocation5], 1 }

// kernel: tpu_custom_call.1
= control target key start
LH: loop header
LB: loop body
LE: loop exit
PB: predicated region body
PF: predicated region fallthrough
CT: control target
= control target key end

     0   :  { %14 = vsyncpa [#allocation4], 0  ;;  %s4369_s0 = inlined_call_operand.hbm [shape: bf16[8,128], index: 0, kind: input, shape index: {}]   ;;  %s4370_s1 = inlined_call_operand.hbm [shape: bf16[128,1024], index: 1, kind: input, shape index: {}]   ;;  %s4371_s2 = inlined_call_operand.hbm [shape: f32[1,1024], index: 2, kind: input, shape index: {}]   ;;  %s4372_s3 = inlined_call_operand.hbm [shape: bf16[1024,512], index: 3, kind: input, shape index: {}]   ;;  %s4373_s4 = inlined_call_operand.vmem [shape: f32[1,512], index: 4, kind: input, shape index: {}]   ;;  %s4374_s5 = inlined_call_operand.hbm [shape: bf16[512,128], index: 5, kind: input, shape index: {}]   ;;  %s4375_s6 = inlined_call_operand.vmem [shape: f32[1,128], index: 6, kind: input, shape index: {}]   ;;  %s4376_s7 = inlined_call_operand.hbm [shape: bf16[128,128], index: 7, kind: input, shape index: {}]   ;;  %s4377_s8 = inlined_call_operand.vmem [shape: f32[1,128], index: 8, kind: input, shape index: {}]   ;;  %s4378_s9 = inlined_call_operand.hbm [shape: f32[8,128], index: 9, kind: output, shape index: {}]  }
   0x1   :  { %15 = vsyncpa [#allocation7], 0 }
   0x2   :  { %16 = vsyncpa [#allocation10], 0 }
   0x3   :  { %17 = vsyncpa [#allocation13], 0 }
   0x4   :  { %18 = vsyncpa [#allocation5], 0  ;;  %s4177_s30 = smov [#allocation6]  }
   0x5   :  { %s34_s10 = sshll.u32 %s4177_s30, 4  ;;  %s35_s10 = int_to_ptr.vmem [resolvable:$true] %s34_s10 }
   0x6   :  { %s4035_s11 = scalar_lea.vmem %s35_s10, 8192  ;;  %p4040_p1 = scmp.lt.s32.totalorder %s35_s10, %s35_s10 }
   0x7   :  { %p4036_p0 = scmp.ne.s32.totalorder %s35_s10, %s4035_s11  ;;  %p4041_p2 = scmp.lt.s32.totalorder %s4035_s11, %s4035_s11 }
   0x9   :  { %p4042_p3 = por %p4041_p2, %p4040_p1 }
   0xb   :  { %p4043_p4 = pnand %p4042_p3, %p4036_p0 }
   0xd   :  { %4046 = shalt.err (!%p4043_p4)
}
   0xe   :  { %s4178_s12 = smov 512   ;;  %s4179_s13 = smov 32  }
   0xf   :  { %40 = dma.hbm_to_vmem [thread:$0]  %s4370_s1, 8192, %s35_s10, [#allocation7], %s4178_s12, %s4178_s12, %s4179_s13  }
  0x10   :  { %s4180_s16 = smov [#allocation9]  }
  0x11   :  { %s56_s17 = sshll.u32 %s4180_s16, 4  ;;  %s57_s17 = int_to_ptr.vmem [resolvable:$true] %s56_s17 }
  0x12   :  { %s4055_s18 = scalar_lea.vmem %s57_s17, 32768  ;;  %p4060_p6 = scmp.lt.s32.totalorder %s57_s17, %s57_s17 }
  0x13   :  { %p4056_p5 = scmp.ne.s32.totalorder %s57_s17, %s4055_s18  ;;  %p4061_p7 = scmp.lt.s32.totalorder %s4055_s18, %s4055_s18 }
  0x15   :  { %p4062_p8 = por %p4061_p7, %p4060_p6 }
  0x17   :  { %p4063_p9 = pnand %p4062_p8, %p4056_p5 }
  0x19   :  { %4066 = shalt.err (!%p4063_p9)
}
  0x1a   :  { %s4181_s19 = smov 256   ;;  %s4182_s20 = smov 16  }
  0x1b   :  { %62 = dma.hbm_to_vmem [thread:$0]  %s4372_s3, 32768, %s57_s17, [#allocation10], %s4181_s19, %s4181_s19, %s4182_s20  }
  0x1c   :  { %s4183_s23 = smov [#allocation3]   ;;  %s4184_s25 = smov [#allocation8]  }
  0x1d   :  { %s25_s24 = sshll.u32 %s4183_s23, 4  ;;  %s47_s1 = sshll.u32 %s4184_s25, 4  ;;  %s26_s24 = int_to_ptr.vmem [resolvable:$true] %s25_s24  ;;  %s48_s1 = int_to_ptr.vmem [resolvable:$true] %s47_s1 }
  0x1e   :  { %s4075_s26 = scalar_lea.vmem %s26_s24, 64  ;;  %p4080_p11 = scmp.lt.s32.totalorder %s26_s24, %s26_s24 }
  0x1f   :  { %p4076_p10 = scmp.ne.s32.totalorder %s26_s24, %s4075_s26  ;;  %p4081_p12 = scmp.lt.s32.totalorder %s4075_s26, %s4075_s26 }
  0x21   :  { %p4082_p13 = por %p4081_p12, %p4080_p11 }
  0x23   :  { %p4083_p0 = pnand %p4082_p13, %p4076_p10 }
  0x25   :  { %4086 = shalt.err (!%p4083_p0)
}
  0x26   :  { %28 = dma.hbm_to_vmem [thread:$0]  %s4369_s0, 64, %s26_s24, [#allocation4]  }
  0x27   :  { %s4095_s29 = scalar_lea.vmem %s48_s1, 128  ;;  %p4100_p2 = scmp.lt.s32.totalorder %s48_s1, %s48_s1 }
  0x28   :  { %p4096_p1 = scmp.ne.s32.totalorder %s48_s1, %s4095_s29  ;;  %p4101_p3 = scmp.lt.s32.totalorder %s4095_s29, %s4095_s29 }
  0x2a   :  { %p4102_p4 = por %p4101_p3, %p4100_p2 }
  0x2c   :  { %p4103_p5 = pnand %p4102_p4, %p4096_p1 }
  0x2e   :  { %4106 = shalt.err (!%p4103_p5)
}
  0x2f   :  { %50 = dma.hbm_to_vmem [thread:$0]  %s4371_s2, 128, %s48_s1, [#allocation7]  }
  0x30   :  { %s4185_s10 = smov [#allocation11]  }
  0x31   :  { %s70_s11 = sshll.u32 %s4185_s10, 4  ;;  %s71_s11 = int_to_ptr.vmem [resolvable:$true] %s70_s11 }
  0x32   :  { %s4115_s12 = scalar_lea.vmem %s71_s11, 4096  ;;  %p4120_p7 = scmp.lt.s32.totalorder %s71_s11, %s71_s11 }
  0x33   :  { %p4116_p6 = scmp.ne.s32.totalorder %s71_s11, %s4115_s12  ;;  %p4121_p8 = scmp.lt.s32.totalorder %s4115_s12, %s4115_s12 }
  0x35   :  { %p4122_p9 = por %p4121_p8, %p4120_p7 }
  0x37   :  { %p4123_p10 = pnand %p4122_p9, %p4116_p6 }
  0x39   :  { %4126 = shalt.err (!%p4123_p10)
}
  0x3a   :  { %s4186_s0 = smov 64   ;;  %s4187_s13 = smov 4  }
  0x3b   :  { %76 = dma.hbm_to_vmem [thread:$0]  %s4374_s5, 4096, %s71_s11, [#allocation10], %s4186_s0, %s4186_s0, %s4187_s13  }
  0x3c   :  { %s4188_s16 = smov [#allocation12]  }
  0x3d   :  { %s84_s17 = sshll.u32 %s4188_s16, 4  ;;  %s85_s17 = int_to_ptr.vmem [resolvable:$true] %s84_s17 }
  0x3e   :  { %s4135_s2 = scalar_lea.vmem %s85_s17, 1024  ;;  %p4140_p12 = scmp.lt.s32.totalorder %s85_s17, %s85_s17 }
  0x3f   :  { %p4136_p11 = scmp.ne.s32.totalorder %s85_s17, %s4135_s2  ;;  %p4141_p13 = scmp.lt.s32.totalorder %s4135_s2, %s4135_s2 }
  0x41   :  { %p4142_p0 = por %p4141_p13, %p4140_p12 }
  0x43   :  { %p4143_p1 = pnand %p4142_p0, %p4136_p11 }
  0x45   :  { %4146 = shalt.err (!%p4143_p1)
}
  0x46   :  { %90 = dma.hbm_to_vmem [thread:$0]  %s4376_s7, 1024, %s85_s17, [#allocation13], %s4186_s0, %s4186_s0, %s4187_s13  }
  0x47   :  { %4167 = dma.done.wait [#allocation4], 64  }
  0x48   :  { %4168 = vsyncadd [#allocation4], 4294967232 }
  0x49   :  { %4169 = dma.done.wait [#allocation7], 8320  }
  0x4a   :  { %4170 = vsyncadd [#allocation7], 4294958976 }
  0x4b   :  { %4171 = dma.done.wait [#allocation10], 36864  }
  0x4c   :  { %4172 = vsyncadd [#allocation10], 4294930432 }
  0x4d   :  { %4173 = dma.done.wait [#allocation13], 1024  }
  0x4e   :  { %4174 = vsyncadd [#allocation13], 4294966272  ;;  %v4189_v0 = vmov 0   ;;  %v189_v1 = vld [vmem:[#allocation6 + $0x1c0] sm:$0xff]  ;;  %v190_v3 = vld [vmem:[#allocation6 + $0x1c8] sm:$0xff]  ;;  %vm4191_vm0 = vmmov 0  }
  0x4f   :  { %549 = vmatprep.mubr.bf16.mxu0 %v4189_v0  ;;  %590 = vmatprep.mubr.bf16.mxu1 %v4189_v0  ;;  %v193_v2 = vld [vmem:[#allocation6 + $0x1e0] sm:$0xff]  ;;  %v194_v5 = vld [vmem:[#allocation6 + $0x1e8] sm:$0xff]  ;;  %v191_v62 = vld [vmem:[#allocation6 + $0x1d0] sm:$0xff] }
  0x50   :  { %v3205_v4 = vcombine.high %v189_v1, %v193_v2  ;;  %v3204_v6 = vcombine.low %v189_v1, %v193_v2  ;;  %v181_v7 = vld [vmem:[#allocation6 + $0x180] sm:$0xff]  ;;  %v3207_v9 = vcombine.high %v190_v3, %v194_v5  ;;  %v3206_v10 = vcombine.low %v190_v3, %v194_v5  ;;  %v182_v12 = vld [vmem:[#allocation6 + $0x188] sm:$0xff]  ;;  %v195_v1 = vld [vmem:[#allocation6 + $0x1f0] sm:$0xff] }
  0x51   :  { %v185_v8 = vld [vmem:[#allocation6 + $0x1a0] sm:$0xff]  ;;  %v186_v13 = vld [vmem:[#allocation6 + $0x1a8] sm:$0xff]  ;;  %v192_v2 = vld [vmem:[#allocation6 + $0x1d8] sm:$0xff] }
  0x52   :  { %v3197_v11 = vcombine.high %v181_v7, %v185_v8  ;;  %v173_v14 = vld [vmem:[#allocation6 + $0x140] sm:$0xff]  ;;  %517 = vmatprep.subr.bf16.mxu0 %v3205_v4  ;;  %v3199_v15 = vcombine.high %v182_v12, %v186_v13  ;;  %v174_v17 = vld [vmem:[#allocation6 + $0x148] sm:$0xff]  ;;  %558 = vmatprep.subr.bf16.mxu1 %v3207_v9  ;;  %v3196_v19 = vcombine.low %v181_v7, %v185_v8  ;;  %v196_v3 = vld [vmem:[#allocation6 + $0x1f8] sm:$0xff] }
  0x53   :  { %v177_v16 = vld [vmem:[#allocation6 + $0x160] sm:$0xff]  ;;  %v178_v18 = vld [vmem:[#allocation6 + $0x168] sm:$0xff]  ;;  %518 = vmatpush1.bf16.msra.mxu0 %v3204_v6  ;;  %559 = vmatpush1.bf16.msra.mxu1 %v3206_v10  ;;  %v3198_v20 = vcombine.low %v182_v12, %v186_v13  ;;  %v3209_v6 = vcombine.high %v191_v62, %v195_v1  ;;  %v183_v7 = vld [vmem:[#allocation6 + $0x190] sm:$0xff]  ;;  %v3211_v8 = vcombine.high %v192_v2, %v196_v3 }
  0x54   :  { %519 = vmatprep.subr.bf16.mxu0 %v3197_v11  ;;  %v3189_v21 = vcombine.high %v173_v14, %v177_v16  ;;  %560 = vmatprep.subr.bf16.mxu1 %v3199_v15  ;;  %v3191_v22 = vcombine.high %v174_v17, %v178_v18  ;;  %v165_v23 = vld [vmem:[#allocation6 + $0x100] sm:$0xff]  ;;  %v166_v25 = vld [vmem:[#allocation6 + $0x108] sm:$0xff]  ;;  %v3188_v27 = vcombine.low %v173_v14, %v177_v16  ;;  %v187_v9 = vld [vmem:[#allocation6 + $0x1b0] sm:$0xff] }
  0x55   :  { %v169_v24 = vld [vmem:[#allocation6 + $0x120] sm:$0xff]  ;;  %v170_v26 = vld [vmem:[#allocation6 + $0x128] sm:$0xff]  ;;  %v3190_v28 = vcombine.low %v174_v17, %v178_v18  ;;  %v184_v10 = vld [vmem:[#allocation6 + $0x198] sm:$0xff]  ;;  %v3208_v13 = vcombine.low %v191_v62, %v195_v1  ;;  %v3210_v14 = vcombine.low %v192_v2, %v196_v3  ;;  %v3201_v15 = vcombine.high %v183_v7, %v187_v9 }
  0x56   :  { %v3181_v29 = vcombine.high %v165_v23, %v169_v24  ;;  %v3183_v30 = vcombine.high %v166_v25, %v170_v26  ;;  %v157_v31 = vld [vmem:[#allocation6 + $0xc0] sm:$0xff]  ;;  %v158_v33 = vld [vmem:[#allocation6 + $0xc8] sm:$0xff]  ;;  %v3180_v35 = vcombine.low %v165_v23, %v169_v24  ;;  %v3182_v36 = vcombine.low %v166_v25, %v170_v26  ;;  %v188_v11 = vld [vmem:[#allocation6 + $0x1b8] sm:$0xff] }
  0x57   :  { %520 = vmatpush1.bf16.msra.mxu0 %v3196_v19  ;;  %561 = vmatpush1.bf16.msra.mxu1 %v3198_v20  ;;  %v161_v32 = vld [vmem:[#allocation6 + $0xe0] sm:$0xff]  ;;  %v162_v34 = vld [vmem:[#allocation6 + $0xe8] sm:$0xff]  ;;  %v4263_v12 = vld [vmem:[#allocation3] sm:$0xf]  ;;  %v3203_v17 = vcombine.high %v184_v10, %v188_v11 }
  0x58   :  { %521 = vmatprep.subr.bf16.mxu0 %v3189_v21  ;;  %562 = vmatprep.subr.bf16.mxu1 %v3191_v22  ;;  %v3173_v37 = vcombine.high %v157_v31, %v161_v32  ;;  %v3175_v38 = vcombine.high %v158_v33, %v162_v34  ;;  %v149_v39 = vld [vmem:[#allocation6 + $0x80] sm:$0xff]  ;;  %v150_v41 = vld [vmem:[#allocation6 + $0x88] sm:$0xff]  ;;  %v3172_v43 = vcombine.low %v157_v31, %v161_v32  ;;  %v175_v16 = vld [vmem:[#allocation6 + $0x150] sm:$0xff] }
  0x59   :  { %v153_v40 = vld [vmem:[#allocation6 + $0xa0] sm:$0xff]  ;;  %v154_v42 = vld [vmem:[#allocation6 + $0xa8] sm:$0xff]  ;;  %v3174_v44 = vcombine.low %v158_v33, %v162_v34  ;;  %v179_v18 = vld [vmem:[#allocation6 + $0x170] sm:$0xff]  ;;  %v3200_v21 = vcombine.low %v183_v7, %v187_v9  ;;  %v3202_v22 = vcombine.low %v184_v10, %v188_v11 }
  0x5a   :  { %v3165_v45 = vcombine.high %v149_v39, %v153_v40  ;;  %v3167_v46 = vcombine.high %v150_v41, %v154_v42  ;;  %v141_v47 = vld [vmem:[#allocation6 + $0x40] sm:$0xff]  ;;  %v142_v49 = vld [vmem:[#allocation6 + $0x48] sm:$0xff]  ;;  %v3164_v51 = vcombine.low %v149_v39, %v153_v40  ;;  %v3166_v52 = vcombine.low %v150_v41, %v154_v42  ;;  %v176_v19 = vld [vmem:[#allocation6 + $0x158] sm:$0xff] }
  0x5b   :  { %522 = vmatpush1.bf16.msra.mxu0 %v3188_v27  ;;  %563 = vmatpush1.bf16.msra.mxu1 %v3190_v28  ;;  %v145_v48 = vld [vmem:[#allocation6 + $0x60] sm:$0xff]  ;;  %v146_v50 = vld [vmem:[#allocation6 + $0x68] sm:$0xff]  ;;  %v180_v20 = vld [vmem:[#allocation6 + $0x178] sm:$0xff]  ;;  %v3193_v23 = vcombine.high %v175_v16, %v179_v18 }
  0x5c   :  { %523 = vmatprep.subr.bf16.mxu0 %v3181_v29  ;;  %564 = vmatprep.subr.bf16.mxu1 %v3183_v30  ;;  %v3157_v53 = vcombine.high %v141_v47, %v145_v48  ;;  %v133_v54 = vld [vmem:[#allocation6] sm:$0xff]  ;;  %v3159_v55 = vcombine.high %v142_v49, %v146_v50  ;;  %v134_v57 = vld [vmem:[#allocation6 + $0x8] sm:$0xff]  ;;  %v3156_v59 = vcombine.low %v141_v47, %v145_v48  ;;  %v167_v24 = vld [vmem:[#allocation6 + $0x110] sm:$0xff] }
  0x5d   :  { %v137_v56 = vld [vmem:[#allocation6 + $0x20] sm:$0xff]  ;;  %v138_v58 = vld [vmem:[#allocation6 + $0x28] sm:$0xff]  ;;  %v3158_v60 = vcombine.low %v142_v49, %v146_v50  ;;  %v3195_v25 = vcombine.high %v176_v19, %v180_v20  ;;  %v171_v26 = vld [vmem:[#allocation6 + $0x130] sm:$0xff]  ;;  %v3192_v29 = vcombine.low %v175_v16, %v179_v18  ;;  %v3194_v30 = vcombine.low %v176_v19, %v180_v20 }
  0x5e   :  { %v3149_v61 = vcombine.high %v133_v54, %v137_v56  ;;  %v3151_v63 = vcombine.high %v134_v57, %v138_v58  ;;  %v3148_v4 = vcombine.low %v133_v54, %v137_v56  ;;  %v3150_v5 = vcombine.low %v134_v57, %v138_v58  ;;  %v168_v27 = vld [vmem:[#allocation6 + $0x118] sm:$0xff]  ;;  %v159_v32 = vld [vmem:[#allocation6 + $0xd0] sm:$0xff] }
  0x5f   :  { %524 = vmatpush1.bf16.msra.mxu0 %v3180_v35  ;;  %565 = vmatpush1.bf16.msra.mxu1 %v3182_v36  ;;  %v172_v28 = vld [vmem:[#allocation6 + $0x138] sm:$0xff]  ;;  %v3185_v31 = vcombine.high %v167_v24, %v171_v26  ;;  %v163_v34 = vld [vmem:[#allocation6 + $0xf0] sm:$0xff] }
  0x60   :  { %525 = vmatprep.subr.bf16.mxu0 %v3173_v37  ;;  %566 = vmatprep.subr.bf16.mxu1 %v3175_v38  ;;  %v3187_v33 = vcombine.high %v168_v27, %v172_v28  ;;  %v160_v35 = vld [vmem:[#allocation6 + $0xd8] sm:$0xff]  ;;  %v3184_v37 = vcombine.low %v167_v24, %v171_v26  ;;  %v3186_v38 = vcombine.low %v168_v27, %v172_v28  ;;  %v151_v40 = vld [vmem:[#allocation6 + $0x90] sm:$0xff] }
  0x61   :  { %v164_v36 = vld [vmem:[#allocation6 + $0xf8] sm:$0xff]  ;;  %v3177_v39 = vcombine.high %v159_v32, %v163_v34  ;;  %v155_v41 = vld [vmem:[#allocation6 + $0xb0] sm:$0xff] }
  0x62   :  { %v152_v42 = vld [vmem:[#allocation6 + $0x98] sm:$0xff]  ;;  %v143_v47 = vld [vmem:[#allocation6 + $0x50] sm:$0xff] }
  0x63   :  { %526 = vmatpush1.bf16.msra.mxu0 %v3172_v43  ;;  %567 = vmatpush1.bf16.msra.mxu1 %v3174_v44  ;;  %v156_v43 = vld [vmem:[#allocation6 + $0xb8] sm:$0xff]  ;;  %v3176_v44 = vcombine.low %v159_v32, %v163_v34  ;;  %v147_v49 = vld [vmem:[#allocation6 + $0x70] sm:$0xff] }
  0x64   :  { %527 = vmatprep.subr.bf16.mxu0 %v3165_v45  ;;  %568 = vmatprep.subr.bf16.mxu1 %v3167_v46  ;;  %v3178_v45 = vcombine.low %v160_v35, %v164_v36  ;;  %v3169_v46 = vcombine.high %v151_v40, %v155_v41  ;;  %v3171_v48 = vcombine.high %v152_v42, %v156_v43  ;;  %v144_v50 = vld [vmem:[#allocation6 + $0x58] sm:$0xff]  ;;  %v139_v57 = vld [vmem:[#allocation6 + $0x30] sm:$0xff] }
  0x65   :  { %v3161_v54 = vcombine.high %v143_v47, %v147_v49  ;;  %v136_v58 = vld [vmem:[#allocation6 + $0x18] sm:$0xff] }
  0x66   :  { %v3601_v1 = vld [vmem:[#allocation9 + $0xe4] ss:$16 sps:$4 sm:$0xff]   ;;  %v3605_v9 = vld [vmem:[#allocation9 + $0xc0] ss:$16 sps:$4 sm:$0xff]  }
  0x67   :  { %528 = vmatpush1.bf16.msra.mxu0 %v3164_v51  ;;  %569 = vmatpush1.bf16.msra.mxu1 %v3166_v52  ;;  %v148_v51 = vld [vmem:[#allocation6 + $0x78] sm:$0xff]  ;;  %v3168_v52 = vcombine.low %v151_v40, %v155_v41 }
  0x68   :  { %529 = vmatprep.subr.bf16.mxu0 %v3157_v53  ;;  %570 = vmatprep.subr.bf16.mxu1 %v3159_v55  ;;  %v3170_v53 = vcombine.low %v152_v42, %v156_v43  ;;  %v135_v55 = vld [vmem:[#allocation6 + $0x10] sm:$0xff]  ;;  %v3163_v56 = vcombine.high %v144_v50, %v148_v51  ;;  %v3604_v3 = vld [vmem:[#allocation9 + $0x2e4] ss:$16 sps:$4 sm:$0xff]   ;;  %v3608_v10 = vld [vmem:[#allocation9 + $0x2c0] ss:$16 sps:$4 sm:$0xff]  }
  0x69   :  { %v3153_v62 = vcombine.high %v135_v55, %v139_v57  ;;  %v3152_v2 = vcombine.low %v135_v55, %v139_v57  ;;  %v3607_v7 = vld [vmem:[#allocation9 + $0xc4] ss:$16 sps:$4 sm:$0xff]   ;;  %v3617_v18 = vld [vmem:[#allocation9 + $0x80] ss:$16 sps:$4 sm:$0xff]  }
  0x6a   :  { %v3613_v11 = vld [vmem:[#allocation9 + $0xa4] ss:$16 sps:$4 sm:$0xff]   ;;  %v3620_v19 = vld [vmem:[#allocation9 + $0x280] ss:$16 sps:$4 sm:$0xff]  }
  0x6b   :  { %530 = vmatpush1.bf16.msra.mxu0 %v3156_v59  ;;  %571 = vmatpush1.bf16.msra.mxu1 %v3158_v60  ;;  %v140_v59 = vld [vmem:[#allocation6 + $0x38] sm:$0xff]  ;;  %v3160_v60 = vcombine.low %v143_v47, %v147_v49 }
  0x6c   :  { %531 = vmatprep.subr.bf16.mxu0 %v3149_v61  ;;  %572 = vmatprep.subr.bf16.mxu1 %v3151_v63  ;;  %v3162_v61 = vcombine.low %v144_v50, %v148_v51  ;;  %v3155_v63 = vcombine.high %v136_v58, %v140_v59  ;;  %v3619_v16 = vld [vmem:[#allocation9 + $0x84] ss:$16 sps:$4 sm:$0xff]   ;;  %v3632_v26 = vld [vmem:[#allocation9 + $0x240] ss:$16 sps:$4 sm:$0xff]  }
  0x6d   :  { %v3625_v20 = vld [vmem:[#allocation9 + $0x64] ss:$16 sps:$4 sm:$0xff]   ;;  %v3644_v34 = vld [vmem:[#allocation9 + $0x200] ss:$16 sps:$4 sm:$0xff]  }
  0x6e   :  { %v3634_v24 = vld [vmem:[#allocation9 + $0x244] ss:$16 sps:$4 sm:$0xff]   ;;  %v3656_v41 = vld [vmem:[#allocation9 + $0x3c0] ss:$16 sps:$4 sm:$0xff]  }
  0x6f   :  { %532 = vmatpush1.bf16.msra.mxu0 %v3148_v4  ;;  %573 = vmatpush1.bf16.msra.mxu1 %v3150_v5  ;;  %v3154_v4 = vcombine.low %v136_v58, %v140_v59  ;;  %v3599_v5 = vld [vmem:[#allocation9 + $0xe0] ss:$16 sps:$4 sm:$0xff]   ;;  %v3637_v27 = vld [vmem:[#allocation9 + $0x24] ss:$16 sps:$4 sm:$0xff]  }
  0x70   :  { %599 = vmatprep.subr.bf16.mxu0 %v3209_v6  ;;  %640 = vmatprep.subr.bf16.mxu1 %v3211_v8  ;;  %v3602_v6 = vld [vmem:[#allocation9 + $0x2e0] ss:$16 sps:$4 sm:$0xff]   ;;  %v3610_v8 = vld [vmem:[#allocation9 + $0x2c4] ss:$16 sps:$4 sm:$0xff]  }
  0x71   :  { %v3640_v28 = vld [vmem:[#allocation9 + $0x224] ss:$16 sps:$4 sm:$0xff]   ;;  %v3668_v49 = vld [vmem:[#allocation9 + $0x380] ss:$16 sps:$4 sm:$0xff]  }
  0x72   :  { %550 = vmatmul.mubr.bf16.vlgmr.msra.gmra.mxu0 %v4263_v12  ;;  %591 = vmatmul.mubr.bf16.vlgmr.msra.gmra.mxu1 %v4263_v12  ;;  %v3646_v32 = vld [vmem:[#allocation9 + $0x204] ss:$16 sps:$4 sm:$0xff]   ;;  %v3680_v57 = vld [vmem:[#allocation9 + $0x340] ss:$16 sps:$4 sm:$0xff]  }
  0x73   :  { %600 = vmatpush1.bf16.msra.mxu0 %v3208_v13  ;;  %641 = vmatpush1.bf16.msra.mxu1 %v3210_v14  ;;  %v3616_v13 = vld [vmem:[#allocation9 + $0x2a4] ss:$16 sps:$4 sm:$0xff]   ;;  %v3611_v14 = vld [vmem:[#allocation9 + $0xa0] ss:$16 sps:$4 sm:$0xff]  }
  0x74   :  { %601 = vmatprep.subr.bf16.mxu0 %v3201_v15  ;;  %642 = vmatprep.subr.bf16.mxu1 %v3203_v17  ;;  %v3614_v15 = vld [vmem:[#allocation9 + $0x2a0] ss:$16 sps:$4 sm:$0xff]   ;;  %v3622_v17 = vld [vmem:[#allocation9 + $0x284] ss:$16 sps:$4 sm:$0xff]  }
  0x75   :  { %631 = vmatprep.mubr.bf16.mxu0 %v4189_v0  ;;  %672 = vmatprep.mubr.bf16.mxu1 %v4189_v0  ;;  %v3179_v0 = vcombine.high %v160_v35, %v164_v36  ;;  %v3649_v35 = vld [vmem:[#allocation9 + $0x1e4] ss:$16 sps:$4 sm:$0xff]  }
  0x76   :  { %v3652_v36 = vld [vmem:[#allocation9 + $0x3e4] ss:$16 sps:$4 sm:$0xff]  }
  0x77   :  { %602 = vmatpush1.bf16.msra.mxu0 %v3200_v21  ;;  %643 = vmatpush1.bf16.msra.mxu1 %v3202_v22  ;;  %v3628_v21 = vld [vmem:[#allocation9 + $0x264] ss:$16 sps:$4 sm:$0xff]   ;;  %v3626_v22 = vld [vmem:[#allocation9 + $0x260] ss:$16 sps:$4 sm:$0xff]  }
  0x78   :  { %603 = vmatprep.subr.bf16.mxu0 %v3193_v23  ;;  %644 = vmatprep.subr.bf16.mxu1 %v3195_v25  ;;  %v3631_v23 = vld [vmem:[#allocation9 + $0x44] ss:$16 sps:$4 sm:$0xff]   ;;  %v3629_v25 = vld [vmem:[#allocation9 + $0x40] ss:$16 sps:$4 sm:$0xff]  }
  0x79   :  { %v3658_v40 = vld [vmem:[#allocation9 + $0x3c4] ss:$16 sps:$4 sm:$0xff]  }
  0x7a   :  { %v3661_v42 = vld [vmem:[#allocation9 + $0x1a4] ss:$16 sps:$4 sm:$0xff]  }
  0x7b   :  { %604 = vmatpush1.bf16.msra.mxu0 %v3192_v29  ;;  %645 = vmatpush1.bf16.msra.mxu1 %v3194_v30  ;;  %v3635_v29 = vld [vmem:[#allocation9 + $0x20] ss:$16 sps:$4 sm:$0xff]   ;;  %v3664_v43 = vld [vmem:[#allocation9 + $0x3a4] ss:$16 sps:$4 sm:$0xff]  }
  0x7c   :  { %605 = vmatprep.subr.bf16.mxu0 %v3185_v31  ;;  %646 = vmatprep.subr.bf16.mxu1 %v3187_v33  ;;  %v3638_v30 = vld [vmem:[#allocation9 + $0x220] ss:$16 sps:$4 sm:$0xff]   ;;  %v3643_v31 = vld [vmem:[#allocation9 + $0x4] ss:$16 sps:$4 sm:$0xff]  }
  0x7d   :  { %v3641_v33 = vld [vmem:[#allocation9] ss:$16 sps:$4 sm:$0xff]   ;;  %v3670_v47 = vld [vmem:[#allocation9 + $0x384] ss:$16 sps:$4 sm:$0xff]  }
  0x7e   :  { %v3673_v50 = vld [vmem:[#allocation9 + $0x164] ss:$16 sps:$4 sm:$0xff]  }
  0x7f   :  { %606 = vmatpush1.bf16.msra.mxu0 %v3184_v37  ;;  %647 = vmatpush1.bf16.msra.mxu1 %v3186_v38  ;;  %v3647_v37 = vld [vmem:[#allocation9 + $0x1e0] ss:$16 sps:$4 sm:$0xff]   ;;  %v3676_v51 = vld [vmem:[#allocation9 + $0x364] ss:$16 sps:$4 sm:$0xff]  }
  0x80   :  { %607 = vmatprep.subr.bf16.mxu0 %v3177_v39  ;;  %648 = vmatprep.subr.bf16.mxu1 %v3179_v0  ;;  %v3650_v38 = vld [vmem:[#allocation9 + $0x3e0] ss:$16 sps:$4 sm:$0xff]   ;;  %v3655_v39 = vld [vmem:[#allocation9 + $0x1c4] ss:$16 sps:$4 sm:$0xff]  }
  0x81   :  { %v3653_v0 = vld [vmem:[#allocation9 + $0x1c0] ss:$16 sps:$4 sm:$0xff]   ;;  %v3682_v55 = vld [vmem:[#allocation9 + $0x344] ss:$16 sps:$4 sm:$0xff]  }
  0x82   :  { %v3685_v58 = vld [vmem:[#allocation9 + $0x124] ss:$16 sps:$4 sm:$0xff]  }
  0x83   :  { %608 = vmatpush1.bf16.msra.mxu0 %v3176_v44  ;;  %649 = vmatpush1.bf16.msra.mxu1 %v3178_v45  ;;  %v3659_v44 = vld [vmem:[#allocation9 + $0x1a0] ss:$16 sps:$4 sm:$0xff]   ;;  %v3688_v59 = vld [vmem:[#allocation9 + $0x324] ss:$16 sps:$4 sm:$0xff]  }
  0x84   :  { %609 = vmatprep.subr.bf16.mxu0 %v3169_v46  ;;  %650 = vmatprep.subr.bf16.mxu1 %v3171_v48  ;;  %v3662_v45 = vld [vmem:[#allocation9 + $0x3a0] ss:$16 sps:$4 sm:$0xff]   ;;  %v3667_v46 = vld [vmem:[#allocation9 + $0x184] ss:$16 sps:$4 sm:$0xff]  }
  0x85   :  { %v3665_v48 = vld [vmem:[#allocation9 + $0x180] ss:$16 sps:$4 sm:$0xff]  }
  0x87   :  { %610 = vmatpush1.bf16.msra.mxu0 %v3168_v52  ;;  %651 = vmatpush1.bf16.msra.mxu1 %v3170_v53  ;;  %v3671_v52 = vld [vmem:[#allocation9 + $0x160] ss:$16 sps:$4 sm:$0xff]  }
  0x88   :  { %611 = vmatprep.subr.bf16.mxu0 %v3161_v54  ;;  %652 = vmatprep.subr.bf16.mxu1 %v3163_v56  ;;  %v3674_v53 = vld [vmem:[#allocation9 + $0x360] ss:$16 sps:$4 sm:$0xff]   ;;  %v3679_v54 = vld [vmem:[#allocation9 + $0x144] ss:$16 sps:$4 sm:$0xff]  }
  0x89   :  { %v3677_v56 = vld [vmem:[#allocation9 + $0x140] ss:$16 sps:$4 sm:$0xff]  }
  0x8b   :  { %612 = vmatpush1.bf16.msra.mxu0 %v3160_v60  ;;  %653 = vmatpush1.bf16.msra.mxu1 %v3162_v61  ;;  %v3683_v60 = vld [vmem:[#allocation9 + $0x120] ss:$16 sps:$4 sm:$0xff]  }
  0x8c   :  { %613 = vmatprep.subr.bf16.mxu0 %v3153_v62  ;;  %654 = vmatprep.subr.bf16.mxu1 %v3155_v63  ;;  %v3686_v61 = vld [vmem:[#allocation9 + $0x320] ss:$16 sps:$4 sm:$0xff]   ;;  %v3691_v62 = vld [vmem:[#allocation9 + $0x104] ss:$16 sps:$4 sm:$0xff]  }
  0x8d   :  { %v3694_v63 = vld [vmem:[#allocation9 + $0x304] ss:$16 sps:$4 sm:$0xff]  }
  0x8f   :  { %614 = vmatpush1.bf16.msra.mxu0 %v3152_v2  ;;  %655 = vmatpush1.bf16.msra.mxu1 %v3154_v4  ;;  %v3692_v2 = vld [vmem:[#allocation9 + $0x300] ss:$16 sps:$4 sm:$0xff]   ;;  %v3700_v4 = vld [vmem:[#allocation9 + $0x6e4] ss:$16 sps:$4 sm:$0xff]  }
  0x90   :  { %2332 = vmatprep.subr.bf16.mxu0 %v3601_v1  ;;  %2373 = vmatprep.subr.bf16.mxu1 %v3604_v3  ;;  %v3689_v1 = vld [vmem:[#allocation9 + $0x100] ss:$16 sps:$4 sm:$0xff]   ;;  %v3697_v3 = vld [vmem:[#allocation9 + $0x4e4] ss:$16 sps:$4 sm:$0xff]  }
  0x92   :  { %632 = vmatmul.mubr.bf16.vlgmr.msra.gmra.mxu0 %v4263_v12  ;;  %673 = vmatmul.mubr.bf16.vlgmr.msra.gmra.mxu1 %v4263_v12  ;;  %v3623_v12 = vld [vmem:[#allocation9 + $0x60] ss:$16 sps:$4 sm:$0xff]  }
  0x93   :  { %2333 = vmatpush1.bf16.msra.mxu0 %v3599_v5  ;;  %2374 = vmatpush1.bf16.msra.mxu1 %v3602_v6  ;;  %v710_v5 = vlaneseq }
  0x94   :  { %2334 = vmatprep.subr.bf16.mxu0 %v3607_v7  ;;  %2375 = vmatprep.subr.bf16.mxu1 %v3610_v8  ;;  %v4273_v7 = vld [vmem:[#allocation8] sm:$0xff] }
  0x95   :  { %v4271_v6 = vshrl.u32 %v710_v5, 7  ;;  %v3739_v5 = vld [vmem:[#allocation9 + $0x404] ss:$16 sps:$4 sm:$0xff]  }
  0x97   :  { %2335 = vmatpush1.bf16.msra.mxu0 %v3605_v9  ;;  %2376 = vmatpush1.bf16.msra.mxu1 %v3608_v10  ;;  %v728_v8 = vsub.s32 4, %v4271_v6  ;;  %v736_v10 = vsub.s32 6, %v4271_v6 }
  0x98   :  { %2336 = vmatprep.subr.bf16.mxu0 %v3613_v11  ;;  %2377 = vmatprep.subr.bf16.mxu1 %v3616_v13  ;;  %v712_v13 = vsub.s32 0, %v4271_v6 }
  0x99   :  { %v4277_v9 = vrot.slane %v4273_v7, %v728_v8  ;;  %v4281_v11 = vrot.slane %v4273_v7, %v736_v10 }
  0x9b   :  { %2337 = vmatpush1.bf16.msra.mxu0 %v3611_v14  ;;  %2378 = vmatpush1.bf16.msra.mxu1 %v3614_v15  ;;  %v720_v14 = vsub.s32 2, %v4271_v6  ;;  %v716_v15 = vsub.s32 1, %v4271_v6 }
  0x9c   :  { %2338 = vmatprep.subr.bf16.mxu0 %v3619_v16  ;;  %2379 = vmatprep.subr.bf16.mxu1 %v3622_v17  ;;  %v724_v16 = vsub.s32 3, %v4271_v6  ;;  %v713_v17 = vrot.slane %v4273_v7, %v712_v13 }
  0x9f   :  { %2339 = vmatpush1.bf16.msra.mxu0 %v3617_v18  ;;  %2380 = vmatpush1.bf16.msra.mxu1 %v3620_v19  ;;  %v721_v18 = vrot.slane %v4273_v7, %v720_v14  ;;  %v717_v19 = vrot.slane %v4273_v7, %v716_v15 }
  0xa0   :  { %2340 = vmatprep.subr.bf16.mxu0 %v3625_v20  ;;  %2381 = vmatprep.subr.bf16.mxu1 %v3628_v21  ;;  %v725_v21 = vrot.slane %v4273_v7, %v724_v16 }
  0xa3   :  { %2341 = vmatpush1.bf16.msra.mxu0 %v3623_v12  ;;  %2382 = vmatpush1.bf16.msra.mxu1 %v3626_v22 }
  0xa4   :  { %2342 = vmatprep.subr.bf16.mxu0 %v3631_v23  ;;  %2383 = vmatprep.subr.bf16.mxu1 %v3634_v24 }
  0xa7   :  { %2343 = vmatpush1.bf16.msra.mxu0 %v3629_v25  ;;  %2384 = vmatpush1.bf16.msra.mxu1 %v3632_v26 }
  0xa8   :  { %2344 = vmatprep.subr.bf16.mxu0 %v3637_v27  ;;  %2385 = vmatprep.subr.bf16.mxu1 %v3640_v28 }
  0xab   :  { %2345 = vmatpush1.bf16.msra.mxu0 %v3635_v29  ;;  %2386 = vmatpush1.bf16.msra.mxu1 %v3638_v30 }
  0xac   :  { %2346 = vmatprep.subr.bf16.mxu0 %v3643_v31  ;;  %2387 = vmatprep.subr.bf16.mxu1 %v3646_v32 }
  0xaf   :  { %2347 = vmatpush1.bf16.msra.mxu0 %v3641_v33  ;;  %2388 = vmatpush1.bf16.msra.mxu1 %v3644_v34 }
  0xb0   :  { %2348 = vmatprep.subr.bf16.mxu0 %v3649_v35  ;;  %2389 = vmatprep.subr.bf16.mxu1 %v3652_v36 }
  0xb3   :  { %2349 = vmatpush2.bf16.msra.mxu0 %v3647_v37  ;;  %2390 = vmatpush2.bf16.msra.mxu1 %v3650_v38  ;;  %v3695_v38 = vld [vmem:[#allocation9 + $0x4e0] ss:$16 sps:$4 sm:$0xff]  }
  0xb4   :  { %2350 = vmatprep.subr.bf16.mxu0 %v3655_v39  ;;  %2391 = vmatprep.subr.bf16.mxu1 %v3658_v40 }
  0xb7   :  { %2351 = vmatpush2.bf16.msra.mxu0 %v3653_v0  ;;  %2392 = vmatpush2.bf16.msra.mxu1 %v3656_v41  ;;  %v3698_v0 = vld [vmem:[#allocation9 + $0x6e0] ss:$16 sps:$4 sm:$0xff]   ;;  %v3703_v41 = vld [vmem:[#allocation9 + $0x4c4] ss:$16 sps:$4 sm:$0xff]  }
  0xb8   :  { %2352 = vmatprep.subr.bf16.mxu0 %v3661_v42  ;;  %2393 = vmatprep.subr.bf16.mxu1 %v3664_v43  ;;  %v3706_v42 = vld [vmem:[#allocation9 + $0x6c4] ss:$16 sps:$4 sm:$0xff]   ;;  %v3701_v43 = vld [vmem:[#allocation9 + $0x4c0] ss:$16 sps:$4 sm:$0xff]  }
  0xbb   :  { %2353 = vmatpush2.bf16.msra.mxu0 %v3659_v44  ;;  %2394 = vmatpush2.bf16.msra.mxu1 %v3662_v45  ;;  %v3704_v44 = vld [vmem:[#allocation9 + $0x6c0] ss:$16 sps:$4 sm:$0xff]   ;;  %v3709_v45 = vld [vmem:[#allocation9 + $0x4a4] ss:$16 sps:$4 sm:$0xff]  }
  0xbc   :  { %2354 = vmatprep.subr.bf16.mxu0 %v3667_v46  ;;  %2395 = vmatprep.subr.bf16.mxu1 %v3670_v47  ;;  %v3712_v46 = vld [vmem:[#allocation9 + $0x6a4] ss:$16 sps:$4 sm:$0xff]   ;;  %v3707_v47 = vld [vmem:[#allocation9 + $0x4a0] ss:$16 sps:$4 sm:$0xff]  }
  0xbf   :  { %2355 = vmatpush2.bf16.msra.mxu0 %v3665_v48  ;;  %2396 = vmatpush2.bf16.msra.mxu1 %v3668_v49  ;;  %v3710_v48 = vld [vmem:[#allocation9 + $0x6a0] ss:$16 sps:$4 sm:$0xff]   ;;  %v3715_v49 = vld [vmem:[#allocation9 + $0x484] ss:$16 sps:$4 sm:$0xff]  }
  0xc0   :  { %2356 = vmatprep.subr.bf16.mxu0 %v3673_v50  ;;  %2397 = vmatprep.subr.bf16.mxu1 %v3676_v51  ;;  %v3718_v50 = vld [vmem:[#allocation9 + $0x684] ss:$16 sps:$4 sm:$0xff]   ;;  %v3713_v51 = vld [vmem:[#allocation9 + $0x480] ss:$16 sps:$4 sm:$0xff]  }
  0xc3   :  { %2357 = vmatpush2.bf16.msra.mxu0 %v3671_v52  ;;  %2398 = vmatpush2.bf16.msra.mxu1 %v3674_v53  ;;  %v3716_v52 = vld [vmem:[#allocation9 + $0x680] ss:$16 sps:$4 sm:$0xff]   ;;  %v3721_v53 = vld [vmem:[#allocation9 + $0x464] ss:$16 sps:$4 sm:$0xff]  }
  0xc4   :  { %2358 = vmatprep.subr.bf16.mxu0 %v3679_v54  ;;  %2399 = vmatprep.subr.bf16.mxu1 %v3682_v55  ;;  %v3724_v54 = vld [vmem:[#allocation9 + $0x664] ss:$16 sps:$4 sm:$0xff]   ;;  %v3719_v55 = vld [vmem:[#allocation9 + $0x460] ss:$16 sps:$4 sm:$0xff]  }
  0xc7   :  { %2359 = vmatpush2.bf16.msra.mxu0 %v3677_v56  ;;  %2400 = vmatpush2.bf16.msra.mxu1 %v3680_v57  ;;  %v3722_v56 = vld [vmem:[#allocation9 + $0x660] ss:$16 sps:$4 sm:$0xff]   ;;  %v3727_v57 = vld [vmem:[#allocation9 + $0x444] ss:$16 sps:$4 sm:$0xff]  }
  0xc8   :  { %2360 = vmatprep.subr.bf16.mxu0 %v3685_v58  ;;  %2401 = vmatprep.subr.bf16.mxu1 %v3688_v59  ;;  %v3730_v58 = vld [vmem:[#allocation9 + $0x644] ss:$16 sps:$4 sm:$0xff]   ;;  %v3725_v59 = vld [vmem:[#allocation9 + $0x440] ss:$16 sps:$4 sm:$0xff]  }
  0xcb   :  { %2361 = vmatpush2.bf16.msra.mxu0 %v3683_v60  ;;  %2402 = vmatpush2.bf16.msra.mxu1 %v3686_v61  ;;  %v732_v60 = vsub.s32 5, %v4271_v6  ;;  %v3728_v61 = vld [vmem:[#allocation9 + $0x640] ss:$16 sps:$4 sm:$0xff]  }
  0xcc   :  { %2362 = vmatprep.subr.bf16.mxu0 %v3691_v62  ;;  %2403 = vmatprep.subr.bf16.mxu1 %v3694_v63  ;;  %v3733_v62 = vld [vmem:[#allocation9 + $0x424] ss:$16 sps:$4 sm:$0xff]   ;;  %v740_v63 = vsub.s32 7, %v4271_v6 }
  0xce   :  { %v741_v10 = vrot.slane %v4273_v7, %v740_v63  ;;  %v3782_v63 = vld [vmem:[#allocation9 + $0x720] ss:$16 sps:$4 sm:$0xff]  }
  0xcf   :  { %2363 = vmatpush2.bf16.msra.mxu0 %v3689_v1  ;;  %2404 = vmatpush2.bf16.msra.mxu1 %v3692_v2  ;;  %v3736_v1 = vld [vmem:[#allocation9 + $0x624] ss:$16 sps:$4 sm:$0xff]   ;;  %v3731_v2 = vld [vmem:[#allocation9 + $0x420] ss:$16 sps:$4 sm:$0xff]  }
  0xd0   :  { %2414 = vmatprep.subr.bf16.mxu0 %v3697_v3  ;;  %2455 = vmatprep.subr.bf16.mxu1 %v3700_v4  ;;  %v733_v3 = vrot.slane %v4273_v7, %v732_v60  ;;  %v3734_v4 = vld [vmem:[#allocation9 + $0x620] ss:$16 sps:$4 sm:$0xff]  }
 0x132   :  { %v551_v20 = vpop.f32.mrf.mxu0  ;;  %v592_v22 = vpop.f32.mrf.mxu1 }
 0x133   :  { %v750_v12 = vadd.f32 %v713_v17, %v551_v20  ;;  %v752_v23 = vadd.f32 %v721_v18, %v592_v22  ;;  %v3742_v17 = vld [vmem:[#allocation9 + $0x604] ss:$16 sps:$4 sm:$0xff]   ;;  %v3737_v20 = vld [vmem:[#allocation9 + $0x400] ss:$16 sps:$4 sm:$0xff]  }
 0x134   :  { %v553_v24 = vpop.f32.mrf.mxu0  ;;  %v594_v26 = vpop.f32.mrf.mxu1  ;;  %v3740_v22 = vld [vmem:[#allocation9 + $0x600] ss:$16 sps:$4 sm:$0xff]  }
 0x135   :  { %v751_v25 = vadd.f32 %v717_v19, %v553_v24  ;;  %v758_v27 = vmax.f32 %v750_v12, 0.0  ;;  %v760_v28 = vmax.f32 %v752_v23, 0.0  ;;  %v753_v29 = vadd.f32 %v725_v21, %v594_v26  ;;  %v3745_v23 = vld [vmem:[#allocation9 + $0x5e4] ss:$16 sps:$4 sm:$0xff]  }
 0x136   :  { %v555_v30 = vpop.f32.mrf.mxu0  ;;  %v596_v32 = vpop.f32.mrf.mxu1  ;;  %v3748_v26 = vld [vmem:[#allocation9 + $0x7e4] ss:$16 sps:$4 sm:$0xff]  }
 0x137   :  { %v759_v31 = vmax.f32 %v751_v25, 0.0  ;;  %v761_v33 = vmax.f32 %v753_v29, 0.0  ;;  %v4299_v35 = vpack.c.bf16 %v760_v28, %v760_v28  ;;  %v4303_v39 = vpack.c.bf16 %v758_v27, %v758_v27  ;;  %v3743_v30 = vld [vmem:[#allocation9 + $0x5e0] ss:$16 sps:$4 sm:$0xff]  }
 0x138   :  { %v556_v34 = vpop.f32.mrf.mxu0  ;;  %v597_v37 = vpop.f32.mrf.mxu1 }
 0x139   :  { %v4301_v36 = vpack.c.bf16 %v759_v31, %v759_v31  ;;  %v4305_v40 = vpack.c.bf16 %v761_v33, %v761_v33  ;;  %v3746_v33 = vld [vmem:[#allocation9 + $0x7e0] ss:$16 sps:$4 sm:$0xff]   ;;  %v3751_v34 = vld [vmem:[#allocation9 + $0x5c4] ss:$16 sps:$4 sm:$0xff]  }
 0x13b   :  { %2364 = vmatprep.mubr.bf16.mxu0 %v4301_v36  ;;  %2405 = vmatprep.mubr.bf16.mxu1 %v4305_v40 }
 0x13c   :  { %2365 = vmatmul.mubr.bf16.vlgmr.msra.gmra.mxu0 %v4303_v39  ;;  %2406 = vmatmul.mubr.bf16.vlgmr.msra.gmra.mxu1 %v4299_v35 }
 0x13d   :  { %2415 = vmatpush1.bf16.msra.mxu0 %v3695_v38  ;;  %2456 = vmatpush1.bf16.msra.mxu1 %v3698_v0  ;;  %v3754_v38 = vld [vmem:[#allocation9 + $0x7c4] ss:$16 sps:$4 sm:$0xff]   ;;  %v3749_v0 = vld [vmem:[#allocation9 + $0x5c0] ss:$16 sps:$4 sm:$0xff]  }
 0x13e   :  { %2416 = vmatprep.subr.bf16.mxu0 %v3703_v41  ;;  %2457 = vmatprep.subr.bf16.mxu1 %v3706_v42  ;;  %v3752_v41 = vld [vmem:[#allocation9 + $0x7c0] ss:$16 sps:$4 sm:$0xff]   ;;  %v3757_v42 = vld [vmem:[#allocation9 + $0x5a4] ss:$16 sps:$4 sm:$0xff]  }
 0x141   :  { %2417 = vmatpush1.bf16.msra.mxu0 %v3701_v43  ;;  %2458 = vmatpush1.bf16.msra.mxu1 %v3704_v44  ;;  %v3760_v43 = vld [vmem:[#allocation9 + $0x7a4] ss:$16 sps:$4 sm:$0xff]   ;;  %v3755_v44 = vld [vmem:[#allocation9 + $0x5a0] ss:$16 sps:$4 sm:$0xff]  }
 0x142   :  { %2418 = vmatprep.subr.bf16.mxu0 %v3709_v45  ;;  %2459 = vmatprep.subr.bf16.mxu1 %v3712_v46  ;;  %v3758_v45 = vld [vmem:[#allocation9 + $0x7a0] ss:$16 sps:$4 sm:$0xff]   ;;  %v3763_v46 = vld [vmem:[#allocation9 + $0x584] ss:$16 sps:$4 sm:$0xff]  }
 0x145   :  { %2419 = vmatpush1.bf16.msra.mxu0 %v3707_v47  ;;  %2460 = vmatpush1.bf16.msra.mxu1 %v3710_v48  ;;  %v3766_v47 = vld [vmem:[#allocation9 + $0x784] ss:$16 sps:$4 sm:$0xff]   ;;  %v3761_v48 = vld [vmem:[#allocation9 + $0x580] ss:$16 sps:$4 sm:$0xff]  }
 0x146   :  { %2420 = vmatprep.subr.bf16.mxu0 %v3715_v49  ;;  %2461 = vmatprep.subr.bf16.mxu1 %v3718_v50  ;;  %v3764_v49 = vld [vmem:[#allocation9 + $0x780] ss:$16 sps:$4 sm:$0xff]   ;;  %v3769_v50 = vld [vmem:[#allocation9 + $0x564] ss:$16 sps:$4 sm:$0xff]  }
 0x149   :  { %2421 = vmatpush1.bf16.msra.mxu0 %v3713_v51  ;;  %2462 = vmatpush1.bf16.msra.mxu1 %v3716_v52  ;;  %v3772_v51 = vld [vmem:[#allocation9 + $0x764] ss:$16 sps:$4 sm:$0xff]   ;;  %v3767_v52 = vld [vmem:[#allocation9 + $0x560] ss:$16 sps:$4 sm:$0xff]  }
 0x14a   :  { %2422 = vmatprep.subr.bf16.mxu0 %v3721_v53  ;;  %2463 = vmatprep.subr.bf16.mxu1 %v3724_v54  ;;  %v3770_v53 = vld [vmem:[#allocation9 + $0x760] ss:$16 sps:$4 sm:$0xff]   ;;  %v3775_v54 = vld [vmem:[#allocation9 + $0x544] ss:$16 sps:$4 sm:$0xff]  }
 0x14d   :  { %2423 = vmatpush1.bf16.msra.mxu0 %v3719_v55  ;;  %2464 = vmatpush1.bf16.msra.mxu1 %v3722_v56  ;;  %v3778_v55 = vld [vmem:[#allocation9 + $0x744] ss:$16 sps:$4 sm:$0xff]   ;;  %v3773_v56 = vld [vmem:[#allocation9 + $0x540] ss:$16 sps:$4 sm:$0xff]  }
 0x14e   :  { %2424 = vmatprep.subr.bf16.mxu0 %v3727_v57  ;;  %2465 = vmatprep.subr.bf16.mxu1 %v3730_v58  ;;  %v3776_v57 = vld [vmem:[#allocation9 + $0x740] ss:$16 sps:$4 sm:$0xff]   ;;  %v3781_v58 = vld [vmem:[#allocation9 + $0x524] ss:$16 sps:$4 sm:$0xff]  }
 0x151   :  { %2425 = vmatpush1.bf16.msra.mxu0 %v3725_v59  ;;  %2466 = vmatpush1.bf16.msra.mxu1 %v3728_v61  ;;  %v3784_v59 = vld [vmem:[#allocation9 + $0x724] ss:$16 sps:$4 sm:$0xff]   ;;  %v3779_v61 = vld [vmem:[#allocation9 + $0x520] ss:$16 sps:$4 sm:$0xff]  }
 0x152   :  { %2426 = vmatprep.subr.bf16.mxu0 %v3733_v62  ;;  %v4314_v8 = vpop.f32.mrf.mxu0  ;;  %2467 = vmatprep.subr.bf16.mxu1 %v3736_v1  ;;  %v4317_v18 = vpop.f32.mrf.mxu1  ;;  %v3787_v1 = vld [vmem:[#allocation9 + $0x504] ss:$16 sps:$4 sm:$0xff]  }
 0x153   :  { %v756_v60 = vadd.f32 %v4281_v11, %v4317_v18  ;;  %v754_v62 = vadd.f32 %v4277_v9, %v4314_v8  ;;  %v3796_v11 = vld [vmem:[#allocation9 + $0x2ec] ss:$16 sps:$4 sm:$0xff]   ;;  %v3791_v9 = vld [vmem:[#allocation9 + $0xe8] ss:$16 sps:$4 sm:$0xff]  }
 0x154   :  { %v635_v19 = vpop.f32.mrf.mxu0  ;;  %v676_v12 = vpop.f32.mrf.mxu1 }
 0x155   :  { %2427 = vmatpush1.bf16.msra.mxu0 %v3731_v2  ;;  %v755_v21 = vadd.f32 %v733_v3, %v635_v19  ;;  %2468 = vmatpush1.bf16.msra.mxu1 %v3734_v4  ;;  %v757_v25 = vadd.f32 %v741_v10, %v676_v12  ;;  %v3790_v2 = vld [vmem:[#allocation9 + $0x704] ss:$16 sps:$4 sm:$0xff]   ;;  %v764_v3 = vmax.f32 %v756_v60, 0.0  ;;  %v3785_v4 = vld [vmem:[#allocation9 + $0x500] ss:$16 sps:$4 sm:$0xff]  }
 0x156   :  { %2428 = vmatprep.subr.bf16.mxu0 %v3739_v5  ;;  %v637_v24 = vpop.f32.mrf.mxu0  ;;  %2469 = vmatprep.subr.bf16.mxu1 %v3742_v17  ;;  %v678_v28 = vpop.f32.mrf.mxu1  ;;  %v762_v5 = vmax.f32 %v754_v62, 0.0  ;;  %v3788_v10 = vld [vmem:[#allocation9 + $0x700] ss:$16 sps:$4 sm:$0xff]   ;;  %v3793_v17 = vld [vmem:[#allocation9 + $0xec] ss:$16 sps:$4 sm:$0xff]  }
 0x157   :  { %v763_v27 = vmax.f32 %v755_v21, 0.0  ;;  %v765_v7 = vmax.f32 %v757_v25, 0.0  ;;  %v4329_v18 = vpack.c.bf16 %v764_v3, %v764_v3  ;;  %v3794_v19 = vld [vmem:[#allocation9 + $0x2e8] ss:$16 sps:$4 sm:$0xff]   ;;  %v3802_v21 = vld [vmem:[#allocation9 + $0x2cc] ss:$16 sps:$4 sm:$0xff]  }
 0x158   :  { %v638_v29 = vpop.f32.mrf.mxu0  ;;  %v679_v32 = vpop.f32.mrf.mxu1  ;;  %v4331_v8 = vpack.c.bf16 %v762_v5, %v762_v5  ;;  %v3797_v12 = vld [vmem:[#allocation9 + $0xc8] ss:$16 sps:$4 sm:$0xff]   ;;  %v3808_v24 = vld [vmem:[#allocation9 + $0x2ac] ss:$16 sps:$4 sm:$0xff]  }
 0x159   :  { %2429 = vmatpush1.bf16.msra.mxu0 %v3737_v20  ;;  %v4319_v31 = vpack.c.bf16 %v763_v27, %v763_v27  ;;  %2470 = vmatpush1.bf16.msra.mxu1 %v3740_v22  ;;  %v4321_v37 = vpack.c.bf16 %v765_v7, %v765_v7  ;;  %v3799_v20 = vld [vmem:[#allocation9 + $0xcc] ss:$16 sps:$4 sm:$0xff]   ;;  %v3800_v22 = vld [vmem:[#allocation9 + $0x2c8] ss:$16 sps:$4 sm:$0xff]  }
 0x15a   :  { %2430 = vmatprep.subr.bf16.mxu0 %v3745_v23  ;;  %2471 = vmatprep.subr.bf16.mxu1 %v3748_v26  ;;  %v3805_v23 = vld [vmem:[#allocation9 + $0xac] ss:$16 sps:$4 sm:$0xff]   ;;  %v3803_v25 = vld [vmem:[#allocation9 + $0xa8] ss:$16 sps:$4 sm:$0xff]  }
 0x15b   :  { %2446 = vmatprep.mubr.bf16.mxu0 %v4319_v31  ;;  %2487 = vmatprep.mubr.bf16.mxu1 %v4321_v37  ;;  %v3806_v26 = vld [vmem:[#allocation9 + $0x2a8] ss:$16 sps:$4 sm:$0xff]   ;;  %v3811_v27 = vld [vmem:[#allocation9 + $0x8c] ss:$16 sps:$4 sm:$0xff]  }
 0x15c   :  { %v3814_v28 = vld [vmem:[#allocation9 + $0x28c] ss:$16 sps:$4 sm:$0xff]   ;;  %v3809_v7 = vld [vmem:[#allocation9 + $0x88] ss:$16 sps:$4 sm:$0xff]  }
 0x15d   :  { %2431 = vmatpush2.bf16.msra.mxu0 %v3743_v30  ;;  %2472 = vmatpush2.bf16.msra.mxu1 %v3746_v33  ;;  %v3817_v29 = vld [vmem:[#allocation9 + $0x6c] ss:$16 sps:$4 sm:$0xff]   ;;  %v3818_v32 = vld [vmem:[#allocation9 + $0x268] ss:$16 sps:$4 sm:$0xff]  }
 0x15e   :  { %2432 = vmatprep.subr.bf16.mxu0 %v3751_v34  ;;  %2473 = vmatprep.subr.bf16.mxu1 %v3754_v38  ;;  %v3820_v30 = vld [vmem:[#allocation9 + $0x26c] ss:$16 sps:$4 sm:$0xff]   ;;  %v3821_v38 = vld [vmem:[#allocation9 + $0x48] ss:$16 sps:$4 sm:$0xff]  }
 0x15f   :  { %v3823_v33 = vld [vmem:[#allocation9 + $0x4c] ss:$16 sps:$4 sm:$0xff]   ;;  %v3854_v60 = vld [vmem:[#allocation9 + $0x3a8] ss:$16 sps:$4 sm:$0xff]  }
 0x160   :  { %v3826_v34 = vld [vmem:[#allocation9 + $0x24c] ss:$16 sps:$4 sm:$0xff]   ;;  %v3866_v5 = vld [vmem:[#allocation9 + $0x368] ss:$16 sps:$4 sm:$0xff]  }
 0x161   :  { %2433 = vmatpush2.bf16.msra.mxu0 %v3749_v0  ;;  %2474 = vmatpush2.bf16.msra.mxu1 %v3752_v41  ;;  %v3824_v0 = vld [vmem:[#allocation9 + $0x248] ss:$16 sps:$4 sm:$0xff]   ;;  %v3829_v41 = vld [vmem:[#allocation9 + $0x2c] ss:$16 sps:$4 sm:$0xff]  }
 0x162   :  { %2434 = vmatprep.subr.bf16.mxu0 %v3757_v42  ;;  %2475 = vmatprep.subr.bf16.mxu1 %v3760_v43  ;;  %v3832_v42 = vld [vmem:[#allocation9 + $0x22c] ss:$16 sps:$4 sm:$0xff]   ;;  %v3827_v43 = vld [vmem:[#allocation9 + $0x28] ss:$16 sps:$4 sm:$0xff]  }
 0x163   :  { %v3862_v62 = vld [vmem:[#allocation9 + $0x38c] ss:$16 sps:$4 sm:$0xff]  }
 0x164   :  { %v3868_v3 = vld [vmem:[#allocation9 + $0x36c] ss:$16 sps:$4 sm:$0xff]  }
 0x165   :  { %2435 = vmatpush2.bf16.msra.mxu0 %v3755_v44  ;;  %2476 = vmatpush2.bf16.msra.mxu1 %v3758_v45  ;;  %v3830_v44 = vld [vmem:[#allocation9 + $0x228] ss:$16 sps:$4 sm:$0xff]   ;;  %v3835_v45 = vld [vmem:[#allocation9 + $0xc] ss:$16 sps:$4 sm:$0xff]  }
 0x166   :  { %2436 = vmatprep.subr.bf16.mxu0 %v3763_v46  ;;  %2477 = vmatprep.subr.bf16.mxu1 %v3766_v47  ;;  %v3838_v46 = vld [vmem:[#allocation9 + $0x20c] ss:$16 sps:$4 sm:$0xff]   ;;  %v3833_v47 = vld [vmem:[#allocation9 + $0x8] ss:$16 sps:$4 sm:$0xff]  }
 0x169   :  { %2437 = vmatpush2.bf16.msra.mxu0 %v3761_v48  ;;  %2478 = vmatpush2.bf16.msra.mxu1 %v3764_v49  ;;  %v3836_v48 = vld [vmem:[#allocation9 + $0x208] ss:$16 sps:$4 sm:$0xff]   ;;  %v3841_v49 = vld [vmem:[#allocation9 + $0x1ec] ss:$16 sps:$4 sm:$0xff]  }
 0x16a   :  { %2438 = vmatprep.subr.bf16.mxu0 %v3769_v50  ;;  %2479 = vmatprep.subr.bf16.mxu1 %v3772_v51  ;;  %v3844_v50 = vld [vmem:[#allocation9 + $0x3ec] ss:$16 sps:$4 sm:$0xff]   ;;  %v3839_v51 = vld [vmem:[#allocation9 + $0x1e8] ss:$16 sps:$4 sm:$0xff]  }
 0x16d   :  { %2439 = vmatpush2.bf16.msra.mxu0 %v3767_v52  ;;  %2480 = vmatpush2.bf16.msra.mxu1 %v3770_v53  ;;  %v3842_v52 = vld [vmem:[#allocation9 + $0x3e8] ss:$16 sps:$4 sm:$0xff]   ;;  %v3847_v53 = vld [vmem:[#allocation9 + $0x1cc] ss:$16 sps:$4 sm:$0xff]  }
 0x16e   :  { %2440 = vmatprep.subr.bf16.mxu0 %v3775_v54  ;;  %2481 = vmatprep.subr.bf16.mxu1 %v3778_v55  ;;  %v3850_v54 = vld [vmem:[#allocation9 + $0x3cc] ss:$16 sps:$4 sm:$0xff]   ;;  %v3845_v55 = vld [vmem:[#allocation9 + $0x1c8] ss:$16 sps:$4 sm:$0xff]  }
 0x171   :  { %2441 = vmatpush2.bf16.msra.mxu0 %v3773_v56  ;;  %2482 = vmatpush2.bf16.msra.mxu1 %v3776_v57  ;;  %v3848_v56 = vld [vmem:[#allocation9 + $0x3c8] ss:$16 sps:$4 sm:$0xff]   ;;  %v3853_v57 = vld [vmem:[#allocation9 + $0x1ac] ss:$16 sps:$4 sm:$0xff]  }
 0x172   :  { %2442 = vmatprep.subr.bf16.mxu0 %v3781_v58  ;;  %2483 = vmatprep.subr.bf16.mxu1 %v3784_v59  ;;  %v3856_v58 = vld [vmem:[#allocation9 + $0x3ac] ss:$16 sps:$4 sm:$0xff]   ;;  %v3851_v59 = vld [vmem:[#allocation9 + $0x1a8] ss:$16 sps:$4 sm:$0xff]  }
 0x175   :  { %2443 = vmatpush2.bf16.msra.mxu0 %v3779_v61  ;;  %2484 = vmatpush2.bf16.msra.mxu1 %v3782_v63  ;;  %v3859_v61 = vld [vmem:[#allocation9 + $0x18c] ss:$16 sps:$4 sm:$0xff]   ;;  %v3857_v63 = vld [vmem:[#allocation9 + $0x188] ss:$16 sps:$4 sm:$0xff]  }
 0x176   :  { %2444 = vmatprep.subr.bf16.mxu0 %v3787_v1  ;;  %2485 = vmatprep.subr.bf16.mxu1 %v3790_v2  ;;  %v3860_v1 = vld [vmem:[#allocation9 + $0x388] ss:$16 sps:$4 sm:$0xff]   ;;  %v3865_v2 = vld [vmem:[#allocation9 + $0x16c] ss:$16 sps:$4 sm:$0xff]  }
 0x179   :  { %2445 = vmatpush2.bf16.msra.mxu0 %v3785_v4  ;;  %2486 = vmatpush2.bf16.msra.mxu1 %v3788_v10  ;;  %v3863_v4 = vld [vmem:[#allocation9 + $0x168] ss:$16 sps:$4 sm:$0xff]   ;;  %v3871_v10 = vld [vmem:[#allocation9 + $0x14c] ss:$16 sps:$4 sm:$0xff]  }
 0x17a   :  { %2496 = vmatprep.subr.bf16.mxu0 %v3793_v17  ;;  %2537 = vmatprep.subr.bf16.mxu1 %v3796_v11  ;;  %v3874_v17 = vld [vmem:[#allocation9 + $0x34c] ss:$16 sps:$4 sm:$0xff]   ;;  %v3869_v11 = vld [vmem:[#allocation9 + $0x148] ss:$16 sps:$4 sm:$0xff]  }
 0x17c   :  { %2447 = vmatmul.mubr.bf16.vlgmr.msra.gmra.mxu0 %v4331_v8  ;;  %2488 = vmatmul.mubr.bf16.vlgmr.msra.gmra.mxu1 %v4329_v18 }
 0x17d   :  { %2497 = vmatpush1.bf16.msra.mxu0 %v3791_v9  ;;  %2528 = vmatprep.mubr.bf16.mxu0 %v4301_v36  ;;  %v3812_v36 = vld [vmem:[#allocation9 + $0x288] ss:$16 sps:$4 sm:$0xff]  }
 0x17e   :  { %2538 = vmatpush1.bf16.msra.mxu1 %v3794_v19  ;;  %2569 = vmatprep.mubr.bf16.mxu1 %v4305_v40  ;;  %v3815_v40 = vld [vmem:[#allocation9 + $0x68] ss:$16 sps:$4 sm:$0xff]   ;;  %v3877_v19 = vld [vmem:[#allocation9 + $0x12c] ss:$16 sps:$4 sm:$0xff]  }
 0x17f   :  { %2498 = vmatprep.subr.bf16.mxu0 %v3799_v20  ;;  %2539 = vmatprep.subr.bf16.mxu1 %v3802_v21  ;;  %v3872_v9 = vld [vmem:[#allocation9 + $0x348] ss:$16 sps:$4 sm:$0xff]   ;;  %v3880_v20 = vld [vmem:[#allocation9 + $0x32c] ss:$16 sps:$4 sm:$0xff]  }
 0x180   :  { %v3875_v21 = vld [vmem:[#allocation9 + $0x128] ss:$16 sps:$4 sm:$0xff]  }
 0x181   :  { %2499 = vmatpush1.bf16.msra.mxu0 %v3797_v12  ;;  %v3878_v12 = vld [vmem:[#allocation9 + $0x328] ss:$16 sps:$4 sm:$0xff]  }
 0x182   :  { %2540 = vmatpush1.bf16.msra.mxu1 %v3800_v22  ;;  %2500 = vmatprep.subr.bf16.mxu0 %v3805_v23  ;;  %v3883_v22 = vld [vmem:[#allocation9 + $0x10c] ss:$16 sps:$4 sm:$0xff]  }
 0x183   :  { %2541 = vmatprep.subr.bf16.mxu1 %v3808_v24  ;;  %v3886_v23 = vld [vmem:[#allocation9 + $0x30c] ss:$16 sps:$4 sm:$0xff]   ;;  %v3881_v24 = vld [vmem:[#allocation9 + $0x108] ss:$16 sps:$4 sm:$0xff]  }
 0x185   :  { %2501 = vmatpush1.bf16.msra.mxu0 %v3803_v25  ;;  %v3884_v25 = vld [vmem:[#allocation9 + $0x308] ss:$16 sps:$4 sm:$0xff]  }
 0x186   :  { %2542 = vmatpush1.bf16.msra.mxu1 %v3806_v26  ;;  %2502 = vmatprep.subr.bf16.mxu0 %v3811_v27  ;;  %v3889_v26 = vld [vmem:[#allocation9 + $0x4ec] ss:$16 sps:$4 sm:$0xff]  }
 0x187   :  { %2543 = vmatprep.subr.bf16.mxu1 %v3814_v28  ;;  %v3892_v27 = vld [vmem:[#allocation9 + $0x6ec] ss:$16 sps:$4 sm:$0xff]   ;;  %v3887_v28 = vld [vmem:[#allocation9 + $0x4e8] ss:$16 sps:$4 sm:$0xff]  }
 0x189   :  { %2503 = vmatpush1.bf16.msra.mxu0 %v3809_v7  ;;  %v3890_v7 = vld [vmem:[#allocation9 + $0x6e8] ss:$16 sps:$4 sm:$0xff]  }
 0x18a   :  { %2544 = vmatpush1.bf16.msra.mxu1 %v3812_v36  ;;  %2504 = vmatprep.subr.bf16.mxu0 %v3817_v29  ;;  %v3895_v36 = vld [vmem:[#allocation9 + $0x4cc] ss:$16 sps:$4 sm:$0xff]  }
 0x18b   :  { %2545 = vmatprep.subr.bf16.mxu1 %v3820_v30  ;;  %v3898_v29 = vld [vmem:[#allocation9 + $0x6cc] ss:$16 sps:$4 sm:$0xff]   ;;  %v3893_v30 = vld [vmem:[#allocation9 + $0x4c8] ss:$16 sps:$4 sm:$0xff]  }
 0x18d   :  { %2505 = vmatpush1.bf16.msra.mxu0 %v3815_v40  ;;  %v3896_v40 = vld [vmem:[#allocation9 + $0x6c8] ss:$16 sps:$4 sm:$0xff]  }
 0x18e   :  { %2546 = vmatpush1.bf16.msra.mxu1 %v3818_v32  ;;  %2506 = vmatprep.subr.bf16.mxu0 %v3823_v33  ;;  %v3901_v32 = vld [vmem:[#allocation9 + $0x4ac] ss:$16 sps:$4 sm:$0xff]  }
 0x18f   :  { %2547 = vmatprep.subr.bf16.mxu1 %v3826_v34  ;;  %v3904_v33 = vld [vmem:[#allocation9 + $0x6ac] ss:$16 sps:$4 sm:$0xff]   ;;  %v3899_v34 = vld [vmem:[#allocation9 + $0x4a8] ss:$16 sps:$4 sm:$0xff]  }
 0x191   :  { %2507 = vmatpush1.bf16.msra.mxu0 %v3821_v38  ;;  %v3907_v38 = vld [vmem:[#allocation9 + $0x48c] ss:$16 sps:$4 sm:$0xff]  }
 0x192   :  { %2548 = vmatpush1.bf16.msra.mxu1 %v3824_v0  ;;  %2508 = vmatprep.subr.bf16.mxu0 %v3829_v41  ;;  %v3905_v0 = vld [vmem:[#allocation9 + $0x488] ss:$16 sps:$4 sm:$0xff]   ;;  %v3913_v41 = vld [vmem:[#allocation9 + $0x46c] ss:$16 sps:$4 sm:$0xff]  }
 0x193   :  { %2549 = vmatprep.subr.bf16.mxu1 %v3832_v42  ;;  %v3916_v42 = vld [vmem:[#allocation9 + $0x66c] ss:$16 sps:$4 sm:$0xff]  }
 0x195   :  { %2509 = vmatpush1.bf16.msra.mxu0 %v3827_v43  ;;  %v3914_v43 = vld [vmem:[#allocation9 + $0x668] ss:$16 sps:$4 sm:$0xff]  }
 0x196   :  { %2550 = vmatpush1.bf16.msra.mxu1 %v3830_v44  ;;  %2510 = vmatprep.subr.bf16.mxu0 %v3835_v45  ;;  %v3919_v44 = vld [vmem:[#allocation9 + $0x44c] ss:$16 sps:$4 sm:$0xff]  }
 0x197   :  { %2551 = vmatprep.subr.bf16.mxu1 %v3838_v46  ;;  %v3922_v45 = vld [vmem:[#allocation9 + $0x64c] ss:$16 sps:$4 sm:$0xff]   ;;  %v3917_v46 = vld [vmem:[#allocation9 + $0x448] ss:$16 sps:$4 sm:$0xff]  }
 0x199   :  { %2511 = vmatpush1.bf16.msra.mxu0 %v3833_v47  ;;  %v3920_v47 = vld [vmem:[#allocation9 + $0x648] ss:$16 sps:$4 sm:$0xff]  }
 0x19a   :  { %2552 = vmatpush1.bf16.msra.mxu1 %v3836_v48  ;;  %2512 = vmatprep.subr.bf16.mxu0 %v3841_v49  ;;  %v3925_v48 = vld [vmem:[#allocation9 + $0x42c] ss:$16 sps:$4 sm:$0xff]  }
 0x19b   :  { %2553 = vmatprep.subr.bf16.mxu1 %v3844_v50  ;;  %v3928_v49 = vld [vmem:[#allocation9 + $0x62c] ss:$16 sps:$4 sm:$0xff]   ;;  %v3923_v50 = vld [vmem:[#allocation9 + $0x428] ss:$16 sps:$4 sm:$0xff]  }
 0x19d   :  { %2513 = vmatpush2.bf16.msra.mxu0 %v3839_v51  ;;  %v3926_v51 = vld [vmem:[#allocation9 + $0x628] ss:$16 sps:$4 sm:$0xff]  }
 0x19e   :  { %2554 = vmatpush2.bf16.msra.mxu1 %v3842_v52  ;;  %2514 = vmatprep.subr.bf16.mxu0 %v3847_v53  ;;  %v3931_v52 = vld [vmem:[#allocation9 + $0x40c] ss:$16 sps:$4 sm:$0xff]  }
 0x19f   :  { %2555 = vmatprep.subr.bf16.mxu1 %v3850_v54  ;;  %v3934_v53 = vld [vmem:[#allocation9 + $0x60c] ss:$16 sps:$4 sm:$0xff]   ;;  %v3929_v54 = vld [vmem:[#allocation9 + $0x408] ss:$16 sps:$4 sm:$0xff]  }
 0x1a1   :  { %2515 = vmatpush2.bf16.msra.mxu0 %v3845_v55  ;;  %v3932_v55 = vld [vmem:[#allocation9 + $0x608] ss:$16 sps:$4 sm:$0xff]  }
 0x1a2   :  { %2556 = vmatpush2.bf16.msra.mxu1 %v3848_v56  ;;  %2516 = vmatprep.subr.bf16.mxu0 %v3853_v57  ;;  %v3937_v56 = vld [vmem:[#allocation9 + $0x5ec] ss:$16 sps:$4 sm:$0xff]  }
 0x1a3   :  { %2557 = vmatprep.subr.bf16.mxu1 %v3856_v58  ;;  %v3940_v57 = vld [vmem:[#allocation9 + $0x7ec] ss:$16 sps:$4 sm:$0xff]   ;;  %v3935_v58 = vld [vmem:[#allocation9 + $0x5e8] ss:$16 sps:$4 sm:$0xff]  }
 0x1a5   :  { %2517 = vmatpush2.bf16.msra.mxu0 %v3851_v59  ;;  %v3938_v59 = vld [vmem:[#allocation9 + $0x7e8] ss:$16 sps:$4 sm:$0xff]  }
 0x1a6   :  { %2558 = vmatpush2.bf16.msra.mxu1 %v3854_v60  ;;  %2518 = vmatprep.subr.bf16.mxu0 %v3859_v61  ;;  %v3943_v60 = vld [vmem:[#allocation9 + $0x5cc] ss:$16 sps:$4 sm:$0xff]  }
 0x1a7   :  { %2559 = vmatprep.subr.bf16.mxu1 %v3862_v62  ;;  %v3946_v61 = vld [vmem:[#allocation9 + $0x7cc] ss:$16 sps:$4 sm:$0xff]   ;;  %v3941_v62 = vld [vmem:[#allocation9 + $0x5c8] ss:$16 sps:$4 sm:$0xff]  }
 0x1a9   :  { %2519 = vmatpush2.bf16.msra.mxu0 %v3857_v63  ;;  %v3944_v63 = vld [vmem:[#allocation9 + $0x7c8] ss:$16 sps:$4 sm:$0xff]  }
 0x1aa   :  { %2560 = vmatpush2.bf16.msra.mxu1 %v3860_v1  ;;  %2520 = vmatprep.subr.bf16.mxu0 %v3865_v2  ;;  %v3949_v1 = vld [vmem:[#allocation9 + $0x5ac] ss:$16 sps:$4 sm:$0xff]  }
 0x1ab   :  { %2561 = vmatprep.subr.bf16.mxu1 %v3868_v3  ;;  %v3952_v2 = vld [vmem:[#allocation9 + $0x7ac] ss:$16 sps:$4 sm:$0xff]   ;;  %v3947_v3 = vld [vmem:[#allocation9 + $0x5a8] ss:$16 sps:$4 sm:$0xff]  }
 0x1ad   :  { %2521 = vmatpush2.bf16.msra.mxu0 %v3863_v4  ;;  %v3950_v4 = vld [vmem:[#allocation9 + $0x7a8] ss:$16 sps:$4 sm:$0xff]  }
 0x1ae   :  { %2562 = vmatpush2.bf16.msra.mxu1 %v3866_v5  ;;  %2522 = vmatprep.subr.bf16.mxu0 %v3871_v10  ;;  %v3955_v5 = vld [vmem:[#allocation9 + $0x58c] ss:$16 sps:$4 sm:$0xff]  }
 0x1af   :  { %2563 = vmatprep.subr.bf16.mxu1 %v3874_v17  ;;  %v3958_v10 = vld [vmem:[#allocation9 + $0x78c] ss:$16 sps:$4 sm:$0xff]   ;;  %v3953_v17 = vld [vmem:[#allocation9 + $0x588] ss:$16 sps:$4 sm:$0xff]  }
 0x1b1   :  { %2523 = vmatpush2.bf16.msra.mxu0 %v3869_v11  ;;  %v3956_v11 = vld [vmem:[#allocation9 + $0x788] ss:$16 sps:$4 sm:$0xff]  }
 0x1b2   :  { %2564 = vmatpush2.bf16.msra.mxu1 %v3872_v9  ;;  %2524 = vmatprep.subr.bf16.mxu0 %v3877_v19  ;;  %v3961_v9 = vld [vmem:[#allocation9 + $0x56c] ss:$16 sps:$4 sm:$0xff]  }
 0x1b3   :  { %2565 = vmatprep.subr.bf16.mxu1 %v3880_v20  ;;  %v3964_v19 = vld [vmem:[#allocation9 + $0x76c] ss:$16 sps:$4 sm:$0xff]   ;;  %v3959_v20 = vld [vmem:[#allocation9 + $0x568] ss:$16 sps:$4 sm:$0xff]  }
 0x1b5   :  { %2525 = vmatpush2.bf16.msra.mxu0 %v3875_v21  ;;  %v3962_v21 = vld [vmem:[#allocation9 + $0x768] ss:$16 sps:$4 sm:$0xff]  }
 0x1b6   :  { %2566 = vmatpush2.bf16.msra.mxu1 %v3878_v12  ;;  %2526 = vmatprep.subr.bf16.mxu0 %v3883_v22  ;;  %v3967_v12 = vld [vmem:[#allocation9 + $0x54c] ss:$16 sps:$4 sm:$0xff]  }
 0x1b7   :  { %2567 = vmatprep.subr.bf16.mxu1 %v3886_v23  ;;  %v3970_v22 = vld [vmem:[#allocation9 + $0x74c] ss:$16 sps:$4 sm:$0xff]   ;;  %v3965_v23 = vld [vmem:[#allocation9 + $0x548] ss:$16 sps:$4 sm:$0xff]  }
 0x1b9   :  { %2527 = vmatpush2.bf16.msra.mxu0 %v3881_v24  ;;  %v3968_v24 = vld [vmem:[#allocation9 + $0x748] ss:$16 sps:$4 sm:$0xff]  }
 0x1ba   :  { %2568 = vmatpush2.bf16.msra.mxu1 %v3884_v25  ;;  %2578 = vmatprep.subr.bf16.mxu0 %v3889_v26  ;;  %v3973_v25 = vld [vmem:[#allocation9 + $0x52c] ss:$16 sps:$4 sm:$0xff]  }
 0x1bb   :  { %2619 = vmatprep.subr.bf16.mxu1 %v3892_v27  ;;  %v3976_v26 = vld [vmem:[#allocation9 + $0x72c] ss:$16 sps:$4 sm:$0xff]   ;;  %v3971_v27 = vld [vmem:[#allocation9 + $0x528] ss:$16 sps:$4 sm:$0xff]  }
 0x1bc   :  { %2529 = vmatmul.mubr.bf16.vlgmr.msra.gmra.mxu0 %v4303_v39  ;;  %v3902_v39 = vld [vmem:[#allocation9 + $0x6a8] ss:$16 sps:$4 sm:$0xff]  }
 0x1bd   :  { %2570 = vmatmul.mubr.bf16.vlgmr.msra.gmra.mxu1 %v4299_v35  ;;  %2579 = vmatpush1.bf16.msra.mxu0 %v3887_v28  ;;  %v3910_v35 = vld [vmem:[#allocation9 + $0x68c] ss:$16 sps:$4 sm:$0xff]   ;;  %v3974_v28 = vld [vmem:[#allocation9 + $0x728] ss:$16 sps:$4 sm:$0xff]  }
 0x1be   :  { %2610 = vmatprep.mubr.bf16.mxu0 %v4319_v31  ;;  %2620 = vmatpush1.bf16.msra.mxu1 %v3890_v7  ;;  %v3908_v31 = vld [vmem:[#allocation9 + $0x688] ss:$16 sps:$4 sm:$0xff]   ;;  %v3979_v7 = vld [vmem:[#allocation9 + $0x50c] ss:$16 sps:$4 sm:$0xff]  }
 0x1bf   :  { %2651 = vmatprep.mubr.bf16.mxu1 %v4321_v37  ;;  %2580 = vmatprep.subr.bf16.mxu0 %v3895_v36  ;;  %v3911_v37 = vld [vmem:[#allocation9 + $0x468] ss:$16 sps:$4 sm:$0xff]   ;;  %v3982_v36 = vld [vmem:[#allocation9 + $0x70c] ss:$16 sps:$4 sm:$0xff]  }
 0x1c0   :  { %2621 = vmatprep.subr.bf16.mxu1 %v3898_v29  ;;  %v3977_v29 = vld [vmem:[#allocation9 + $0x508] ss:$16 sps:$4 sm:$0xff]  }
 0x1c1   :  { %2581 = vmatpush1.bf16.msra.mxu0 %v3893_v30  ;;  %v3980_v30 = vld [vmem:[#allocation9 + $0x708] ss:$16 sps:$4 sm:$0xff]  }
 0x1c2   :  { %2622 = vmatpush1.bf16.msra.mxu1 %v3896_v40  ;;  %2582 = vmatprep.subr.bf16.mxu0 %v3901_v32  ;;  %v3983_v40 = vld [vmem:[#allocation11 + $0x78] sm:$0xff]  }
 0x1c3   :  { %2623 = vmatprep.subr.bf16.mxu1 %v3904_v33  ;;  %v3984_v32 = vld [vmem:[#allocation11 + $0x38] sm:$0xff]   ;;  %v3985_v33 = vld [vmem:[#allocation11 + $0x70] sm:$0xff]  }
 0x1c5   :  { %2583 = vmatpush1.bf16.msra.mxu0 %v3899_v34 }
 0x1c6   :  { %2624 = vmatpush1.bf16.msra.mxu1 %v3902_v39  ;;  %2584 = vmatprep.subr.bf16.mxu0 %v3907_v38  ;;  %v3986_v38 = vld [vmem:[#allocation11 + $0x30] sm:$0xff]  }
 0x1c7   :  { %2625 = vmatprep.subr.bf16.mxu1 %v3910_v35 }
 0x1c9   :  { %2585 = vmatpush1.bf16.msra.mxu0 %v3905_v0  ;;  %v3987_v0 = vld [vmem:[#allocation11 + $0x68] sm:$0xff]  }
 0x1ca   :  { %2626 = vmatpush1.bf16.msra.mxu1 %v3908_v31  ;;  %2586 = vmatprep.subr.bf16.mxu0 %v3913_v41 }
 0x1cb   :  { %2627 = vmatprep.subr.bf16.mxu1 %v3916_v42 }
 0x1cd   :  { %2587 = vmatpush1.bf16.msra.mxu0 %v3911_v37  ;;  %v3988_v37 = vld [vmem:[#allocation11 + $0x28] sm:$0xff]  }
 0x1ce   :  { %2628 = vmatpush1.bf16.msra.mxu1 %v3914_v43  ;;  %2588 = vmatprep.subr.bf16.mxu0 %v3919_v44  ;;  %v3989_v44 = vld [vmem:[#allocation11 + $0x60] sm:$0xff]  }
 0x1cf   :  { %2629 = vmatprep.subr.bf16.mxu1 %v3922_v45 }
 0x1d1   :  { %2589 = vmatpush1.bf16.msra.mxu0 %v3917_v46  ;;  %v3999_v46 = vld [vmem:[#allocation11 + $0xf8] sm:$0xff]  }
 0x1d2   :  { %2630 = vmatpush1.bf16.msra.mxu1 %v3920_v47  ;;  %2590 = vmatprep.subr.bf16.mxu0 %v3925_v48  ;;  %v4001_v47 = vld [vmem:[#allocation11 + $0xf0] sm:$0xff]   ;;  %v3991_v48 = vld [vmem:[#allocation11 + $0x58] sm:$0xff]  }
 0x1d3   :  { %2631 = vmatprep.subr.bf16.mxu1 %v3928_v49  ;;  %v4002_v49 = vld [vmem:[#allocation11 + $0xb0] sm:$0xff]  }
 0x1d5   :  { %2591 = vmatpush1.bf16.msra.mxu0 %v3923_v50  ;;  %v4003_v50 = vld [vmem:[#allocation11 + $0xe8] sm:$0xff]  }
 0x1d6   :  { %2632 = vmatpush1.bf16.msra.mxu1 %v3926_v51  ;;  %2592 = vmatprep.subr.bf16.mxu0 %v3931_v52  ;;  %v3992_v51 = vld [vmem:[#allocation11 + $0x18] sm:$0xff]   ;;  %v3993_v52 = vld [vmem:[#allocation11 + $0x50] sm:$0xff]  }
 0x1d7   :  { %2633 = vmatprep.subr.bf16.mxu1 %v3934_v53  ;;  %v4004_v53 = vld [vmem:[#allocation11 + $0xa8] sm:$0xff]  }
 0x1d9   :  { %2593 = vmatpush1.bf16.msra.mxu0 %v3929_v54  ;;  %v4005_v54 = vld [vmem:[#allocation11 + $0xe0] sm:$0xff]  }
 0x1da   :  { %2634 = vmatpush1.bf16.msra.mxu1 %v3932_v55  ;;  %2594 = vmatprep.subr.bf16.mxu0 %v3937_v56  ;;  %v3994_v55 = vld [vmem:[#allocation11 + $0x10] sm:$0xff]   ;;  %v3995_v56 = vld [vmem:[#allocation11 + $0x48] sm:$0xff]  }
 0x1db   :  { %2635 = vmatprep.subr.bf16.mxu1 %v3940_v57  ;;  %v4006_v57 = vld [vmem:[#allocation11 + $0xa0] sm:$0xff]  }
 0x1dd   :  { %2595 = vmatpush2.bf16.msra.mxu0 %v3935_v58  ;;  %v4007_v58 = vld [vmem:[#allocation11 + $0xd8] sm:$0xff]  }
 0x1de   :  { %2636 = vmatpush2.bf16.msra.mxu1 %v3938_v59  ;;  %2596 = vmatprep.subr.bf16.mxu0 %v3943_v60  ;;  %v3996_v59 = vld [vmem:[#allocation11 + $0x8] sm:$0xff]   ;;  %v3997_v60 = vld [vmem:[#allocation11 + $0x40] sm:$0xff]  }
 0x1df   :  { %2637 = vmatprep.subr.bf16.mxu1 %v3946_v61  ;;  %v4008_v61 = vld [vmem:[#allocation11 + $0x98] sm:$0xff]  }
 0x1e1   :  { %2597 = vmatpush2.bf16.msra.mxu0 %v3941_v62  ;;  %v3998_v62 = vld [vmem:[#allocation11] sm:$0xff]  }
 0x1e2   :  { %2638 = vmatpush2.bf16.msra.mxu1 %v3944_v63  ;;  %2598 = vmatprep.subr.bf16.mxu0 %v3949_v1  ;;  %v4346_v63 = vld [vmem:[%s4373_s4] sm:$0xf] }
 0x1e3   :  { %2639 = vmatprep.subr.bf16.mxu1 %v3952_v2  ;;  %v1035_v1 = vrot.slane %v4346_v63, %v712_v13  ;;  %v1039_v2 = vrot.slane %v4346_v63, %v716_v15  ;;  %v4012_v15 = vld [vmem:[#allocation11 + $0x88] sm:$0xff]  }
 0x1e5   :  { %2599 = vmatpush2.bf16.msra.mxu0 %v3947_v3 }
 0x1e6   :  { %2640 = vmatpush2.bf16.msra.mxu1 %v3950_v4  ;;  %2600 = vmatprep.subr.bf16.mxu0 %v3955_v5 }
 0x1e7   :  { %2641 = vmatprep.subr.bf16.mxu1 %v3958_v10 }
 0x1e9   :  { %2601 = vmatpush2.bf16.msra.mxu0 %v3953_v17  ;;  %v4009_v17 = vld [vmem:[#allocation11 + $0xd0] sm:$0xff]  }
 0x1ea   :  { %2642 = vmatpush2.bf16.msra.mxu1 %v3956_v11  ;;  %2602 = vmatprep.subr.bf16.mxu0 %v3961_v9 }
 0x1eb   :  { %2643 = vmatprep.subr.bf16.mxu1 %v3964_v19 }
 0x1ed   :  { %2603 = vmatpush2.bf16.msra.mxu0 %v3959_v20  ;;  %v4010_v20 = vld [vmem:[#allocation11 + $0x90] sm:$0xff]  }
 0x1ee   :  { %2644 = vmatpush2.bf16.msra.mxu1 %v3962_v21  ;;  %2604 = vmatprep.subr.bf16.mxu0 %v3967_v12 }
 0x1ef   :  { %2645 = vmatprep.subr.bf16.mxu1 %v3970_v22 }
 0x1f1   :  { %2605 = vmatpush2.bf16.msra.mxu0 %v3965_v23 }
 0x1f2   :  { %2646 = vmatpush2.bf16.msra.mxu1 %v3968_v24  ;;  %2606 = vmatprep.subr.bf16.mxu0 %v3973_v25  ;;  %v4011_v24 = vld [vmem:[#allocation11 + $0xc8] sm:$0xff]  }
 0x1f3   :  { %2647 = vmatprep.subr.bf16.mxu1 %v3976_v26 }
 0x1f5   :  { %2607 = vmatpush2.bf16.msra.mxu0 %v3971_v27 }
 0x1f6   :  { %2648 = vmatpush2.bf16.msra.mxu1 %v3974_v28  ;;  %2608 = vmatprep.subr.bf16.mxu0 %v3979_v7 }
 0x1f7   :  { %2649 = vmatprep.subr.bf16.mxu1 %v3982_v36 }
 0x1f9   :  { %2609 = vmatpush2.bf16.msra.mxu0 %v3977_v29  ;;  %v4013_v29 = vld [vmem:[#allocation11 + $0xc0] sm:$0xff]  }
 0x1fa   :  { %2650 = vmatpush2.bf16.msra.mxu1 %v3980_v30  ;;  %3510 = vmatprep.subr.bf16.mxu0 %v3983_v40  ;;  %v4014_v40 = vld [vmem:[#allocation11 + $0x80] sm:$0xff]  }
 0x1fb   :  { %3532 = vmatprep.subr.bf16.mxu1 %v3999_v46  ;;  %v4019_v46 = vld [vmem:[#allocation12 + $0x18] sm:$0xff]  }
 0x1fc   :  { %2611 = vmatmul.mubr.bf16.vlgmr.msra.gmra.mxu0 %v4331_v8  ;;  %v2366_v34 = vpop.f32.mrf.mxu0  ;;  %v2407_v39 = vpop.f32.mrf.mxu1  ;;  %v4000_v8 = vld [vmem:[#allocation11 + $0xb8] sm:$0xff]  }
 0x1fd   :  { %2652 = vmatmul.mubr.bf16.vlgmr.msra.gmra.mxu1 %v4329_v18  ;;  %3511 = vmatpush3.bf16.msra.mxu0 %v3984_v32  ;;  %v3990_v18 = vld [vmem:[#allocation11 + $0x20] sm:$0xff]   ;;  %v2367_v3 = vadd.f32 %v2366_v34, %v1035_v1 }
 0x1fe   :  { %v2368_v35 = vpop.f32.mrf.mxu0  ;;  %3512 = vmatprep.subr.bf16.mxu0 %v3985_v33  ;;  %v2409_v31 = vpop.f32.mrf.mxu1  ;;  %3533 = vmatpush3.bf16.msra.mxu1 %v4000_v8  ;;  %v1043_v8 = vrot.slane %v4346_v63, %v720_v14 }
 0x1ff   :  { %3534 = vmatprep.subr.bf16.mxu1 %v4001_v47  ;;  %v2369_v4 = vadd.f32 %v2368_v35, %v1039_v2  ;;  %v2408_v5 = vadd.f32 %v2407_v39, %v2367_v3  ;;  %v1047_v47 = vrot.slane %v4346_v63, %v724_v16  ;;  %v4020_v2 = vld [vmem:[#allocation12 + $0x10] sm:$0xff]  }
 0x200   :  { %v2370_v41 = vpop.f32.mrf.mxu0  ;;  %v2411_v42 = vpop.f32.mrf.mxu1 }
 0x201   :  { %3513 = vmatpush3.bf16.msra.mxu0 %v3986_v38  ;;  %v2410_v11 = vadd.f32 %v2409_v31, %v2369_v4  ;;  %v4015_v42 = vld [vmem:[#allocation12 + $0x38] sm:$0xff]  }
 0x202   :  { %v2371_v43 = vpop.f32.mrf.mxu0  ;;  %3514 = vmatprep.subr.bf16.mxu0 %v3987_v0  ;;  %v2412_v45 = vpop.f32.mrf.mxu1  ;;  %3535 = vmatpush3.bf16.msra.mxu1 %v4002_v49 }
 0x203   :  { %3536 = vmatprep.subr.bf16.mxu1 %v4003_v50  ;;  %v4016_v43 = vld [vmem:[#allocation12 + $0x30] sm:$0xff]   ;;  %v4018_v45 = vld [vmem:[#allocation12 + $0x20] sm:$0xff]  }
 0x205   :  { %3515 = vmatpush3.bf16.msra.mxu0 %v3988_v37  ;;  %v4190_v37 = vmov 0.0  }
 0x206   :  { %3516 = vmatprep.subr.bf16.mxu0 %v3989_v44  ;;  %3537 = vmatpush3.bf16.msra.mxu1 %v4004_v53  ;;  %v4017_v44 = vld [vmem:[#allocation12 + $0x28] sm:$0xff]  }
 0x207   :  { %3538 = vmatprep.subr.bf16.mxu1 %v4005_v54 }
 0x209   :  { %3517 = vmatpush3.bf16.msra.mxu0 %v3990_v18 }
 0x20a   :  { %3518 = vmatprep.subr.bf16.mxu0 %v3991_v48  ;;  %3539 = vmatpush3.bf16.msra.mxu1 %v4006_v57 }
 0x20b   :  { %3540 = vmatprep.subr.bf16.mxu1 %v4007_v58 }
 0x20d   :  { %3519 = vmatpush3.bf16.msra.mxu0 %v3992_v51 }
 0x20e   :  { %3520 = vmatprep.subr.bf16.mxu0 %v3993_v52  ;;  %3541 = vmatpush3.bf16.msra.mxu1 %v4008_v61 }
 0x20f   :  { %3542 = vmatprep.subr.bf16.mxu1 %v4009_v17 }
 0x211   :  { %3521 = vmatpush3.bf16.msra.mxu0 %v3994_v55 }
 0x212   :  { %3522 = vmatprep.subr.bf16.mxu0 %v3995_v56  ;;  %3543 = vmatpush3.bf16.msra.mxu1 %v4010_v20 }
 0x213   :  { %3544 = vmatprep.subr.bf16.mxu1 %v4011_v24 }
 0x215   :  { %3523 = vmatpush3.bf16.msra.mxu0 %v3996_v59 }
 0x216   :  { %3524 = vmatprep.subr.bf16.mxu0 %v3997_v60  ;;  %3545 = vmatpush3.bf16.msra.mxu1 %v4012_v15 }
 0x217   :  { %3546 = vmatprep.subr.bf16.mxu1 %v4013_v29 }
 0x219   :  { %3525 = vmatpush3.bf16.msra.mxu0 %v3998_v62 }
 0x21a   :  { %3547 = vmatpush3.bf16.msra.mxu1 %v4014_v40  ;;  %3563 = vmatprep.subr.bf16.mxu0 %v4190_v37 }
 0x23c   :  { %v2448_v10 = vpop.f32.mrf.mxu0  ;;  %v2489_v19 = vpop.f32.mrf.mxu1 }
 0x23d   :  { %v2449_v9 = vadd.f32 %v2448_v10, %v2408_v5  ;;  %v4021_v10 = vld [vmem:[#allocation12 + $0x8] sm:$0xff]  }
 0x23e   :  { %v2450_v21 = vpop.f32.mrf.mxu0  ;;  %v2491_v23 = vpop.f32.mrf.mxu1 }
 0x23f   :  { %v2490_v12 = vadd.f32 %v2489_v19, %v2449_v9  ;;  %v2451_v22 = vadd.f32 %v2450_v21, %v2410_v11  ;;  %v4022_v11 = vld [vmem:[#allocation12] sm:$0xff]   ;;  %v3468_v9 = vld [vmem:[%s4375_s6] ss:$0 sm:$0xff]  ;;  %s4192_s6 = smov [#allocation14]  }
 0x240   :  { %v2452_v13 = vpop.f32.mrf.mxu0  ;;  %v2493_v26 = vpop.f32.mrf.mxu1  ;;  %s3136_s23 = sshll.u32 %s4192_s6, 4  ;;  %s3137_s23 = int_to_ptr.vmem [resolvable:$true] %s3136_s23 }
 0x241   :  { %v2492_v25 = vadd.f32 %v2491_v23, %v2451_v22  ;;  %v2660_v27 = vmax.f32 %v2490_v12, 0.0  ;;  %v3501_v26 = vld [vmem:[%s4377_s8] ss:$0 sm:$0xff]  ;;  %s4147_s24 = scalar_lea.vmem %s3137_s23, 128  ;;  %p4152_p3 = scmp.lt.s32.totalorder %s3137_s23, %s3137_s23 }
 0x242   :  { %v2453_v28 = vpop.f32.mrf.mxu0  ;;  %v2494_v36 = vpop.f32.mrf.mxu1  ;;  %p4148_p2 = scmp.ne.s32.totalorder %s3137_s23, %s4147_s24  ;;  %p4153_p4 = scmp.lt.s32.totalorder %s4147_s24, %s4147_s24 }
 0x243   :  { %v2661_v7 = vmax.f32 %v2492_v25, 0.0  ;;  %v2664_v32 = vpack.c.bf16 %v2660_v27, %v2660_v27 }
 0x244   :  { %p4154_p5 = por %p4153_p4, %p4152_p3 }
 0x245   :  { %v2665_v30 = vpack.c.bf16 %v2661_v7, %v2661_v7 }
 0x246   :  { %p4155_p6 = pnand %p4154_p5, %p4148_p2 }
 0x247   :  { %2963 = vmatprep.mubr.bf16.mxu0 %v2665_v30 }
 0x248   :  { %2964 = vmatmul.mubr.bf16.vlgmr.msra.gmra.mxu0 %v2664_v32 }
 0x249   :  { %3564 = vmatpush3.bf16.msra.mxu0 %v4015_v42  ;;  %3579 = vmatprep.mubr.msk.bf16.mxu0 %vm4191_vm0, %v4190_v37 }
 0x24a   :  { %3565 = vmatprep.subr.bf16.mxu0 %v4190_v37 }
 0x24d   :  { %3566 = vmatpush3.bf16.msra.mxu0 %v4016_v43 }
 0x24e   :  { %3567 = vmatprep.subr.bf16.mxu0 %v4190_v37 }
 0x251   :  { %3568 = vmatpush3.bf16.msra.mxu0 %v4017_v44 }
 0x252   :  { %3569 = vmatprep.subr.bf16.mxu0 %v4190_v37 }
 0x255   :  { %3570 = vmatpush3.bf16.msra.mxu0 %v4018_v45 }
 0x256   :  { %3571 = vmatprep.subr.bf16.mxu0 %v4190_v37 }
 0x259   :  { %3572 = vmatpush3.bf16.msra.mxu0 %v4019_v46 }
 0x25a   :  { %3573 = vmatprep.subr.bf16.mxu0 %v4190_v37 }
 0x25d   :  { %3574 = vmatpush3.bf16.msra.mxu0 %v4020_v2 }
 0x25e   :  { %3575 = vmatprep.subr.bf16.mxu0 %v4190_v37 }
 0x261   :  { %3576 = vmatpush3.bf16.msra.mxu0 %v4021_v10 }
 0x262   :  { %3577 = vmatprep.subr.bf16.mxu0 %v4190_v37 }
 0x265   :  { %3578 = vmatpush3.bf16.msra.mxu0 %v4022_v11 }
 0x27c   :  { %v2530_v33 = vpop.f32.mrf.mxu0 }
 0x27d   :  { %v2571_v34 = vpop.f32.mrf.mxu1  ;;  %v2531_v18 = vadd.f32 %v2530_v33, %v1043_v8 }
 0x27e   :  { %v2532_v39 = vpop.f32.mrf.mxu0 }
 0x27f   :  { %v2573_v38 = vpop.f32.mrf.mxu1  ;;  %v2533_v48 = vadd.f32 %v2532_v39, %v1047_v47  ;;  %v2572_v49 = vadd.f32 %v2571_v34, %v2531_v18 }
 0x280   :  { %v2534_v35 = vpop.f32.mrf.mxu0 }
 0x281   :  { %v2575_v0 = vpop.f32.mrf.mxu1  ;;  %v2574_v51 = vadd.f32 %v2573_v38, %v2533_v48 }
 0x282   :  { %v2535_v31 = vpop.f32.mrf.mxu0 }
 0x283   :  { %v2576_v41 = vpop.f32.mrf.mxu1 }
 0x2bc   :  { %v2612_v50 = vpop.f32.mrf.mxu0 }
 0x2bd   :  { %v2613_v52 = vadd.f32 %v2612_v50, %v2572_v49  ;;  %v2653_v53 = vpop.f32.mrf.mxu1 }
 0x2be   :  { %v2614_v54 = vpop.f32.mrf.mxu0 }
 0x2bf   :  { %v2654_v55 = vadd.f32 %v2653_v53, %v2613_v52  ;;  %v2615_v56 = vadd.f32 %v2614_v54, %v2574_v51  ;;  %v2655_v57 = vpop.f32.mrf.mxu1 }
 0x2c0   :  { %v2616_v58 = vpop.f32.mrf.mxu0 }
 0x2c1   :  { %v2656_v59 = vadd.f32 %v2655_v57, %v2615_v56  ;;  %v2657_v60 = vpop.f32.mrf.mxu1  ;;  %v2662_v61 = vmax.f32 %v2654_v55, 0.0 }
 0x2c2   :  { %v2617_v14 = vpop.f32.mrf.mxu0 }
 0x2c3   :  { %v2663_v62 = vmax.f32 %v2656_v59, 0.0  ;;  %v2658_v6 = vpop.f32.mrf.mxu1  ;;  %v2666_v16 = vpack.c.bf16 %v2662_v61, %v2662_v61 }
 0x2c5   :  { %v2667_v1 = vpack.c.bf16 %v2663_v62, %v2663_v62 }
 0x2c7   :  { %3003 = vmatprep.mubr.bf16.mxu1 %v2667_v1 }
 0x2c8   :  { %3004 = vmatmul.mubr.bf16.vlgmr.msra.gmra.mxu1 %v2666_v16 }
 0x308   :  { %v3526_v63 = vpop.f32.mrf.mxu0 }
 0x30a   :  { %v3527_v3 = vpop.f32.mrf.mxu0 }
 0x30b   :  { %v3528_v4 = vadd.f32 %v3527_v3, %v3526_v63 }
 0x30c   :  { %v3529_v5 = vpop.f32.mrf.mxu0 }
 0x30d   :  { %v2966_v21 = vadd.f32 %v3528_v4, %v3468_v9 }
 0x30e   :  { %v3530_v17 = vpop.f32.mrf.mxu0 }
 0x388   :  { %v3548_v19 = vpop.f32.mrf.mxu1 }
 0x38a   :  { %v3549_v20 = vpop.f32.mrf.mxu1 }
 0x38b   :  { %v3550_v12 = vadd.f32 %v3549_v20, %v3548_v19 }
 0x38c   :  { %v3551_v22 = vpop.f32.mrf.mxu1 }
 0x38d   :  { %v3006_v23 = vadd.f32 %v3550_v12, %v2966_v21 }
 0x38e   :  { %v3552_v13 = vpop.f32.mrf.mxu1 }
 0x38f   :  { %v3011_v24 = vmax.f32 %v3006_v23, 0.0 }
 0x391   :  { %v3012_v25 = vpack.c.bf16 %v3011_v24, %v3011_v24 }
 0x393   :  { %3580 = vmatmul.mubr.bf16.vlgmr.msra.gmra.mxu0 %v3012_v25 }
 0x453   :  { %v3118_v15 = vpop.f32.mrf.mxu0 }
 0x454   :  { %v3119_v27 = vadd.f32 %v3501_v26, %v3118_v15 }
 0x455   :  { %v3581_v28 = vpop.f32.mrf.mxu0 }
 0x456   :  { %v3124_v7 = vsub.f32 0.0, %v3119_v27 }
 0x457   :  { %v3121_v36 = vpop.f32.mrf.mxu0 }
 0x458   :  { %v3125_v29 = vmul.f32 1.442695, %v3124_v7 }
 0x459   :  { %v3582_v30 = vpop.f32.mrf.mxu0 }
 0x45a   :  { %4023 = vpow2.f32 %v3125_v29 }
 0x467   :  { %v4024_v40 = vpop.eup %4023 }
 0x468   :  { %v3127_v32 = vadd.f32 1.0, %v4024_v40 }
 0x46a   :  { %4025 = vrcp.f32 %v3127_v32 }
 0x477   :  { %v4026_v33 = vpop.eup %4025 }
 0x478   :  { %3129 = vst [vmem:[#allocation14] sm:$0xff] %v4026_v33 }
 0x479   :  { %4158 = shalt.err (!%p4155_p6)
}
 0x47a   :  { %3139 = dma.vmem_to_hbm [thread:$0]  %s3137_s23, 128, %s4378_s9, [#allocation5]  }
 0x47b   :  { %4175 = dma.done.wait [#allocation5], 128  }
 0x47c   :  { %4176 = vsyncadd [#allocation5], 4294967168 }
 0x47d   :  { %3143 = vsyncpa [#allocation4], 1 }
 0x47e   :  { %3144 = vsyncpa [#allocation7], 1 }
 0x47f   :  { %3145 = vsyncpa [#allocation10], 1 }
 0x480   :  { %3146 = vsyncpa [#allocation13], 1 }
 0x481   :  { %3147 = vsyncpa [#allocation5], 1 }

</bundles_post_ra>
